<compile_context>
chip_gen: v7x
topology: tpu7x:2x2x1
jax: 0.10.0
libtpu: 0.0.40
codegen_flags: <defaults>
</compile_context>

<pallas_src>
import jax
import jax.numpy as jnp
from jax.experimental import pallas as pl
from jax.experimental.pallas import tpu as pltpu

EMBED = 64
HIDDEN = 128
NUM_LAYERS = 2
PROJ = HIDDEN // NUM_LAYERS          # 64 (proj_size)
VOCAB = 25                           # len(vocab) stand-in
LEAKY_SLOPE = 0.01                   # nn.LeakyReLU default
MM_DTYPE = jnp.bfloat16              # MXU operand dtype (f32 accumulate)


# ----------------------------------------------------------------------------
# Fused kernel: embedding'd inputs -> 2-layer BiLSTM(proj) x2 streams -> mean
# over N -> elementwise product -> MLP head -> sigmoid.  Everything in VMEM.
# ----------------------------------------------------------------------------
def _bilstm_demo_kernel(
    pa_x_ref, ep_x_ref,
    pa_wih0_ref, pa_b0_ref, pa_wih1_ref, pa_b1_ref, pa_whh_ref, pa_whr_ref,
    ep_wih0_ref, ep_b0_ref, ep_wih1_ref, ep_b1_ref, ep_whh_ref, ep_whr_ref,
    hw1_ref, hb1_ref, hw2_ref, hb2_ref,
    out_ref):
  H, P = HIDDEN, PROJ
  T, N, _ = pa_x_ref.shape

  def mm(a, w_ref, idx=None):
    w = w_ref[...] if idx is None else w_ref[idx]
    return jnp.dot(a.astype(MM_DTYPE), w, preferred_element_type=jnp.float32)

  def run_dir(gpre, whh_ref, whr_ref, widx, reverse):
    # gpre: (T, N, 4H) f32 -- precomputed x@W_ih + (b_ih+b_hh)
    h = jnp.zeros((N, P), jnp.float32)
    c = jnp.zeros((N, H), jnp.float32)
    outs = [None] * T
    order = range(T - 1, -1, -1) if reverse else range(T)
    for t in order:                                   # T=2: unrolled at trace
      g = gpre[t] + mm(h, whh_ref, widx)              # (N, 4H)
      i_g = jax.nn.sigmoid(g[:, 0:H])
      f_g = jax.nn.sigmoid(g[:, H:2 * H])
      g_g = jnp.tanh(g[:, 2 * H:3 * H])
      o_g = jax.nn.sigmoid(g[:, 3 * H:4 * H])
      c = f_g * c + i_g * g_g                         # (N, H) f32
      h = mm(o_g * jnp.tanh(c), whr_ref, widx)        # (N, P)
      outs[t] = h
    return jnp.stack(outs, axis=0)                    # (T, N, P)

  def bilstm_stream(x_ref, wih0_ref, b0_ref, wih1_ref, b1_ref,
                    whh_ref, whr_ref):
    x = x_ref[...]                                    # (T, N, E) f32
    # layer 0: one matmul covers all timesteps and BOTH directions
    g0 = (mm(x.reshape(T * N, -1), wih0_ref)
          + b0_ref[...]).reshape(T, N, 8 * H)         # (T, N, 1024)
    y_f = run_dir(g0[..., :4 * H], whh_ref, whr_ref, 0, reverse=False)
    y_b = run_dir(g0[..., 4 * H:], whh_ref, whr_ref, 1, reverse=True)
    y = jnp.concatenate([y_f, y_b], axis=-1)          # (T, N, 2P=128)
    # layer 1
    g1 = (mm(y.reshape(T * N, 2 * P), wih1_ref)
          + b1_ref[...]).reshape(T, N, 8 * H)
    z_f = run_dir(g1[..., :4 * H], whh_ref, whr_ref, 2, reverse=False)
    z_b = run_dir(g1[..., 4 * H:], whh_ref, whr_ref, 3, reverse=True)
    z = jnp.concatenate([z_f, z_b], axis=-1)          # (T, N, 128)
    return jnp.mean(z, axis=1)                        # (T, 128)  (mean over dim=1)

  pa_m = bilstm_stream(pa_x_ref, pa_wih0_ref, pa_b0_ref, pa_wih1_ref,
                       pa_b1_ref, pa_whh_ref, pa_whr_ref)
  ep_m = bilstm_stream(ep_x_ref, ep_wih0_ref, ep_b0_ref, ep_wih1_ref,
                       ep_b1_ref, ep_whh_ref, ep_whr_ref)

  x = pa_m * ep_m                                     # (T=2, 128)
  hdn = mm(x, hw1_ref) + hb1_ref[...]                 # (2, 64)
  hdn = jnp.where(hdn > 0, hdn, LEAKY_SLOPE * hdn)    # LeakyReLU
  # TODO(synk): nn.Dropout(p=0.1) omitted (eval-mode identity).
  y = mm(hdn, hw2_ref) + hb2_ref[...]                 # (2, 1)
  out_ref[...] = jax.nn.sigmoid(y)


# ----------------------------------------------------------------------------
# Parameter init (PyTorch layout) + one-time preparation (transpose/stack/cast)
# ----------------------------------------------------------------------------
def init_lstm_dir(key, input_size, hidden, proj):
  k = 1.0 / jnp.sqrt(jnp.float32(hidden))
  ks = jax.random.split(key, 5)
  w_ih = jax.random.uniform(ks[0], (4 * hidden, input_size), jnp.float32, -k, k)
  w_hh = jax.random.uniform(ks[1], (4 * hidden, proj), jnp.float32, -k, k)
  b_ih = jax.random.uniform(ks[2], (4 * hidden,), jnp.float32, -k, k)
  b_hh = jax.random.uniform(ks[3], (4 * hidden,), jnp.float32, -k, k)
  w_hr = jax.random.uniform(ks[4], (proj, hidden), jnp.float32, -k, k)
  return (w_ih, w_hh, b_ih, b_hh, w_hr)


def init_bilstm(key, embed, hidden, proj, num_layers):
  layers = []
  for layer in range(num_layers):
    in_size = embed if layer == 0 else 2 * proj
    key, kf, kb = jax.random.split(key, 3)
    layers.append((init_lstm_dir(kf, in_size, hidden, proj),
                   init_lstm_dir(kb, in_size, hidden, proj)))
  return layers


def prepare_stream(layer_params):
  """PyTorch-layout 2-layer bi-LSTM params -> fused-kernel layout (done once)."""
  (f0, b0), (f1, b1) = layer_params

  def wih_stack(fp, bp):      # (In, 8H): fwd gates | bwd gates
    return jnp.concatenate([fp[0].T, bp[0].T], axis=1).astype(MM_DTYPE)

  def bias_stack(fp, bp):     # (1, 8H): (b_ih+b_hh) fwd | bwd
    return jnp.concatenate([fp[2] + fp[3], bp[2] + bp[3]]).reshape(1, -1)

  whh = jnp.stack([f0[1].T, b0[1].T, f1[1].T, b1[1].T]).astype(MM_DTYPE)  # (4,P,4H)
  whr = jnp.stack([f0[4].T, b0[4].T, f1[4].T, b1[4].T]).astype(MM_DTYPE)  # (4,H,P)
  return dict(wih0=wih_stack(f0, b0), b0=bias_stack(f0, b0),
              wih1=wih_stack(f1, b1), b1=bias_stack(f1, b1),
              whh=whh, whr=whr)


def init_params(key):
  k_emb, k_lp, k_le, k1, k2, k3, k4 = jax.random.split(key, 7)
  kw1 = 1.0 / jnp.sqrt(jnp.float32(HIDDEN))
  kw2 = 1.0 / jnp.sqrt(jnp.float32(HIDDEN // 2))
  w1 = jax.random.uniform(k1, (HIDDEN // 2, HIDDEN), jnp.float32, -kw1, kw1)
  b1 = jax.random.uniform(k2, (HIDDEN // 2,), jnp.float32, -kw1, kw1)
  w2 = jax.random.uniform(k3, (1, HIDDEN // 2), jnp.float32, -kw2, kw2)
  b2 = jax.random.uniform(k4, (1,), jnp.float32, -kw2, kw2)
  return {
      "embedding": jax.random.normal(k_emb, (VOCAB, EMBED), jnp.float32),
      "para": prepare_stream(init_bilstm(k_lp, EMBED, HIDDEN, PROJ, NUM_LAYERS)),
      "epi": prepare_stream(init_bilstm(k_le, EMBED, HIDDEN, PROJ, NUM_LAYERS)),
      "hw1": w1.T.astype(MM_DTYPE), "hb1": b1.reshape(1, -1),
      "hw2": w2.T.astype(MM_DTYPE), "hb2": b2.reshape(1, -1),
  }


# ----------------------------------------------------------------------------
# Forward (mirrors BiLSTM_demo.forward, use_pretrain=False): one pallas_call.
# ----------------------------------------------------------------------------
@jax.jit
def bilstm_demo_forward(para_tokens, epi_tokens, params):
  emb = params["embedding"]
  # Embedding lookup done with a single XLA gather (not a Pallas kernel).
  pa_x = jnp.take(emb, para_tokens, axis=0)     # (T=B, N=L, E)
  ep_x = jnp.take(emb, epi_tokens, axis=0)
  pa, ep = params["para"], params["epi"]

  args = (pa_x, ep_x,
          pa["wih0"], pa["b0"], pa["wih1"], pa["b1"], pa["whh"], pa["whr"],
          ep["wih0"], ep["b0"], ep["wih1"], ep["b1"], ep["whh"], ep["whr"],
          params["hw1"], params["hb1"], params["hw2"], params["hb2"])
  vmem = pl.BlockSpec(memory_space=pltpu.MemorySpace.VMEM)
  return pl.pallas_call(
      _bilstm_demo_kernel,
      out_shape=jax.ShapeDtypeStruct((pa_x.shape[0], 1), jnp.float32),
      in_specs=[vmem] * len(args),
      out_specs=vmem,
  )(*args)


if __name__ == "__main__":
  key = jax.random.PRNGKey(0)
  k_params, k_pa, k_ep = jax.random.split(key, 3)

  B, L = 2, 16
  params = init_params(k_params)
  para_tokens = jax.random.randint(k_pa, (B, L), 0, VOCAB, dtype=jnp.int32)
  epi_tokens = jax.random.randint(k_ep, (B, L), 0, VOCAB, dtype=jnp.int32)

  out = bilstm_demo_forward(para_tokens, epi_tokens, params)
  out = jax.block_until_ready(out)
  assert out.shape == (B, 1)
  assert bool(jnp.all(jnp.isfinite(out)))
  print("KERNEL_OK")
</pallas_src>

<mosaic_0001>
module attributes {stable_mosaic.version = 11 : i64} {
  func.func @_bilstm_demo_kernel(%arg0: memref<2x16x64xf32, #tpu.memory_space<vmem>>, %arg1: memref<2x16x64xf32, #tpu.memory_space<vmem>>, %arg2: memref<64x1024xbf16, #tpu.memory_space<vmem>>, %arg3: memref<1x1024xf32, #tpu.memory_space<vmem>>, %arg4: memref<128x1024xbf16, #tpu.memory_space<vmem>>, %arg5: memref<1x1024xf32, #tpu.memory_space<vmem>>, %arg6: memref<4x64x512xbf16, #tpu.memory_space<vmem>>, %arg7: memref<4x128x64xbf16, #tpu.memory_space<vmem>>, %arg8: memref<64x1024xbf16, #tpu.memory_space<vmem>>, %arg9: memref<1x1024xf32, #tpu.memory_space<vmem>>, %arg10: memref<128x1024xbf16, #tpu.memory_space<vmem>>, %arg11: memref<1x1024xf32, #tpu.memory_space<vmem>>, %arg12: memref<4x64x512xbf16, #tpu.memory_space<vmem>>, %arg13: memref<4x128x64xbf16, #tpu.memory_space<vmem>>, %arg14: memref<128x64xbf16, #tpu.memory_space<vmem>>, %arg15: memref<1x64xf32, #tpu.memory_space<vmem>>, %arg16: memref<64x1xbf16, #tpu.memory_space<vmem>>, %arg17: memref<1x1xf32, #tpu.memory_space<vmem>>, %arg18: memref<2x1xf32, #tpu.memory_space<vmem>>) attributes {dimension_semantics = [], scalar_prefetch = 0 : i64, scratch_operands = 0 : i64, tpu.core_type = #tpu.core_type<tc>} {
    %c0 = arith.constant 0 : index
    %c0_0 = arith.constant 0 : index
    %c0_1 = arith.constant 0 : index
    %0 = vector.load %arg0[%c0, %c0_0, %c0_1] : memref<2x16x64xf32, #tpu.memory_space<vmem>>, vector<2x16x64xf32>
    %1 = vector.shape_cast %0 : vector<2x16x64xf32> to vector<32x64xf32>
    %c0_2 = arith.constant 0 : index
    %c0_3 = arith.constant 0 : index
    %2 = vector.load %arg2[%c0_2, %c0_3] : memref<64x1024xbf16, #tpu.memory_space<vmem>>, vector<64x1024xbf16>
    %3 = arith.truncf %1 : vector<32x64xf32> to vector<32x64xbf16>
    %cst = arith.constant dense<0.000000e+00> : vector<32x1024xf32>
    %4 = tpu.matmul %3, %2, %cst {dimension_numbers = #tpu.dot_dimension_numbers<[1], [0], [0], [1], [0, 0, 1, 1], [], []>} : vector<32x64xbf16>, vector<64x1024xbf16>, vector<32x1024xf32> -> vector<32x1024xf32>
    %c0_4 = arith.constant 0 : index
    %c0_5 = arith.constant 0 : index
    %5 = vector.load %arg3[%c0_4, %c0_5] : memref<1x1024xf32, #tpu.memory_space<vmem>>, vector<1x1024xf32>
    %6 = vector.broadcast %5 : vector<1x1024xf32> to vector<32x1024xf32>
    %7 = arith.addf %4, %6 : vector<32x1024xf32>
    %8 = vector.shape_cast %7 : vector<32x1024xf32> to vector<2x16x1024xf32>
    %9 = vector.extract_strided_slice %8 {offsets = [0, 0, 0], sizes = [2, 16, 512], strides = [1, 1, 1]} : vector<2x16x1024xf32> to vector<2x16x512xf32>
    %cst_6 = arith.constant 0.000000e+00 : f32
    %10 = vector.broadcast %cst_6 : f32 to vector<16x64xf32>
    %cst_7 = arith.constant 0.000000e+00 : f32
    %11 = vector.broadcast %cst_7 : f32 to vector<16x128xf32>
    %12 = vector.extract_strided_slice %9 {offsets = [0, 0, 0], sizes = [1, 16, 512], strides = [1, 1, 1]} : vector<2x16x512xf32> to vector<1x16x512xf32>
    %13 = vector.shape_cast %12 : vector<1x16x512xf32> to vector<16x512xf32>
    %c0_8 = arith.constant 0 : index
    %c0_9 = arith.constant 0 : index
    %c0_10 = arith.constant 0 : index
    %14 = vector.load %arg6[%c0_8, %c0_9, %c0_10] : memref<4x64x512xbf16, #tpu.memory_space<vmem>>, vector<1x64x512xbf16>
    %15 = vector.shape_cast %14 : vector<1x64x512xbf16> to vector<64x512xbf16>
    %16 = arith.truncf %10 : vector<16x64xf32> to vector<16x64xbf16>
    %cst_11 = arith.constant dense<0.000000e+00> : vector<16x512xf32>
    %17 = tpu.matmul %16, %15, %cst_11 {dimension_numbers = #tpu.dot_dimension_numbers<[1], [0], [0], [1], [0, 0, 1, 1], [], []>} : vector<16x64xbf16>, vector<64x512xbf16>, vector<16x512xf32> -> vector<16x512xf32>
    %18 = arith.addf %13, %17 : vector<16x512xf32>
    %19 = vector.extract_strided_slice %18 {offsets = [0, 0], sizes = [16, 128], strides = [1, 1]} : vector<16x512xf32> to vector<16x128xf32>
    %20 = arith.negf %19 : vector<16x128xf32>
    %21 = math.exp %20 : vector<16x128xf32>
    %cst_12 = arith.constant 1.000000e+00 : f32
    %22 = vector.broadcast %cst_12 : f32 to vector<16x128xf32>
    %23 = arith.addf %22, %21 : vector<16x128xf32>
    %24 = arith.divf %22, %23 : vector<16x128xf32>
    %25 = vector.extract_strided_slice %18 {offsets = [0, 128], sizes = [16, 128], strides = [1, 1]} : vector<16x512xf32> to vector<16x128xf32>
    %26 = arith.negf %25 : vector<16x128xf32>
    %27 = math.exp %26 : vector<16x128xf32>
    %cst_13 = arith.constant 1.000000e+00 : f32
    %28 = vector.broadcast %cst_13 : f32 to vector<16x128xf32>
    %29 = arith.addf %28, %27 : vector<16x128xf32>
    %30 = arith.divf %28, %29 : vector<16x128xf32>
    %31 = vector.extract_strided_slice %18 {offsets = [0, 256], sizes = [16, 128], strides = [1, 1]} : vector<16x512xf32> to vector<16x128xf32>
    %32 = math.tanh %31 : vector<16x128xf32>
    %33 = vector.extract_strided_slice %18 {offsets = [0, 384], sizes = [16, 128], strides = [1, 1]} : vector<16x512xf32> to vector<16x128xf32>
    %34 = arith.negf %33 : vector<16x128xf32>
    %35 = math.exp %34 : vector<16x128xf32>
    %cst_14 = arith.constant 1.000000e+00 : f32
    %36 = vector.broadcast %cst_14 : f32 to vector<16x128xf32>
    %37 = arith.addf %36, %35 : vector<16x128xf32>
    %38 = arith.divf %36, %37 : vector<16x128xf32>
    %39 = arith.mulf %30, %11 : vector<16x128xf32>
    %40 = arith.mulf %24, %32 : vector<16x128xf32>
    %41 = arith.addf %39, %40 : vector<16x128xf32>
    %42 = math.tanh %41 : vector<16x128xf32>
    %43 = arith.mulf %38, %42 : vector<16x128xf32>
    %c0_15 = arith.constant 0 : index
    %c0_16 = arith.constant 0 : index
    %c0_17 = arith.constant 0 : index
    %44 = vector.load %arg7[%c0_15, %c0_16, %c0_17] : memref<4x128x64xbf16, #tpu.memory_space<vmem>>, vector<1x128x64xbf16>
    %45 = vector.shape_cast %44 : vector<1x128x64xbf16> to vector<128x64xbf16>
    %46 = arith.truncf %43 : vector<16x128xf32> to vector<16x128xbf16>
    %cst_18 = arith.constant dense<0.000000e+00> : vector<16x64xf32>
    %47 = tpu.matmul %46, %45, %cst_18 {dimension_numbers = #tpu.dot_dimension_numbers<[1], [0], [0], [1], [0, 0, 1, 1], [], []>} : vector<16x128xbf16>, vector<128x64xbf16>, vector<16x64xf32> -> vector<16x64xf32>
    %48 = vector.extract_strided_slice %9 {offsets = [1, 0, 0], sizes = [1, 16, 512], strides = [1, 1, 1]} : vector<2x16x512xf32> to vector<1x16x512xf32>
    %49 = vector.shape_cast %48 : vector<1x16x512xf32> to vector<16x512xf32>
    %c0_19 = arith.constant 0 : index
    %c0_20 = arith.constant 0 : index
    %c0_21 = arith.constant 0 : index
    %50 = vector.load %arg6[%c0_19, %c0_20, %c0_21] : memref<4x64x512xbf16, #tpu.memory_space<vmem>>, vector<1x64x512xbf16>
    %51 = vector.shape_cast %50 : vector<1x64x512xbf16> to vector<64x512xbf16>
    %52 = arith.truncf %47 : vector<16x64xf32> to vector<16x64xbf16>
    %cst_22 = arith.constant dense<0.000000e+00> : vector<16x512xf32>
    %53 = tpu.matmul %52, %51, %cst_22 {dimension_numbers = #tpu.dot_dimension_numbers<[1], [0], [0], [1], [0, 0, 1, 1], [], []>} : vector<16x64xbf16>, vector<64x512xbf16>, vector<16x512xf32> -> vector<16x512xf32>
    %54 = arith.addf %49, %53 : vector<16x512xf32>
    %55 = vector.extract_strided_slice %54 {offsets = [0, 0], sizes = [16, 128], strides = [1, 1]} : vector<16x512xf32> to vector<16x128xf32>
    %56 = arith.negf %55 : vector<16x128xf32>
    %57 = math.exp %56 : vector<16x128xf32>
    %cst_23 = arith.constant 1.000000e+00 : f32
    %58 = vector.broadcast %cst_23 : f32 to vector<16x128xf32>
    %59 = arith.addf %58, %57 : vector<16x128xf32>
    %60 = arith.divf %58, %59 : vector<16x128xf32>
    %61 = vector.extract_strided_slice %54 {offsets = [0, 128], sizes = [16, 128], strides = [1, 1]} : vector<16x512xf32> to vector<16x128xf32>
    %62 = arith.negf %61 : vector<16x128xf32>
    %63 = math.exp %62 : vector<16x128xf32>
    %cst_24 = arith.constant 1.000000e+00 : f32
    %64 = vector.broadcast %cst_24 : f32 to vector<16x128xf32>
    %65 = arith.addf %64, %63 : vector<16x128xf32>
    %66 = arith.divf %64, %65 : vector<16x128xf32>
    %67 = vector.extract_strided_slice %54 {offsets = [0, 256], sizes = [16, 128], strides = [1, 1]} : vector<16x512xf32> to vector<16x128xf32>
    %68 = math.tanh %67 : vector<16x128xf32>
    %69 = vector.extract_strided_slice %54 {offsets = [0, 384], sizes = [16, 128], strides = [1, 1]} : vector<16x512xf32> to vector<16x128xf32>
    %70 = arith.negf %69 : vector<16x128xf32>
    %71 = math.exp %70 : vector<16x128xf32>
    %cst_25 = arith.constant 1.000000e+00 : f32
    %72 = vector.broadcast %cst_25 : f32 to vector<16x128xf32>
    %73 = arith.addf %72, %71 : vector<16x128xf32>
    %74 = arith.divf %72, %73 : vector<16x128xf32>
    %75 = arith.mulf %66, %41 : vector<16x128xf32>
    %76 = arith.mulf %60, %68 : vector<16x128xf32>
    %77 = arith.addf %75, %76 : vector<16x128xf32>
    %78 = math.tanh %77 : vector<16x128xf32>
    %79 = arith.mulf %74, %78 : vector<16x128xf32>
    %c0_26 = arith.constant 0 : index
    %c0_27 = arith.constant 0 : index
    %c0_28 = arith.constant 0 : index
    %80 = vector.load %arg7[%c0_26, %c0_27, %c0_28] : memref<4x128x64xbf16, #tpu.memory_space<vmem>>, vector<1x128x64xbf16>
    %81 = vector.shape_cast %80 : vector<1x128x64xbf16> to vector<128x64xbf16>
    %82 = arith.truncf %79 : vector<16x128xf32> to vector<16x128xbf16>
    %cst_29 = arith.constant dense<0.000000e+00> : vector<16x64xf32>
    %83 = tpu.matmul %82, %81, %cst_29 {dimension_numbers = #tpu.dot_dimension_numbers<[1], [0], [0], [1], [0, 0, 1, 1], [], []>} : vector<16x128xbf16>, vector<128x64xbf16>, vector<16x64xf32> -> vector<16x64xf32>
    %84 = vector.shape_cast %47 : vector<16x64xf32> to vector<1x16x64xf32>
    %85 = vector.shape_cast %83 : vector<16x64xf32> to vector<1x16x64xf32>
    %86 = tpu.concatenate %84, %85 in 0 : vector<1x16x64xf32>, vector<1x16x64xf32> -> vector<2x16x64xf32>
    %87 = vector.extract_strided_slice %8 {offsets = [0, 0, 512], sizes = [2, 16, 512], strides = [1, 1, 1]} : vector<2x16x1024xf32> to vector<2x16x512xf32>
    %cst_30 = arith.constant 0.000000e+00 : f32
    %88 = vector.broadcast %cst_30 : f32 to vector<16x64xf32>
    %cst_31 = arith.constant 0.000000e+00 : f32
    %89 = vector.broadcast %cst_31 : f32 to vector<16x128xf32>
    %90 = vector.extract_strided_slice %87 {offsets = [1, 0, 0], sizes = [1, 16, 512], strides = [1, 1, 1]} : vector<2x16x512xf32> to vector<1x16x512xf32>
    %91 = vector.shape_cast %90 : vector<1x16x512xf32> to vector<16x512xf32>
    %c1 = arith.constant 1 : index
    %c0_32 = arith.constant 0 : index
    %c0_33 = arith.constant 0 : index
    %92 = vector.load %arg6[%c1, %c0_32, %c0_33] : memref<4x64x512xbf16, #tpu.memory_space<vmem>>, vector<1x64x512xbf16>
    %93 = vector.shape_cast %92 : vector<1x64x512xbf16> to vector<64x512xbf16>
    %94 = arith.truncf %88 : vector<16x64xf32> to vector<16x64xbf16>
    %cst_34 = arith.constant dense<0.000000e+00> : vector<16x512xf32>
    %95 = tpu.matmul %94, %93, %cst_34 {dimension_numbers = #tpu.dot_dimension_numbers<[1], [0], [0], [1], [0, 0, 1, 1], [], []>} : vector<16x64xbf16>, vector<64x512xbf16>, vector<16x512xf32> -> vector<16x512xf32>
    %96 = arith.addf %91, %95 : vector<16x512xf32>
    %97 = vector.extract_strided_slice %96 {offsets = [0, 0], sizes = [16, 128], strides = [1, 1]} : vector<16x512xf32> to vector<16x128xf32>
    %98 = arith.negf %97 : vector<16x128xf32>
    %99 = math.exp %98 : vector<16x128xf32>
    %cst_35 = arith.constant 1.000000e+00 : f32
    %100 = vector.broadcast %cst_35 : f32 to vector<16x128xf32>
    %101 = arith.addf %100, %99 : vector<16x128xf32>
    %102 = arith.divf %100, %101 : vector<16x128xf32>
    %103 = vector.extract_strided_slice %96 {offsets = [0, 128], sizes = [16, 128], strides = [1, 1]} : vector<16x512xf32> to vector<16x128xf32>
    %104 = arith.negf %103 : vector<16x128xf32>
    %105 = math.exp %104 : vector<16x128xf32>
    %cst_36 = arith.constant 1.000000e+00 : f32
    %106 = vector.broadcast %cst_36 : f32 to vector<16x128xf32>
    %107 = arith.addf %106, %105 : vector<16x128xf32>
    %108 = arith.divf %106, %107 : vector<16x128xf32>
    %109 = vector.extract_strided_slice %96 {offsets = [0, 256], sizes = [16, 128], strides = [1, 1]} : vector<16x512xf32> to vector<16x128xf32>
    %110 = math.tanh %109 : vector<16x128xf32>
    %111 = vector.extract_strided_slice %96 {offsets = [0, 384], sizes = [16, 128], strides = [1, 1]} : vector<16x512xf32> to vector<16x128xf32>
    %112 = arith.negf %111 : vector<16x128xf32>
    %113 = math.exp %112 : vector<16x128xf32>
    %cst_37 = arith.constant 1.000000e+00 : f32
    %114 = vector.broadcast %cst_37 : f32 to vector<16x128xf32>
    %115 = arith.addf %114, %113 : vector<16x128xf32>
    %116 = arith.divf %114, %115 : vector<16x128xf32>
    %117 = arith.mulf %108, %89 : vector<16x128xf32>
    %118 = arith.mulf %102, %110 : vector<16x128xf32>
    %119 = arith.addf %117, %118 : vector<16x128xf32>
    %120 = math.tanh %119 : vector<16x128xf32>
    %121 = arith.mulf %116, %120 : vector<16x128xf32>
    %c1_38 = arith.constant 1 : index
    %c0_39 = arith.constant 0 : index
    %c0_40 = arith.constant 0 : index
    %122 = vector.load %arg7[%c1_38, %c0_39, %c0_40] : memref<4x128x64xbf16, #tpu.memory_space<vmem>>, vector<1x128x64xbf16>
    %123 = vector.shape_cast %122 : vector<1x128x64xbf16> to vector<128x64xbf16>
    %124 = arith.truncf %121 : vector<16x128xf32> to vector<16x128xbf16>
    %cst_41 = arith.constant dense<0.000000e+00> : vector<16x64xf32>
    %125 = tpu.matmul %124, %123, %cst_41 {dimension_numbers = #tpu.dot_dimension_numbers<[1], [0], [0], [1], [0, 0, 1, 1], [], []>} : vector<16x128xbf16>, vector<128x64xbf16>, vector<16x64xf32> -> vector<16x64xf32>
    %126 = vector.extract_strided_slice %87 {offsets = [0, 0, 0], sizes = [1, 16, 512], strides = [1, 1, 1]} : vector<2x16x512xf32> to vector<1x16x512xf32>
    %127 = vector.shape_cast %126 : vector<1x16x512xf32> to vector<16x512xf32>
    %c1_42 = arith.constant 1 : index
    %c0_43 = arith.constant 0 : index
    %c0_44 = arith.constant 0 : index
    %128 = vector.load %arg6[%c1_42, %c0_43, %c0_44] : memref<4x64x512xbf16, #tpu.memory_space<vmem>>, vector<1x64x512xbf16>
    %129 = vector.shape_cast %128 : vector<1x64x512xbf16> to vector<64x512xbf16>
    %130 = arith.truncf %125 : vector<16x64xf32> to vector<16x64xbf16>
    %cst_45 = arith.constant dense<0.000000e+00> : vector<16x512xf32>
    %131 = tpu.matmul %130, %129, %cst_45 {dimension_numbers = #tpu.dot_dimension_numbers<[1], [0], [0], [1], [0, 0, 1, 1], [], []>} : vector<16x64xbf16>, vector<64x512xbf16>, vector<16x512xf32> -> vector<16x512xf32>
    %132 = arith.addf %127, %131 : vector<16x512xf32>
    %133 = vector.extract_strided_slice %132 {offsets = [0, 0], sizes = [16, 128], strides = [1, 1]} : vector<16x512xf32> to vector<16x128xf32>
    %134 = arith.negf %133 : vector<16x128xf32>
    %135 = math.exp %134 : vector<16x128xf32>
    %cst_46 = arith.constant 1.000000e+00 : f32
    %136 = vector.broadcast %cst_46 : f32 to vector<16x128xf32>
    %137 = arith.addf %136, %135 : vector<16x128xf32>
    %138 = arith.divf %136, %137 : vector<16x128xf32>
    %139 = vector.extract_strided_slice %132 {offsets = [0, 128], sizes = [16, 128], strides = [1, 1]} : vector<16x512xf32> to vector<16x128xf32>
    %140 = arith.negf %139 : vector<16x128xf32>
    %141 = math.exp %140 : vector<16x128xf32>
    %cst_47 = arith.constant 1.000000e+00 : f32
    %142 = vector.broadcast %cst_47 : f32 to vector<16x128xf32>
    %143 = arith.addf %142, %141 : vector<16x128xf32>
    %144 = arith.divf %142, %143 : vector<16x128xf32>
    %145 = vector.extract_strided_slice %132 {offsets = [0, 256], sizes = [16, 128], strides = [1, 1]} : vector<16x512xf32> to vector<16x128xf32>
    %146 = math.tanh %145 : vector<16x128xf32>
    %147 = vector.extract_strided_slice %132 {offsets = [0, 384], sizes = [16, 128], strides = [1, 1]} : vector<16x512xf32> to vector<16x128xf32>
    %148 = arith.negf %147 : vector<16x128xf32>
    %149 = math.exp %148 : vector<16x128xf32>
    %cst_48 = arith.constant 1.000000e+00 : f32
    %150 = vector.broadcast %cst_48 : f32 to vector<16x128xf32>
    %151 = arith.addf %150, %149 : vector<16x128xf32>
    %152 = arith.divf %150, %151 : vector<16x128xf32>
    %153 = arith.mulf %144, %119 : vector<16x128xf32>
    %154 = arith.mulf %138, %146 : vector<16x128xf32>
    %155 = arith.addf %153, %154 : vector<16x128xf32>
    %156 = math.tanh %155 : vector<16x128xf32>
    %157 = arith.mulf %152, %156 : vector<16x128xf32>
    %c1_49 = arith.constant 1 : index
    %c0_50 = arith.constant 0 : index
    %c0_51 = arith.constant 0 : index
    %158 = vector.load %arg7[%c1_49, %c0_50, %c0_51] : memref<4x128x64xbf16, #tpu.memory_space<vmem>>, vector<1x128x64xbf16>
    %159 = vector.shape_cast %158 : vector<1x128x64xbf16> to vector<128x64xbf16>
    %160 = arith.truncf %157 : vector<16x128xf32> to vector<16x128xbf16>
    %cst_52 = arith.constant dense<0.000000e+00> : vector<16x64xf32>
    %161 = tpu.matmul %160, %159, %cst_52 {dimension_numbers = #tpu.dot_dimension_numbers<[1], [0], [0], [1], [0, 0, 1, 1], [], []>} : vector<16x128xbf16>, vector<128x64xbf16>, vector<16x64xf32> -> vector<16x64xf32>
    %162 = vector.shape_cast %161 : vector<16x64xf32> to vector<1x16x64xf32>
    %163 = vector.shape_cast %125 : vector<16x64xf32> to vector<1x16x64xf32>
    %164 = tpu.concatenate %162, %163 in 0 : vector<1x16x64xf32>, vector<1x16x64xf32> -> vector<2x16x64xf32>
    %165 = tpu.concatenate %86, %164 in 2 : vector<2x16x64xf32>, vector<2x16x64xf32> -> vector<2x16x128xf32>
    %166 = vector.shape_cast %165 : vector<2x16x128xf32> to vector<32x128xf32>
    %c0_53 = arith.constant 0 : index
    %c0_54 = arith.constant 0 : index
    %167 = vector.load %arg4[%c0_53, %c0_54] : memref<128x1024xbf16, #tpu.memory_space<vmem>>, vector<128x1024xbf16>
    %168 = arith.truncf %166 : vector<32x128xf32> to vector<32x128xbf16>
    %cst_55 = arith.constant dense<0.000000e+00> : vector<32x1024xf32>
    %169 = tpu.matmul %168, %167, %cst_55 {dimension_numbers = #tpu.dot_dimension_numbers<[1], [0], [0], [1], [0, 0, 1, 1], [], []>} : vector<32x128xbf16>, vector<128x1024xbf16>, vector<32x1024xf32> -> vector<32x1024xf32>
    %c0_56 = arith.constant 0 : index
    %c0_57 = arith.constant 0 : index
    %170 = vector.load %arg5[%c0_56, %c0_57] : memref<1x1024xf32, #tpu.memory_space<vmem>>, vector<1x1024xf32>
    %171 = vector.broadcast %170 : vector<1x1024xf32> to vector<32x1024xf32>
    %172 = arith.addf %169, %171 : vector<32x1024xf32>
    %173 = vector.shape_cast %172 : vector<32x1024xf32> to vector<2x16x1024xf32>
    %174 = vector.extract_strided_slice %173 {offsets = [0, 0, 0], sizes = [2, 16, 512], strides = [1, 1, 1]} : vector<2x16x1024xf32> to vector<2x16x512xf32>
    %cst_58 = arith.constant 0.000000e+00 : f32
    %175 = vector.broadcast %cst_58 : f32 to vector<16x64xf32>
    %cst_59 = arith.constant 0.000000e+00 : f32
    %176 = vector.broadcast %cst_59 : f32 to vector<16x128xf32>
    %177 = vector.extract_strided_slice %174 {offsets = [0, 0, 0], sizes = [1, 16, 512], strides = [1, 1, 1]} : vector<2x16x512xf32> to vector<1x16x512xf32>
    %178 = vector.shape_cast %177 : vector<1x16x512xf32> to vector<16x512xf32>
    %c2 = arith.constant 2 : index
    %c0_60 = arith.constant 0 : index
    %c0_61 = arith.constant 0 : index
    %179 = vector.load %arg6[%c2, %c0_60, %c0_61] : memref<4x64x512xbf16, #tpu.memory_space<vmem>>, vector<1x64x512xbf16>
    %180 = vector.shape_cast %179 : vector<1x64x512xbf16> to vector<64x512xbf16>
    %181 = arith.truncf %175 : vector<16x64xf32> to vector<16x64xbf16>
    %cst_62 = arith.constant dense<0.000000e+00> : vector<16x512xf32>
    %182 = tpu.matmul %181, %180, %cst_62 {dimension_numbers = #tpu.dot_dimension_numbers<[1], [0], [0], [1], [0, 0, 1, 1], [], []>} : vector<16x64xbf16>, vector<64x512xbf16>, vector<16x512xf32> -> vector<16x512xf32>
    %183 = arith.addf %178, %182 : vector<16x512xf32>
    %184 = vector.extract_strided_slice %183 {offsets = [0, 0], sizes = [16, 128], strides = [1, 1]} : vector<16x512xf32> to vector<16x128xf32>
    %185 = arith.negf %184 : vector<16x128xf32>
    %186 = math.exp %185 : vector<16x128xf32>
    %cst_63 = arith.constant 1.000000e+00 : f32
    %187 = vector.broadcast %cst_63 : f32 to vector<16x128xf32>
    %188 = arith.addf %187, %186 : vector<16x128xf32>
    %189 = arith.divf %187, %188 : vector<16x128xf32>
    %190 = vector.extract_strided_slice %183 {offsets = [0, 128], sizes = [16, 128], strides = [1, 1]} : vector<16x512xf32> to vector<16x128xf32>
    %191 = arith.negf %190 : vector<16x128xf32>
    %192 = math.exp %191 : vector<16x128xf32>
    %cst_64 = arith.constant 1.000000e+00 : f32
    %193 = vector.broadcast %cst_64 : f32 to vector<16x128xf32>
    %194 = arith.addf %193, %192 : vector<16x128xf32>
    %195 = arith.divf %193, %194 : vector<16x128xf32>
    %196 = vector.extract_strided_slice %183 {offsets = [0, 256], sizes = [16, 128], strides = [1, 1]} : vector<16x512xf32> to vector<16x128xf32>
    %197 = math.tanh %196 : vector<16x128xf32>
    %198 = vector.extract_strided_slice %183 {offsets = [0, 384], sizes = [16, 128], strides = [1, 1]} : vector<16x512xf32> to vector<16x128xf32>
    %199 = arith.negf %198 : vector<16x128xf32>
    %200 = math.exp %199 : vector<16x128xf32>
    %cst_65 = arith.constant 1.000000e+00 : f32
    %201 = vector.broadcast %cst_65 : f32 to vector<16x128xf32>
    %202 = arith.addf %201, %200 : vector<16x128xf32>
    %203 = arith.divf %201, %202 : vector<16x128xf32>
    %204 = arith.mulf %195, %176 : vector<16x128xf32>
    %205 = arith.mulf %189, %197 : vector<16x128xf32>
    %206 = arith.addf %204, %205 : vector<16x128xf32>
    %207 = math.tanh %206 : vector<16x128xf32>
    %208 = arith.mulf %203, %207 : vector<16x128xf32>
    %c2_66 = arith.constant 2 : index
    %c0_67 = arith.constant 0 : index
    %c0_68 = arith.constant 0 : index
    %209 = vector.load %arg7[%c2_66, %c0_67, %c0_68] : memref<4x128x64xbf16, #tpu.memory_space<vmem>>, vector<1x128x64xbf16>
    %210 = vector.shape_cast %209 : vector<1x128x64xbf16> to vector<128x64xbf16>
    %211 = arith.truncf %208 : vector<16x128xf32> to vector<16x128xbf16>
    %cst_69 = arith.constant dense<0.000000e+00> : vector<16x64xf32>
    %212 = tpu.matmul %211, %210, %cst_69 {dimension_numbers = #tpu.dot_dimension_numbers<[1], [0], [0], [1], [0, 0, 1, 1], [], []>} : vector<16x128xbf16>, vector<128x64xbf16>, vector<16x64xf32> -> vector<16x64xf32>
    %213 = vector.extract_strided_slice %174 {offsets = [1, 0, 0], sizes = [1, 16, 512], strides = [1, 1, 1]} : vector<2x16x512xf32> to vector<1x16x512xf32>
    %214 = vector.shape_cast %213 : vector<1x16x512xf32> to vector<16x512xf32>
    %c2_70 = arith.constant 2 : index
    %c0_71 = arith.constant 0 : index
    %c0_72 = arith.constant 0 : index
    %215 = vector.load %arg6[%c2_70, %c0_71, %c0_72] : memref<4x64x512xbf16, #tpu.memory_space<vmem>>, vector<1x64x512xbf16>
    %216 = vector.shape_cast %215 : vector<1x64x512xbf16> to vector<64x512xbf16>
    %217 = arith.truncf %212 : vector<16x64xf32> to vector<16x64xbf16>
    %cst_73 = arith.constant dense<0.000000e+00> : vector<16x512xf32>
    %218 = tpu.matmul %217, %216, %cst_73 {dimension_numbers = #tpu.dot_dimension_numbers<[1], [0], [0], [1], [0, 0, 1, 1], [], []>} : vector<16x64xbf16>, vector<64x512xbf16>, vector<16x512xf32> -> vector<16x512xf32>
    %219 = arith.addf %214, %218 : vector<16x512xf32>
    %220 = vector.extract_strided_slice %219 {offsets = [0, 0], sizes = [16, 128], strides = [1, 1]} : vector<16x512xf32> to vector<16x128xf32>
    %221 = arith.negf %220 : vector<16x128xf32>
    %222 = math.exp %221 : vector<16x128xf32>
    %cst_74 = arith.constant 1.000000e+00 : f32
    %223 = vector.broadcast %cst_74 : f32 to vector<16x128xf32>
    %224 = arith.addf %223, %222 : vector<16x128xf32>
    %225 = arith.divf %223, %224 : vector<16x128xf32>
    %226 = vector.extract_strided_slice %219 {offsets = [0, 128], sizes = [16, 128], strides = [1, 1]} : vector<16x512xf32> to vector<16x128xf32>
    %227 = arith.negf %226 : vector<16x128xf32>
    %228 = math.exp %227 : vector<16x128xf32>
    %cst_75 = arith.constant 1.000000e+00 : f32
    %229 = vector.broadcast %cst_75 : f32 to vector<16x128xf32>
    %230 = arith.addf %229, %228 : vector<16x128xf32>
    %231 = arith.divf %229, %230 : vector<16x128xf32>
    %232 = vector.extract_strided_slice %219 {offsets = [0, 256], sizes = [16, 128], strides = [1, 1]} : vector<16x512xf32> to vector<16x128xf32>
    %233 = math.tanh %232 : vector<16x128xf32>
    %234 = vector.extract_strided_slice %219 {offsets = [0, 384], sizes = [16, 128], strides = [1, 1]} : vector<16x512xf32> to vector<16x128xf32>
    %235 = arith.negf %234 : vector<16x128xf32>
    %236 = math.exp %235 : vector<16x128xf32>
    %cst_76 = arith.constant 1.000000e+00 : f32
    %237 = vector.broadcast %cst_76 : f32 to vector<16x128xf32>
    %238 = arith.addf %237, %236 : vector<16x128xf32>
    %239 = arith.divf %237, %238 : vector<16x128xf32>
    %240 = arith.mulf %231, %206 : vector<16x128xf32>
    %241 = arith.mulf %225, %233 : vector<16x128xf32>
    %242 = arith.addf %240, %241 : vector<16x128xf32>
    %243 = math.tanh %242 : vector<16x128xf32>
    %244 = arith.mulf %239, %243 : vector<16x128xf32>
    %c2_77 = arith.constant 2 : index
    %c0_78 = arith.constant 0 : index
    %c0_79 = arith.constant 0 : index
    %245 = vector.load %arg7[%c2_77, %c0_78, %c0_79] : memref<4x128x64xbf16, #tpu.memory_space<vmem>>, vector<1x128x64xbf16>
    %246 = vector.shape_cast %245 : vector<1x128x64xbf16> to vector<128x64xbf16>
    %247 = arith.truncf %244 : vector<16x128xf32> to vector<16x128xbf16>
    %cst_80 = arith.constant dense<0.000000e+00> : vector<16x64xf32>
    %248 = tpu.matmul %247, %246, %cst_80 {dimension_numbers = #tpu.dot_dimension_numbers<[1], [0], [0], [1], [0, 0, 1, 1], [], []>} : vector<16x128xbf16>, vector<128x64xbf16>, vector<16x64xf32> -> vector<16x64xf32>
    %249 = vector.shape_cast %212 : vector<16x64xf32> to vector<1x16x64xf32>
    %250 = vector.shape_cast %248 : vector<16x64xf32> to vector<1x16x64xf32>
    %251 = tpu.concatenate %249, %250 in 0 : vector<1x16x64xf32>, vector<1x16x64xf32> -> vector<2x16x64xf32>
    %252 = vector.extract_strided_slice %173 {offsets = [0, 0, 512], sizes = [2, 16, 512], strides = [1, 1, 1]} : vector<2x16x1024xf32> to vector<2x16x512xf32>
    %cst_81 = arith.constant 0.000000e+00 : f32
    %253 = vector.broadcast %cst_81 : f32 to vector<16x64xf32>
    %cst_82 = arith.constant 0.000000e+00 : f32
    %254 = vector.broadcast %cst_82 : f32 to vector<16x128xf32>
    %255 = vector.extract_strided_slice %252 {offsets = [1, 0, 0], sizes = [1, 16, 512], strides = [1, 1, 1]} : vector<2x16x512xf32> to vector<1x16x512xf32>
    %256 = vector.shape_cast %255 : vector<1x16x512xf32> to vector<16x512xf32>
    %c3 = arith.constant 3 : index
    %c0_83 = arith.constant 0 : index
    %c0_84 = arith.constant 0 : index
    %257 = vector.load %arg6[%c3, %c0_83, %c0_84] : memref<4x64x512xbf16, #tpu.memory_space<vmem>>, vector<1x64x512xbf16>
    %258 = vector.shape_cast %257 : vector<1x64x512xbf16> to vector<64x512xbf16>
    %259 = arith.truncf %253 : vector<16x64xf32> to vector<16x64xbf16>
    %cst_85 = arith.constant dense<0.000000e+00> : vector<16x512xf32>
    %260 = tpu.matmul %259, %258, %cst_85 {dimension_numbers = #tpu.dot_dimension_numbers<[1], [0], [0], [1], [0, 0, 1, 1], [], []>} : vector<16x64xbf16>, vector<64x512xbf16>, vector<16x512xf32> -> vector<16x512xf32>
    %261 = arith.addf %256, %260 : vector<16x512xf32>
    %262 = vector.extract_strided_slice %261 {offsets = [0, 0], sizes = [16, 128], strides = [1, 1]} : vector<16x512xf32> to vector<16x128xf32>
    %263 = arith.negf %262 : vector<16x128xf32>
    %264 = math.exp %263 : vector<16x128xf32>
    %cst_86 = arith.constant 1.000000e+00 : f32
    %265 = vector.broadcast %cst_86 : f32 to vector<16x128xf32>
    %266 = arith.addf %265, %264 : vector<16x128xf32>
    %267 = arith.divf %265, %266 : vector<16x128xf32>
    %268 = vector.extract_strided_slice %261 {offsets = [0, 128], sizes = [16, 128], strides = [1, 1]} : vector<16x512xf32> to vector<16x128xf32>
    %269 = arith.negf %268 : vector<16x128xf32>
    %270 = math.exp %269 : vector<16x128xf32>
    %cst_87 = arith.constant 1.000000e+00 : f32
    %271 = vector.broadcast %cst_87 : f32 to vector<16x128xf32>
    %272 = arith.addf %271, %270 : vector<16x128xf32>
    %273 = arith.divf %271, %272 : vector<16x128xf32>
    %274 = vector.extract_strided_slice %261 {offsets = [0, 256], sizes = [16, 128], strides = [1, 1]} : vector<16x512xf32> to vector<16x128xf32>
    %275 = math.tanh %274 : vector<16x128xf32>
    %276 = vector.extract_strided_slice %261 {offsets = [0, 384], sizes = [16, 128], strides = [1, 1]} : vector<16x512xf32> to vector<16x128xf32>
    %277 = arith.negf %276 : vector<16x128xf32>
    %278 = math.exp %277 : vector<16x128xf32>
    %cst_88 = arith.constant 1.000000e+00 : f32
    %279 = vector.broadcast %cst_88 : f32 to vector<16x128xf32>
    %280 = arith.addf %279, %278 : vector<16x128xf32>
    %281 = arith.divf %279, %280 : vector<16x128xf32>
    %282 = arith.mulf %273, %254 : vector<16x128xf32>
    %283 = arith.mulf %267, %275 : vector<16x128xf32>
    %284 = arith.addf %282, %283 : vector<16x128xf32>
    %285 = math.tanh %284 : vector<16x128xf32>
    %286 = arith.mulf %281, %285 : vector<16x128xf32>
    %c3_89 = arith.constant 3 : index
    %c0_90 = arith.constant 0 : index
    %c0_91 = arith.constant 0 : index
    %287 = vector.load %arg7[%c3_89, %c0_90, %c0_91] : memref<4x128x64xbf16, #tpu.memory_space<vmem>>, vector<1x128x64xbf16>
    %288 = vector.shape_cast %287 : vector<1x128x64xbf16> to vector<128x64xbf16>
    %289 = arith.truncf %286 : vector<16x128xf32> to vector<16x128xbf16>
    %cst_92 = arith.constant dense<0.000000e+00> : vector<16x64xf32>
    %290 = tpu.matmul %289, %288, %cst_92 {dimension_numbers = #tpu.dot_dimension_numbers<[1], [0], [0], [1], [0, 0, 1, 1], [], []>} : vector<16x128xbf16>, vector<128x64xbf16>, vector<16x64xf32> -> vector<16x64xf32>
    %291 = vector.extract_strided_slice %252 {offsets = [0, 0, 0], sizes = [1, 16, 512], strides = [1, 1, 1]} : vector<2x16x512xf32> to vector<1x16x512xf32>
    %292 = vector.shape_cast %291 : vector<1x16x512xf32> to vector<16x512xf32>
    %c3_93 = arith.constant 3 : index
    %c0_94 = arith.constant 0 : index
    %c0_95 = arith.constant 0 : index
    %293 = vector.load %arg6[%c3_93, %c0_94, %c0_95] : memref<4x64x512xbf16, #tpu.memory_space<vmem>>, vector<1x64x512xbf16>
    %294 = vector.shape_cast %293 : vector<1x64x512xbf16> to vector<64x512xbf16>
    %295 = arith.truncf %290 : vector<16x64xf32> to vector<16x64xbf16>
    %cst_96 = arith.constant dense<0.000000e+00> : vector<16x512xf32>
    %296 = tpu.matmul %295, %294, %cst_96 {dimension_numbers = #tpu.dot_dimension_numbers<[1], [0], [0], [1], [0, 0, 1, 1], [], []>} : vector<16x64xbf16>, vector<64x512xbf16>, vector<16x512xf32> -> vector<16x512xf32>
    %297 = arith.addf %292, %296 : vector<16x512xf32>
    %298 = vector.extract_strided_slice %297 {offsets = [0, 0], sizes = [16, 128], strides = [1, 1]} : vector<16x512xf32> to vector<16x128xf32>
    %299 = arith.negf %298 : vector<16x128xf32>
    %300 = math.exp %299 : vector<16x128xf32>
    %cst_97 = arith.constant 1.000000e+00 : f32
    %301 = vector.broadcast %cst_97 : f32 to vector<16x128xf32>
    %302 = arith.addf %301, %300 : vector<16x128xf32>
    %303 = arith.divf %301, %302 : vector<16x128xf32>
    %304 = vector.extract_strided_slice %297 {offsets = [0, 128], sizes = [16, 128], strides = [1, 1]} : vector<16x512xf32> to vector<16x128xf32>
    %305 = arith.negf %304 : vector<16x128xf32>
    %306 = math.exp %305 : vector<16x128xf32>
    %cst_98 = arith.constant 1.000000e+00 : f32
    %307 = vector.broadcast %cst_98 : f32 to vector<16x128xf32>
    %308 = arith.addf %307, %306 : vector<16x128xf32>
    %309 = arith.divf %307, %308 : vector<16x128xf32>
    %310 = vector.extract_strided_slice %297 {offsets = [0, 256], sizes = [16, 128], strides = [1, 1]} : vector<16x512xf32> to vector<16x128xf32>
    %311 = math.tanh %310 : vector<16x128xf32>
    %312 = vector.extract_strided_slice %297 {offsets = [0, 384], sizes = [16, 128], strides = [1, 1]} : vector<16x512xf32> to vector<16x128xf32>
    %313 = arith.negf %312 : vector<16x128xf32>
    %314 = math.exp %313 : vector<16x128xf32>
    %cst_99 = arith.constant 1.000000e+00 : f32
    %315 = vector.broadcast %cst_99 : f32 to vector<16x128xf32>
    %316 = arith.addf %315, %314 : vector<16x128xf32>
    %317 = arith.divf %315, %316 : vector<16x128xf32>
    %318 = arith.mulf %309, %284 : vector<16x128xf32>
    %319 = arith.mulf %303, %311 : vector<16x128xf32>
    %320 = arith.addf %318, %319 : vector<16x128xf32>
    %321 = math.tanh %320 : vector<16x128xf32>
    %322 = arith.mulf %317, %321 : vector<16x128xf32>
    %c3_100 = arith.constant 3 : index
    %c0_101 = arith.constant 0 : index
    %c0_102 = arith.constant 0 : index
    %323 = vector.load %arg7[%c3_100, %c0_101, %c0_102] : memref<4x128x64xbf16, #tpu.memory_space<vmem>>, vector<1x128x64xbf16>
    %324 = vector.shape_cast %323 : vector<1x128x64xbf16> to vector<128x64xbf16>
    %325 = arith.truncf %322 : vector<16x128xf32> to vector<16x128xbf16>
    %cst_103 = arith.constant dense<0.000000e+00> : vector<16x64xf32>
    %326 = tpu.matmul %325, %324, %cst_103 {dimension_numbers = #tpu.dot_dimension_numbers<[1], [0], [0], [1], [0, 0, 1, 1], [], []>} : vector<16x128xbf16>, vector<128x64xbf16>, vector<16x64xf32> -> vector<16x64xf32>
    %327 = vector.shape_cast %326 : vector<16x64xf32> to vector<1x16x64xf32>
    %328 = vector.shape_cast %290 : vector<16x64xf32> to vector<1x16x64xf32>
    %329 = tpu.concatenate %327, %328 in 0 : vector<1x16x64xf32>, vector<1x16x64xf32> -> vector<2x16x64xf32>
    %330 = tpu.concatenate %251, %329 in 2 : vector<2x16x64xf32>, vector<2x16x64xf32> -> vector<2x16x128xf32>
    %cst_104 = arith.constant dense<0.000000e+00> : vector<2x128xf32>
    %331 = vector.multi_reduction <add>, %330, %cst_104 [1] : vector<2x16x128xf32> to vector<2x128xf32>
    %cst_105 = arith.constant 1.600000e+01 : f32
    %332 = vector.broadcast %cst_105 : f32 to vector<2x128xf32>
    %333 = arith.divf %331, %332 : vector<2x128xf32>
    %c0_106 = arith.constant 0 : index
    %c0_107 = arith.constant 0 : index
    %c0_108 = arith.constant 0 : index
    %334 = vector.load %arg1[%c0_106, %c0_107, %c0_108] : memref<2x16x64xf32, #tpu.memory_space<vmem>>, vector<2x16x64xf32>
    %335 = vector.shape_cast %334 : vector<2x16x64xf32> to vector<32x64xf32>
    %c0_109 = arith.constant 0 : index
    %c0_110 = arith.constant 0 : index
    %336 = vector.load %arg8[%c0_109, %c0_110] : memref<64x1024xbf16, #tpu.memory_space<vmem>>, vector<64x1024xbf16>
    %337 = arith.truncf %335 : vector<32x64xf32> to vector<32x64xbf16>
    %cst_111 = arith.constant dense<0.000000e+00> : vector<32x1024xf32>
    %338 = tpu.matmul %337, %336, %cst_111 {dimension_numbers = #tpu.dot_dimension_numbers<[1], [0], [0], [1], [0, 0, 1, 1], [], []>} : vector<32x64xbf16>, vector<64x1024xbf16>, vector<32x1024xf32> -> vector<32x1024xf32>
    %c0_112 = arith.constant 0 : index
    %c0_113 = arith.constant 0 : index
    %339 = vector.load %arg9[%c0_112, %c0_113] : memref<1x1024xf32, #tpu.memory_space<vmem>>, vector<1x1024xf32>
    %340 = vector.broadcast %339 : vector<1x1024xf32> to vector<32x1024xf32>
    %341 = arith.addf %338, %340 : vector<32x1024xf32>
    %342 = vector.shape_cast %341 : vector<32x1024xf32> to vector<2x16x1024xf32>
    %343 = vector.extract_strided_slice %342 {offsets = [0, 0, 0], sizes = [2, 16, 512], strides = [1, 1, 1]} : vector<2x16x1024xf32> to vector<2x16x512xf32>
    %cst_114 = arith.constant 0.000000e+00 : f32
    %344 = vector.broadcast %cst_114 : f32 to vector<16x64xf32>
    %cst_115 = arith.constant 0.000000e+00 : f32
    %345 = vector.broadcast %cst_115 : f32 to vector<16x128xf32>
    %346 = vector.extract_strided_slice %343 {offsets = [0, 0, 0], sizes = [1, 16, 512], strides = [1, 1, 1]} : vector<2x16x512xf32> to vector<1x16x512xf32>
    %347 = vector.shape_cast %346 : vector<1x16x512xf32> to vector<16x512xf32>
    %c0_116 = arith.constant 0 : index
    %c0_117 = arith.constant 0 : index
    %c0_118 = arith.constant 0 : index
    %348 = vector.load %arg12[%c0_116, %c0_117, %c0_118] : memref<4x64x512xbf16, #tpu.memory_space<vmem>>, vector<1x64x512xbf16>
    %349 = vector.shape_cast %348 : vector<1x64x512xbf16> to vector<64x512xbf16>
    %350 = arith.truncf %344 : vector<16x64xf32> to vector<16x64xbf16>
    %cst_119 = arith.constant dense<0.000000e+00> : vector<16x512xf32>
    %351 = tpu.matmul %350, %349, %cst_119 {dimension_numbers = #tpu.dot_dimension_numbers<[1], [0], [0], [1], [0, 0, 1, 1], [], []>} : vector<16x64xbf16>, vector<64x512xbf16>, vector<16x512xf32> -> vector<16x512xf32>
    %352 = arith.addf %347, %351 : vector<16x512xf32>
    %353 = vector.extract_strided_slice %352 {offsets = [0, 0], sizes = [16, 128], strides = [1, 1]} : vector<16x512xf32> to vector<16x128xf32>
    %354 = arith.negf %353 : vector<16x128xf32>
    %355 = math.exp %354 : vector<16x128xf32>
    %cst_120 = arith.constant 1.000000e+00 : f32
    %356 = vector.broadcast %cst_120 : f32 to vector<16x128xf32>
    %357 = arith.addf %356, %355 : vector<16x128xf32>
    %358 = arith.divf %356, %357 : vector<16x128xf32>
    %359 = vector.extract_strided_slice %352 {offsets = [0, 128], sizes = [16, 128], strides = [1, 1]} : vector<16x512xf32> to vector<16x128xf32>
    %360 = arith.negf %359 : vector<16x128xf32>
    %361 = math.exp %360 : vector<16x128xf32>
    %cst_121 = arith.constant 1.000000e+00 : f32
    %362 = vector.broadcast %cst_121 : f32 to vector<16x128xf32>
    %363 = arith.addf %362, %361 : vector<16x128xf32>
    %364 = arith.divf %362, %363 : vector<16x128xf32>
    %365 = vector.extract_strided_slice %352 {offsets = [0, 256], sizes = [16, 128], strides = [1, 1]} : vector<16x512xf32> to vector<16x128xf32>
    %366 = math.tanh %365 : vector<16x128xf32>
    %367 = vector.extract_strided_slice %352 {offsets = [0, 384], sizes = [16, 128], strides = [1, 1]} : vector<16x512xf32> to vector<16x128xf32>
    %368 = arith.negf %367 : vector<16x128xf32>
    %369 = math.exp %368 : vector<16x128xf32>
    %cst_122 = arith.constant 1.000000e+00 : f32
    %370 = vector.broadcast %cst_122 : f32 to vector<16x128xf32>
    %371 = arith.addf %370, %369 : vector<16x128xf32>
    %372 = arith.divf %370, %371 : vector<16x128xf32>
    %373 = arith.mulf %364, %345 : vector<16x128xf32>
    %374 = arith.mulf %358, %366 : vector<16x128xf32>
    %375 = arith.addf %373, %374 : vector<16x128xf32>
    %376 = math.tanh %375 : vector<16x128xf32>
    %377 = arith.mulf %372, %376 : vector<16x128xf32>
    %c0_123 = arith.constant 0 : index
    %c0_124 = arith.constant 0 : index
    %c0_125 = arith.constant 0 : index
    %378 = vector.load %arg13[%c0_123, %c0_124, %c0_125] : memref<4x128x64xbf16, #tpu.memory_space<vmem>>, vector<1x128x64xbf16>
    %379 = vector.shape_cast %378 : vector<1x128x64xbf16> to vector<128x64xbf16>
    %380 = arith.truncf %377 : vector<16x128xf32> to vector<16x128xbf16>
    %cst_126 = arith.constant dense<0.000000e+00> : vector<16x64xf32>
    %381 = tpu.matmul %380, %379, %cst_126 {dimension_numbers = #tpu.dot_dimension_numbers<[1], [0], [0], [1], [0, 0, 1, 1], [], []>} : vector<16x128xbf16>, vector<128x64xbf16>, vector<16x64xf32> -> vector<16x64xf32>
    %382 = vector.extract_strided_slice %343 {offsets = [1, 0, 0], sizes = [1, 16, 512], strides = [1, 1, 1]} : vector<2x16x512xf32> to vector<1x16x512xf32>
    %383 = vector.shape_cast %382 : vector<1x16x512xf32> to vector<16x512xf32>
    %c0_127 = arith.constant 0 : index
    %c0_128 = arith.constant 0 : index
    %c0_129 = arith.constant 0 : index
    %384 = vector.load %arg12[%c0_127, %c0_128, %c0_129] : memref<4x64x512xbf16, #tpu.memory_space<vmem>>, vector<1x64x512xbf16>
    %385 = vector.shape_cast %384 : vector<1x64x512xbf16> to vector<64x512xbf16>
    %386 = arith.truncf %381 : vector<16x64xf32> to vector<16x64xbf16>
    %cst_130 = arith.constant dense<0.000000e+00> : vector<16x512xf32>
    %387 = tpu.matmul %386, %385, %cst_130 {dimension_numbers = #tpu.dot_dimension_numbers<[1], [0], [0], [1], [0, 0, 1, 1], [], []>} : vector<16x64xbf16>, vector<64x512xbf16>, vector<16x512xf32> -> vector<16x512xf32>
    %388 = arith.addf %383, %387 : vector<16x512xf32>
    %389 = vector.extract_strided_slice %388 {offsets = [0, 0], sizes = [16, 128], strides = [1, 1]} : vector<16x512xf32> to vector<16x128xf32>
    %390 = arith.negf %389 : vector<16x128xf32>
    %391 = math.exp %390 : vector<16x128xf32>
    %cst_131 = arith.constant 1.000000e+00 : f32
    %392 = vector.broadcast %cst_131 : f32 to vector<16x128xf32>
    %393 = arith.addf %392, %391 : vector<16x128xf32>
    %394 = arith.divf %392, %393 : vector<16x128xf32>
    %395 = vector.extract_strided_slice %388 {offsets = [0, 128], sizes = [16, 128], strides = [1, 1]} : vector<16x512xf32> to vector<16x128xf32>
    %396 = arith.negf %395 : vector<16x128xf32>
    %397 = math.exp %396 : vector<16x128xf32>
    %cst_132 = arith.constant 1.000000e+00 : f32
    %398 = vector.broadcast %cst_132 : f32 to vector<16x128xf32>
    %399 = arith.addf %398, %397 : vector<16x128xf32>
    %400 = arith.divf %398, %399 : vector<16x128xf32>
    %401 = vector.extract_strided_slice %388 {offsets = [0, 256], sizes = [16, 128], strides = [1, 1]} : vector<16x512xf32> to vector<16x128xf32>
    %402 = math.tanh %401 : vector<16x128xf32>
    %403 = vector.extract_strided_slice %388 {offsets = [0, 384], sizes = [16, 128], strides = [1, 1]} : vector<16x512xf32> to vector<16x128xf32>
    %404 = arith.negf %403 : vector<16x128xf32>
    %405 = math.exp %404 : vector<16x128xf32>
    %cst_133 = arith.constant 1.000000e+00 : f32
    %406 = vector.broadcast %cst_133 : f32 to vector<16x128xf32>
    %407 = arith.addf %406, %405 : vector<16x128xf32>
    %408 = arith.divf %406, %407 : vector<16x128xf32>
    %409 = arith.mulf %400, %375 : vector<16x128xf32>
    %410 = arith.mulf %394, %402 : vector<16x128xf32>
    %411 = arith.addf %409, %410 : vector<16x128xf32>
    %412 = math.tanh %411 : vector<16x128xf32>
    %413 = arith.mulf %408, %412 : vector<16x128xf32>
    %c0_134 = arith.constant 0 : index
    %c0_135 = arith.constant 0 : index
    %c0_136 = arith.constant 0 : index
    %414 = vector.load %arg13[%c0_134, %c0_135, %c0_136] : memref<4x128x64xbf16, #tpu.memory_space<vmem>>, vector<1x128x64xbf16>
    %415 = vector.shape_cast %414 : vector<1x128x64xbf16> to vector<128x64xbf16>
    %416 = arith.truncf %413 : vector<16x128xf32> to vector<16x128xbf16>
    %cst_137 = arith.constant dense<0.000000e+00> : vector<16x64xf32>
    %417 = tpu.matmul %416, %415, %cst_137 {dimension_numbers = #tpu.dot_dimension_numbers<[1], [0], [0], [1], [0, 0, 1, 1], [], []>} : vector<16x128xbf16>, vector<128x64xbf16>, vector<16x64xf32> -> vector<16x64xf32>
    %418 = vector.shape_cast %381 : vector<16x64xf32> to vector<1x16x64xf32>
    %419 = vector.shape_cast %417 : vector<16x64xf32> to vector<1x16x64xf32>
    %420 = tpu.concatenate %418, %419 in 0 : vector<1x16x64xf32>, vector<1x16x64xf32> -> vector<2x16x64xf32>
    %421 = vector.extract_strided_slice %342 {offsets = [0, 0, 512], sizes = [2, 16, 512], strides = [1, 1, 1]} : vector<2x16x1024xf32> to vector<2x16x512xf32>
    %cst_138 = arith.constant 0.000000e+00 : f32
    %422 = vector.broadcast %cst_138 : f32 to vector<16x64xf32>
    %cst_139 = arith.constant 0.000000e+00 : f32
    %423 = vector.broadcast %cst_139 : f32 to vector<16x128xf32>
    %424 = vector.extract_strided_slice %421 {offsets = [1, 0, 0], sizes = [1, 16, 512], strides = [1, 1, 1]} : vector<2x16x512xf32> to vector<1x16x512xf32>
    %425 = vector.shape_cast %424 : vector<1x16x512xf32> to vector<16x512xf32>
    %c1_140 = arith.constant 1 : index
    %c0_141 = arith.constant 0 : index
    %c0_142 = arith.constant 0 : index
    %426 = vector.load %arg12[%c1_140, %c0_141, %c0_142] : memref<4x64x512xbf16, #tpu.memory_space<vmem>>, vector<1x64x512xbf16>
    %427 = vector.shape_cast %426 : vector<1x64x512xbf16> to vector<64x512xbf16>
    %428 = arith.truncf %422 : vector<16x64xf32> to vector<16x64xbf16>
    %cst_143 = arith.constant dense<0.000000e+00> : vector<16x512xf32>
    %429 = tpu.matmul %428, %427, %cst_143 {dimension_numbers = #tpu.dot_dimension_numbers<[1], [0], [0], [1], [0, 0, 1, 1], [], []>} : vector<16x64xbf16>, vector<64x512xbf16>, vector<16x512xf32> -> vector<16x512xf32>
    %430 = arith.addf %425, %429 : vector<16x512xf32>
    %431 = vector.extract_strided_slice %430 {offsets = [0, 0], sizes = [16, 128], strides = [1, 1]} : vector<16x512xf32> to vector<16x128xf32>
    %432 = arith.negf %431 : vector<16x128xf32>
    %433 = math.exp %432 : vector<16x128xf32>
    %cst_144 = arith.constant 1.000000e+00 : f32
    %434 = vector.broadcast %cst_144 : f32 to vector<16x128xf32>
    %435 = arith.addf %434, %433 : vector<16x128xf32>
    %436 = arith.divf %434, %435 : vector<16x128xf32>
    %437 = vector.extract_strided_slice %430 {offsets = [0, 128], sizes = [16, 128], strides = [1, 1]} : vector<16x512xf32> to vector<16x128xf32>
    %438 = arith.negf %437 : vector<16x128xf32>
    %439 = math.exp %438 : vector<16x128xf32>
    %cst_145 = arith.constant 1.000000e+00 : f32
    %440 = vector.broadcast %cst_145 : f32 to vector<16x128xf32>
    %441 = arith.addf %440, %439 : vector<16x128xf32>
    %442 = arith.divf %440, %441 : vector<16x128xf32>
    %443 = vector.extract_strided_slice %430 {offsets = [0, 256], sizes = [16, 128], strides = [1, 1]} : vector<16x512xf32> to vector<16x128xf32>
    %444 = math.tanh %443 : vector<16x128xf32>
    %445 = vector.extract_strided_slice %430 {offsets = [0, 384], sizes = [16, 128], strides = [1, 1]} : vector<16x512xf32> to vector<16x128xf32>
    %446 = arith.negf %445 : vector<16x128xf32>
    %447 = math.exp %446 : vector<16x128xf32>
    %cst_146 = arith.constant 1.000000e+00 : f32
    %448 = vector.broadcast %cst_146 : f32 to vector<16x128xf32>
    %449 = arith.addf %448, %447 : vector<16x128xf32>
    %450 = arith.divf %448, %449 : vector<16x128xf32>
    %451 = arith.mulf %442, %423 : vector<16x128xf32>
    %452 = arith.mulf %436, %444 : vector<16x128xf32>
    %453 = arith.addf %451, %452 : vector<16x128xf32>
    %454 = math.tanh %453 : vector<16x128xf32>
    %455 = arith.mulf %450, %454 : vector<16x128xf32>
    %c1_147 = arith.constant 1 : index
    %c0_148 = arith.constant 0 : index
    %c0_149 = arith.constant 0 : index
    %456 = vector.load %arg13[%c1_147, %c0_148, %c0_149] : memref<4x128x64xbf16, #tpu.memory_space<vmem>>, vector<1x128x64xbf16>
    %457 = vector.shape_cast %456 : vector<1x128x64xbf16> to vector<128x64xbf16>
    %458 = arith.truncf %455 : vector<16x128xf32> to vector<16x128xbf16>
    %cst_150 = arith.constant dense<0.000000e+00> : vector<16x64xf32>
    %459 = tpu.matmul %458, %457, %cst_150 {dimension_numbers = #tpu.dot_dimension_numbers<[1], [0], [0], [1], [0, 0, 1, 1], [], []>} : vector<16x128xbf16>, vector<128x64xbf16>, vector<16x64xf32> -> vector<16x64xf32>
    %460 = vector.extract_strided_slice %421 {offsets = [0, 0, 0], sizes = [1, 16, 512], strides = [1, 1, 1]} : vector<2x16x512xf32> to vector<1x16x512xf32>
    %461 = vector.shape_cast %460 : vector<1x16x512xf32> to vector<16x512xf32>
    %c1_151 = arith.constant 1 : index
    %c0_152 = arith.constant 0 : index
    %c0_153 = arith.constant 0 : index
    %462 = vector.load %arg12[%c1_151, %c0_152, %c0_153] : memref<4x64x512xbf16, #tpu.memory_space<vmem>>, vector<1x64x512xbf16>
    %463 = vector.shape_cast %462 : vector<1x64x512xbf16> to vector<64x512xbf16>
    %464 = arith.truncf %459 : vector<16x64xf32> to vector<16x64xbf16>
    %cst_154 = arith.constant dense<0.000000e+00> : vector<16x512xf32>
    %465 = tpu.matmul %464, %463, %cst_154 {dimension_numbers = #tpu.dot_dimension_numbers<[1], [0], [0], [1], [0, 0, 1, 1], [], []>} : vector<16x64xbf16>, vector<64x512xbf16>, vector<16x512xf32> -> vector<16x512xf32>
    %466 = arith.addf %461, %465 : vector<16x512xf32>
    %467 = vector.extract_strided_slice %466 {offsets = [0, 0], sizes = [16, 128], strides = [1, 1]} : vector<16x512xf32> to vector<16x128xf32>
    %468 = arith.negf %467 : vector<16x128xf32>
    %469 = math.exp %468 : vector<16x128xf32>
    %cst_155 = arith.constant 1.000000e+00 : f32
    %470 = vector.broadcast %cst_155 : f32 to vector<16x128xf32>
    %471 = arith.addf %470, %469 : vector<16x128xf32>
    %472 = arith.divf %470, %471 : vector<16x128xf32>
    %473 = vector.extract_strided_slice %466 {offsets = [0, 128], sizes = [16, 128], strides = [1, 1]} : vector<16x512xf32> to vector<16x128xf32>
    %474 = arith.negf %473 : vector<16x128xf32>
    %475 = math.exp %474 : vector<16x128xf32>
    %cst_156 = arith.constant 1.000000e+00 : f32
    %476 = vector.broadcast %cst_156 : f32 to vector<16x128xf32>
    %477 = arith.addf %476, %475 : vector<16x128xf32>
    %478 = arith.divf %476, %477 : vector<16x128xf32>
    %479 = vector.extract_strided_slice %466 {offsets = [0, 256], sizes = [16, 128], strides = [1, 1]} : vector<16x512xf32> to vector<16x128xf32>
    %480 = math.tanh %479 : vector<16x128xf32>
    %481 = vector.extract_strided_slice %466 {offsets = [0, 384], sizes = [16, 128], strides = [1, 1]} : vector<16x512xf32> to vector<16x128xf32>
    %482 = arith.negf %481 : vector<16x128xf32>
    %483 = math.exp %482 : vector<16x128xf32>
    %cst_157 = arith.constant 1.000000e+00 : f32
    %484 = vector.broadcast %cst_157 : f32 to vector<16x128xf32>
    %485 = arith.addf %484, %483 : vector<16x128xf32>
    %486 = arith.divf %484, %485 : vector<16x128xf32>
    %487 = arith.mulf %478, %453 : vector<16x128xf32>
    %488 = arith.mulf %472, %480 : vector<16x128xf32>
    %489 = arith.addf %487, %488 : vector<16x128xf32>
    %490 = math.tanh %489 : vector<16x128xf32>
    %491 = arith.mulf %486, %490 : vector<16x128xf32>
    %c1_158 = arith.constant 1 : index
    %c0_159 = arith.constant 0 : index
    %c0_160 = arith.constant 0 : index
    %492 = vector.load %arg13[%c1_158, %c0_159, %c0_160] : memref<4x128x64xbf16, #tpu.memory_space<vmem>>, vector<1x128x64xbf16>
    %493 = vector.shape_cast %492 : vector<1x128x64xbf16> to vector<128x64xbf16>
    %494 = arith.truncf %491 : vector<16x128xf32> to vector<16x128xbf16>
    %cst_161 = arith.constant dense<0.000000e+00> : vector<16x64xf32>
    %495 = tpu.matmul %494, %493, %cst_161 {dimension_numbers = #tpu.dot_dimension_numbers<[1], [0], [0], [1], [0, 0, 1, 1], [], []>} : vector<16x128xbf16>, vector<128x64xbf16>, vector<16x64xf32> -> vector<16x64xf32>
    %496 = vector.shape_cast %495 : vector<16x64xf32> to vector<1x16x64xf32>
    %497 = vector.shape_cast %459 : vector<16x64xf32> to vector<1x16x64xf32>
    %498 = tpu.concatenate %496, %497 in 0 : vector<1x16x64xf32>, vector<1x16x64xf32> -> vector<2x16x64xf32>
    %499 = tpu.concatenate %420, %498 in 2 : vector<2x16x64xf32>, vector<2x16x64xf32> -> vector<2x16x128xf32>
    %500 = vector.shape_cast %499 : vector<2x16x128xf32> to vector<32x128xf32>
    %c0_162 = arith.constant 0 : index
    %c0_163 = arith.constant 0 : index
    %501 = vector.load %arg10[%c0_162, %c0_163] : memref<128x1024xbf16, #tpu.memory_space<vmem>>, vector<128x1024xbf16>
    %502 = arith.truncf %500 : vector<32x128xf32> to vector<32x128xbf16>
    %cst_164 = arith.constant dense<0.000000e+00> : vector<32x1024xf32>
    %503 = tpu.matmul %502, %501, %cst_164 {dimension_numbers = #tpu.dot_dimension_numbers<[1], [0], [0], [1], [0, 0, 1, 1], [], []>} : vector<32x128xbf16>, vector<128x1024xbf16>, vector<32x1024xf32> -> vector<32x1024xf32>
    %c0_165 = arith.constant 0 : index
    %c0_166 = arith.constant 0 : index
    %504 = vector.load %arg11[%c0_165, %c0_166] : memref<1x1024xf32, #tpu.memory_space<vmem>>, vector<1x1024xf32>
    %505 = vector.broadcast %504 : vector<1x1024xf32> to vector<32x1024xf32>
    %506 = arith.addf %503, %505 : vector<32x1024xf32>
    %507 = vector.shape_cast %506 : vector<32x1024xf32> to vector<2x16x1024xf32>
    %508 = vector.extract_strided_slice %507 {offsets = [0, 0, 0], sizes = [2, 16, 512], strides = [1, 1, 1]} : vector<2x16x1024xf32> to vector<2x16x512xf32>
    %cst_167 = arith.constant 0.000000e+00 : f32
    %509 = vector.broadcast %cst_167 : f32 to vector<16x64xf32>
    %cst_168 = arith.constant 0.000000e+00 : f32
    %510 = vector.broadcast %cst_168 : f32 to vector<16x128xf32>
    %511 = vector.extract_strided_slice %508 {offsets = [0, 0, 0], sizes = [1, 16, 512], strides = [1, 1, 1]} : vector<2x16x512xf32> to vector<1x16x512xf32>
    %512 = vector.shape_cast %511 : vector<1x16x512xf32> to vector<16x512xf32>
    %c2_169 = arith.constant 2 : index
    %c0_170 = arith.constant 0 : index
    %c0_171 = arith.constant 0 : index
    %513 = vector.load %arg12[%c2_169, %c0_170, %c0_171] : memref<4x64x512xbf16, #tpu.memory_space<vmem>>, vector<1x64x512xbf16>
    %514 = vector.shape_cast %513 : vector<1x64x512xbf16> to vector<64x512xbf16>
    %515 = arith.truncf %509 : vector<16x64xf32> to vector<16x64xbf16>
    %cst_172 = arith.constant dense<0.000000e+00> : vector<16x512xf32>
    %516 = tpu.matmul %515, %514, %cst_172 {dimension_numbers = #tpu.dot_dimension_numbers<[1], [0], [0], [1], [0, 0, 1, 1], [], []>} : vector<16x64xbf16>, vector<64x512xbf16>, vector<16x512xf32> -> vector<16x512xf32>
    %517 = arith.addf %512, %516 : vector<16x512xf32>
    %518 = vector.extract_strided_slice %517 {offsets = [0, 0], sizes = [16, 128], strides = [1, 1]} : vector<16x512xf32> to vector<16x128xf32>
    %519 = arith.negf %518 : vector<16x128xf32>
    %520 = math.exp %519 : vector<16x128xf32>
    %cst_173 = arith.constant 1.000000e+00 : f32
    %521 = vector.broadcast %cst_173 : f32 to vector<16x128xf32>
    %522 = arith.addf %521, %520 : vector<16x128xf32>
    %523 = arith.divf %521, %522 : vector<16x128xf32>
    %524 = vector.extract_strided_slice %517 {offsets = [0, 128], sizes = [16, 128], strides = [1, 1]} : vector<16x512xf32> to vector<16x128xf32>
    %525 = arith.negf %524 : vector<16x128xf32>
    %526 = math.exp %525 : vector<16x128xf32>
    %cst_174 = arith.constant 1.000000e+00 : f32
    %527 = vector.broadcast %cst_174 : f32 to vector<16x128xf32>
    %528 = arith.addf %527, %526 : vector<16x128xf32>
    %529 = arith.divf %527, %528 : vector<16x128xf32>
    %530 = vector.extract_strided_slice %517 {offsets = [0, 256], sizes = [16, 128], strides = [1, 1]} : vector<16x512xf32> to vector<16x128xf32>
    %531 = math.tanh %530 : vector<16x128xf32>
    %532 = vector.extract_strided_slice %517 {offsets = [0, 384], sizes = [16, 128], strides = [1, 1]} : vector<16x512xf32> to vector<16x128xf32>
    %533 = arith.negf %532 : vector<16x128xf32>
    %534 = math.exp %533 : vector<16x128xf32>
    %cst_175 = arith.constant 1.000000e+00 : f32
    %535 = vector.broadcast %cst_175 : f32 to vector<16x128xf32>
    %536 = arith.addf %535, %534 : vector<16x128xf32>
    %537 = arith.divf %535, %536 : vector<16x128xf32>
    %538 = arith.mulf %529, %510 : vector<16x128xf32>
    %539 = arith.mulf %523, %531 : vector<16x128xf32>
    %540 = arith.addf %538, %539 : vector<16x128xf32>
    %541 = math.tanh %540 : vector<16x128xf32>
    %542 = arith.mulf %537, %541 : vector<16x128xf32>
    %c2_176 = arith.constant 2 : index
    %c0_177 = arith.constant 0 : index
    %c0_178 = arith.constant 0 : index
    %543 = vector.load %arg13[%c2_176, %c0_177, %c0_178] : memref<4x128x64xbf16, #tpu.memory_space<vmem>>, vector<1x128x64xbf16>
    %544 = vector.shape_cast %543 : vector<1x128x64xbf16> to vector<128x64xbf16>
    %545 = arith.truncf %542 : vector<16x128xf32> to vector<16x128xbf16>
    %cst_179 = arith.constant dense<0.000000e+00> : vector<16x64xf32>
    %546 = tpu.matmul %545, %544, %cst_179 {dimension_numbers = #tpu.dot_dimension_numbers<[1], [0], [0], [1], [0, 0, 1, 1], [], []>} : vector<16x128xbf16>, vector<128x64xbf16>, vector<16x64xf32> -> vector<16x64xf32>
    %547 = vector.extract_strided_slice %508 {offsets = [1, 0, 0], sizes = [1, 16, 512], strides = [1, 1, 1]} : vector<2x16x512xf32> to vector<1x16x512xf32>
    %548 = vector.shape_cast %547 : vector<1x16x512xf32> to vector<16x512xf32>
    %c2_180 = arith.constant 2 : index
    %c0_181 = arith.constant 0 : index
    %c0_182 = arith.constant 0 : index
    %549 = vector.load %arg12[%c2_180, %c0_181, %c0_182] : memref<4x64x512xbf16, #tpu.memory_space<vmem>>, vector<1x64x512xbf16>
    %550 = vector.shape_cast %549 : vector<1x64x512xbf16> to vector<64x512xbf16>
    %551 = arith.truncf %546 : vector<16x64xf32> to vector<16x64xbf16>
    %cst_183 = arith.constant dense<0.000000e+00> : vector<16x512xf32>
    %552 = tpu.matmul %551, %550, %cst_183 {dimension_numbers = #tpu.dot_dimension_numbers<[1], [0], [0], [1], [0, 0, 1, 1], [], []>} : vector<16x64xbf16>, vector<64x512xbf16>, vector<16x512xf32> -> vector<16x512xf32>
    %553 = arith.addf %548, %552 : vector<16x512xf32>
    %554 = vector.extract_strided_slice %553 {offsets = [0, 0], sizes = [16, 128], strides = [1, 1]} : vector<16x512xf32> to vector<16x128xf32>
    %555 = arith.negf %554 : vector<16x128xf32>
    %556 = math.exp %555 : vector<16x128xf32>
    %cst_184 = arith.constant 1.000000e+00 : f32
    %557 = vector.broadcast %cst_184 : f32 to vector<16x128xf32>
    %558 = arith.addf %557, %556 : vector<16x128xf32>
    %559 = arith.divf %557, %558 : vector<16x128xf32>
    %560 = vector.extract_strided_slice %553 {offsets = [0, 128], sizes = [16, 128], strides = [1, 1]} : vector<16x512xf32> to vector<16x128xf32>
    %561 = arith.negf %560 : vector<16x128xf32>
    %562 = math.exp %561 : vector<16x128xf32>
    %cst_185 = arith.constant 1.000000e+00 : f32
    %563 = vector.broadcast %cst_185 : f32 to vector<16x128xf32>
    %564 = arith.addf %563, %562 : vector<16x128xf32>
    %565 = arith.divf %563, %564 : vector<16x128xf32>
    %566 = vector.extract_strided_slice %553 {offsets = [0, 256], sizes = [16, 128], strides = [1, 1]} : vector<16x512xf32> to vector<16x128xf32>
    %567 = math.tanh %566 : vector<16x128xf32>
    %568 = vector.extract_strided_slice %553 {offsets = [0, 384], sizes = [16, 128], strides = [1, 1]} : vector<16x512xf32> to vector<16x128xf32>
    %569 = arith.negf %568 : vector<16x128xf32>
    %570 = math.exp %569 : vector<16x128xf32>
    %cst_186 = arith.constant 1.000000e+00 : f32
    %571 = vector.broadcast %cst_186 : f32 to vector<16x128xf32>
    %572 = arith.addf %571, %570 : vector<16x128xf32>
    %573 = arith.divf %571, %572 : vector<16x128xf32>
    %574 = arith.mulf %565, %540 : vector<16x128xf32>
    %575 = arith.mulf %559, %567 : vector<16x128xf32>
    %576 = arith.addf %574, %575 : vector<16x128xf32>
    %577 = math.tanh %576 : vector<16x128xf32>
    %578 = arith.mulf %573, %577 : vector<16x128xf32>
    %c2_187 = arith.constant 2 : index
    %c0_188 = arith.constant 0 : index
    %c0_189 = arith.constant 0 : index
    %579 = vector.load %arg13[%c2_187, %c0_188, %c0_189] : memref<4x128x64xbf16, #tpu.memory_space<vmem>>, vector<1x128x64xbf16>
    %580 = vector.shape_cast %579 : vector<1x128x64xbf16> to vector<128x64xbf16>
    %581 = arith.truncf %578 : vector<16x128xf32> to vector<16x128xbf16>
    %cst_190 = arith.constant dense<0.000000e+00> : vector<16x64xf32>
    %582 = tpu.matmul %581, %580, %cst_190 {dimension_numbers = #tpu.dot_dimension_numbers<[1], [0], [0], [1], [0, 0, 1, 1], [], []>} : vector<16x128xbf16>, vector<128x64xbf16>, vector<16x64xf32> -> vector<16x64xf32>
    %583 = vector.shape_cast %546 : vector<16x64xf32> to vector<1x16x64xf32>
    %584 = vector.shape_cast %582 : vector<16x64xf32> to vector<1x16x64xf32>
    %585 = tpu.concatenate %583, %584 in 0 : vector<1x16x64xf32>, vector<1x16x64xf32> -> vector<2x16x64xf32>
    %586 = vector.extract_strided_slice %507 {offsets = [0, 0, 512], sizes = [2, 16, 512], strides = [1, 1, 1]} : vector<2x16x1024xf32> to vector<2x16x512xf32>
    %cst_191 = arith.constant 0.000000e+00 : f32
    %587 = vector.broadcast %cst_191 : f32 to vector<16x64xf32>
    %cst_192 = arith.constant 0.000000e+00 : f32
    %588 = vector.broadcast %cst_192 : f32 to vector<16x128xf32>
    %589 = vector.extract_strided_slice %586 {offsets = [1, 0, 0], sizes = [1, 16, 512], strides = [1, 1, 1]} : vector<2x16x512xf32> to vector<1x16x512xf32>
    %590 = vector.shape_cast %589 : vector<1x16x512xf32> to vector<16x512xf32>
    %c3_193 = arith.constant 3 : index
    %c0_194 = arith.constant 0 : index
    %c0_195 = arith.constant 0 : index
    %591 = vector.load %arg12[%c3_193, %c0_194, %c0_195] : memref<4x64x512xbf16, #tpu.memory_space<vmem>>, vector<1x64x512xbf16>
    %592 = vector.shape_cast %591 : vector<1x64x512xbf16> to vector<64x512xbf16>
    %593 = arith.truncf %587 : vector<16x64xf32> to vector<16x64xbf16>
    %cst_196 = arith.constant dense<0.000000e+00> : vector<16x512xf32>
    %594 = tpu.matmul %593, %592, %cst_196 {dimension_numbers = #tpu.dot_dimension_numbers<[1], [0], [0], [1], [0, 0, 1, 1], [], []>} : vector<16x64xbf16>, vector<64x512xbf16>, vector<16x512xf32> -> vector<16x512xf32>
    %595 = arith.addf %590, %594 : vector<16x512xf32>
    %596 = vector.extract_strided_slice %595 {offsets = [0, 0], sizes = [16, 128], strides = [1, 1]} : vector<16x512xf32> to vector<16x128xf32>
    %597 = arith.negf %596 : vector<16x128xf32>
    %598 = math.exp %597 : vector<16x128xf32>
    %cst_197 = arith.constant 1.000000e+00 : f32
    %599 = vector.broadcast %cst_197 : f32 to vector<16x128xf32>
    %600 = arith.addf %599, %598 : vector<16x128xf32>
    %601 = arith.divf %599, %600 : vector<16x128xf32>
    %602 = vector.extract_strided_slice %595 {offsets = [0, 128], sizes = [16, 128], strides = [1, 1]} : vector<16x512xf32> to vector<16x128xf32>
    %603 = arith.negf %602 : vector<16x128xf32>
    %604 = math.exp %603 : vector<16x128xf32>
    %cst_198 = arith.constant 1.000000e+00 : f32
    %605 = vector.broadcast %cst_198 : f32 to vector<16x128xf32>
    %606 = arith.addf %605, %604 : vector<16x128xf32>
    %607 = arith.divf %605, %606 : vector<16x128xf32>
    %608 = vector.extract_strided_slice %595 {offsets = [0, 256], sizes = [16, 128], strides = [1, 1]} : vector<16x512xf32> to vector<16x128xf32>
    %609 = math.tanh %608 : vector<16x128xf32>
    %610 = vector.extract_strided_slice %595 {offsets = [0, 384], sizes = [16, 128], strides = [1, 1]} : vector<16x512xf32> to vector<16x128xf32>
    %611 = arith.negf %610 : vector<16x128xf32>
    %612 = math.exp %611 : vector<16x128xf32>
    %cst_199 = arith.constant 1.000000e+00 : f32
    %613 = vector.broadcast %cst_199 : f32 to vector<16x128xf32>
    %614 = arith.addf %613, %612 : vector<16x128xf32>
    %615 = arith.divf %613, %614 : vector<16x128xf32>
    %616 = arith.mulf %607, %588 : vector<16x128xf32>
    %617 = arith.mulf %601, %609 : vector<16x128xf32>
    %618 = arith.addf %616, %617 : vector<16x128xf32>
    %619 = math.tanh %618 : vector<16x128xf32>
    %620 = arith.mulf %615, %619 : vector<16x128xf32>
    %c3_200 = arith.constant 3 : index
    %c0_201 = arith.constant 0 : index
    %c0_202 = arith.constant 0 : index
    %621 = vector.load %arg13[%c3_200, %c0_201, %c0_202] : memref<4x128x64xbf16, #tpu.memory_space<vmem>>, vector<1x128x64xbf16>
    %622 = vector.shape_cast %621 : vector<1x128x64xbf16> to vector<128x64xbf16>
    %623 = arith.truncf %620 : vector<16x128xf32> to vector<16x128xbf16>
    %cst_203 = arith.constant dense<0.000000e+00> : vector<16x64xf32>
    %624 = tpu.matmul %623, %622, %cst_203 {dimension_numbers = #tpu.dot_dimension_numbers<[1], [0], [0], [1], [0, 0, 1, 1], [], []>} : vector<16x128xbf16>, vector<128x64xbf16>, vector<16x64xf32> -> vector<16x64xf32>
    %625 = vector.extract_strided_slice %586 {offsets = [0, 0, 0], sizes = [1, 16, 512], strides = [1, 1, 1]} : vector<2x16x512xf32> to vector<1x16x512xf32>
    %626 = vector.shape_cast %625 : vector<1x16x512xf32> to vector<16x512xf32>
    %c3_204 = arith.constant 3 : index
    %c0_205 = arith.constant 0 : index
    %c0_206 = arith.constant 0 : index
    %627 = vector.load %arg12[%c3_204, %c0_205, %c0_206] : memref<4x64x512xbf16, #tpu.memory_space<vmem>>, vector<1x64x512xbf16>
    %628 = vector.shape_cast %627 : vector<1x64x512xbf16> to vector<64x512xbf16>
    %629 = arith.truncf %624 : vector<16x64xf32> to vector<16x64xbf16>
    %cst_207 = arith.constant dense<0.000000e+00> : vector<16x512xf32>
    %630 = tpu.matmul %629, %628, %cst_207 {dimension_numbers = #tpu.dot_dimension_numbers<[1], [0], [0], [1], [0, 0, 1, 1], [], []>} : vector<16x64xbf16>, vector<64x512xbf16>, vector<16x512xf32> -> vector<16x512xf32>
    %631 = arith.addf %626, %630 : vector<16x512xf32>
    %632 = vector.extract_strided_slice %631 {offsets = [0, 0], sizes = [16, 128], strides = [1, 1]} : vector<16x512xf32> to vector<16x128xf32>
    %633 = arith.negf %632 : vector<16x128xf32>
    %634 = math.exp %633 : vector<16x128xf32>
    %cst_208 = arith.constant 1.000000e+00 : f32
    %635 = vector.broadcast %cst_208 : f32 to vector<16x128xf32>
    %636 = arith.addf %635, %634 : vector<16x128xf32>
    %637 = arith.divf %635, %636 : vector<16x128xf32>
    %638 = vector.extract_strided_slice %631 {offsets = [0, 128], sizes = [16, 128], strides = [1, 1]} : vector<16x512xf32> to vector<16x128xf32>
    %639 = arith.negf %638 : vector<16x128xf32>
    %640 = math.exp %639 : vector<16x128xf32>
    %cst_209 = arith.constant 1.000000e+00 : f32
    %641 = vector.broadcast %cst_209 : f32 to vector<16x128xf32>
    %642 = arith.addf %641, %640 : vector<16x128xf32>
    %643 = arith.divf %641, %642 : vector<16x128xf32>
    %644 = vector.extract_strided_slice %631 {offsets = [0, 256], sizes = [16, 128], strides = [1, 1]} : vector<16x512xf32> to vector<16x128xf32>
    %645 = math.tanh %644 : vector<16x128xf32>
    %646 = vector.extract_strided_slice %631 {offsets = [0, 384], sizes = [16, 128], strides = [1, 1]} : vector<16x512xf32> to vector<16x128xf32>
    %647 = arith.negf %646 : vector<16x128xf32>
    %648 = math.exp %647 : vector<16x128xf32>
    %cst_210 = arith.constant 1.000000e+00 : f32
    %649 = vector.broadcast %cst_210 : f32 to vector<16x128xf32>
    %650 = arith.addf %649, %648 : vector<16x128xf32>
    %651 = arith.divf %649, %650 : vector<16x128xf32>
    %652 = arith.mulf %643, %618 : vector<16x128xf32>
    %653 = arith.mulf %637, %645 : vector<16x128xf32>
    %654 = arith.addf %652, %653 : vector<16x128xf32>
    %655 = math.tanh %654 : vector<16x128xf32>
    %656 = arith.mulf %651, %655 : vector<16x128xf32>
    %c3_211 = arith.constant 3 : index
    %c0_212 = arith.constant 0 : index
    %c0_213 = arith.constant 0 : index
    %657 = vector.load %arg13[%c3_211, %c0_212, %c0_213] : memref<4x128x64xbf16, #tpu.memory_space<vmem>>, vector<1x128x64xbf16>
    %658 = vector.shape_cast %657 : vector<1x128x64xbf16> to vector<128x64xbf16>
    %659 = arith.truncf %656 : vector<16x128xf32> to vector<16x128xbf16>
    %cst_214 = arith.constant dense<0.000000e+00> : vector<16x64xf32>
    %660 = tpu.matmul %659, %658, %cst_214 {dimension_numbers = #tpu.dot_dimension_numbers<[1], [0], [0], [1], [0, 0, 1, 1], [], []>} : vector<16x128xbf16>, vector<128x64xbf16>, vector<16x64xf32> -> vector<16x64xf32>
    %661 = vector.shape_cast %660 : vector<16x64xf32> to vector<1x16x64xf32>
    %662 = vector.shape_cast %624 : vector<16x64xf32> to vector<1x16x64xf32>
    %663 = tpu.concatenate %661, %662 in 0 : vector<1x16x64xf32>, vector<1x16x64xf32> -> vector<2x16x64xf32>
    %664 = tpu.concatenate %585, %663 in 2 : vector<2x16x64xf32>, vector<2x16x64xf32> -> vector<2x16x128xf32>
    %cst_215 = arith.constant dense<0.000000e+00> : vector<2x128xf32>
    %665 = vector.multi_reduction <add>, %664, %cst_215 [1] : vector<2x16x128xf32> to vector<2x128xf32>
    %cst_216 = arith.constant 1.600000e+01 : f32
    %666 = vector.broadcast %cst_216 : f32 to vector<2x128xf32>
    %667 = arith.divf %665, %666 : vector<2x128xf32>
    %668 = arith.mulf %333, %667 : vector<2x128xf32>
    %c0_217 = arith.constant 0 : index
    %c0_218 = arith.constant 0 : index
    %669 = vector.load %arg14[%c0_217, %c0_218] : memref<128x64xbf16, #tpu.memory_space<vmem>>, vector<128x64xbf16>
    %670 = arith.truncf %668 : vector<2x128xf32> to vector<2x128xbf16>
    %cst_219 = arith.constant dense<0.000000e+00> : vector<2x64xf32>
    %671 = tpu.matmul %670, %669, %cst_219 {dimension_numbers = #tpu.dot_dimension_numbers<[1], [0], [0], [1], [0, 0, 1, 1], [], []>} : vector<2x128xbf16>, vector<128x64xbf16>, vector<2x64xf32> -> vector<2x64xf32>
    %c0_220 = arith.constant 0 : index
    %c0_221 = arith.constant 0 : index
    %672 = vector.load %arg15[%c0_220, %c0_221] : memref<1x64xf32, #tpu.memory_space<vmem>>, vector<1x64xf32>
    %673 = vector.broadcast %672 : vector<1x64xf32> to vector<2x64xf32>
    %674 = arith.addf %671, %673 : vector<2x64xf32>
    %cst_222 = arith.constant 0.000000e+00 : f32
    %675 = vector.broadcast %cst_222 : f32 to vector<2x64xf32>
    %676 = arith.cmpf ogt, %674, %675 : vector<2x64xf32>
    %cst_223 = arith.constant 0.00999999977 : f32
    %677 = vector.broadcast %cst_223 : f32 to vector<2x64xf32>
    %678 = arith.mulf %677, %674 : vector<2x64xf32>
    %679 = arith.select %676, %674, %678 : vector<2x64xi1>, vector<2x64xf32>
    %c0_224 = arith.constant 0 : index
    %c0_225 = arith.constant 0 : index
    %680 = vector.load %arg16[%c0_224, %c0_225] : memref<64x1xbf16, #tpu.memory_space<vmem>>, vector<64x1xbf16>
    %681 = arith.truncf %679 : vector<2x64xf32> to vector<2x64xbf16>
    %cst_226 = arith.constant dense<0.000000e+00> : vector<2x1xf32>
    %682 = tpu.matmul %681, %680, %cst_226 {dimension_numbers = #tpu.dot_dimension_numbers<[1], [0], [0], [1], [0, 0, 1, 1], [], []>} : vector<2x64xbf16>, vector<64x1xbf16>, vector<2x1xf32> -> vector<2x1xf32>
    %c0_227 = arith.constant 0 : index
    %c0_228 = arith.constant 0 : index
    %683 = vector.load %arg17[%c0_227, %c0_228] : memref<1x1xf32, #tpu.memory_space<vmem>>, vector<1x1xf32>
    %684 = vector.broadcast %683 : vector<1x1xf32> to vector<2x1xf32>
    %685 = arith.addf %682, %684 : vector<2x1xf32>
    %686 = arith.negf %685 : vector<2x1xf32>
    %687 = math.exp %686 : vector<2x1xf32>
    %cst_229 = arith.constant 1.000000e+00 : f32
    %688 = vector.broadcast %cst_229 : f32 to vector<2x1xf32>
    %689 = arith.addf %688, %687 : vector<2x1xf32>
    %690 = arith.divf %688, %689 : vector<2x1xf32>
    %c0_230 = arith.constant 0 : index
    %c0_231 = arith.constant 0 : index
    %691 = vector.load %arg18[%c0_230, %c0_231] : memref<2x1xf32, #tpu.memory_space<vmem>>, vector<2x1xf32>
    tpu.vector_store %arg18[%c0_230, %c0_231], %690 {strides = array<i32>} : memref<2x1xf32, #tpu.memory_space<vmem>>, vector<2x1xf32>,
    return
  }
}

</mosaic_0001>

<bundles_post_ra>
// kernel: bilstm_demo_forward.1
= control target key start
LH: loop header
LB: loop body
LE: loop exit
PB: predicated region body
PF: predicated region fallthrough
CT: control target
= control target key end

     0   :  { %s11724_s0 = inlined_call_operand.vmem [shape: f32[2,16,64], index: 0, kind: input, shape index: {}]   ;;  %s11725_s1 = inlined_call_operand.vmem [shape: f32[2,16,64], index: 1, kind: input, shape index: {}]   ;;  %s11726_s2 = inlined_call_operand.hbm [shape: bf16[64,1024], index: 2, kind: input, shape index: {}]   ;;  %s11727_s3 = inlined_call_operand.vmem [shape: f32[1,1024], index: 3, kind: input, shape index: {}]   ;;  %s11728_s4 = inlined_call_operand.vmem [shape: bf16[128,1024], index: 4, kind: input, shape index: {}]   ;;  %s11729_s5 = inlined_call_operand.vmem [shape: f32[1,1024], index: 5, kind: input, shape index: {}]   ;;  %s11730_s6 = inlined_call_operand.vmem [shape: bf16[4,64,512], index: 6, kind: input, shape index: {}]   ;;  %s11731_s7 = inlined_call_operand.vmem [shape: bf16[4,128,64], index: 7, kind: input, shape index: {}]   ;;  %s11732_s8 = inlined_call_operand.hbm [shape: bf16[64,1024], index: 8, kind: input, shape index: {}]   ;;  %s11733_s9 = inlined_call_operand.hbm [shape: f32[1,1024], index: 9, kind: input, shape index: {}]   ;;  %s11734_s10 = inlined_call_operand.vmem [shape: bf16[128,1024], index: 10, kind: input, shape index: {}]   ;;  %s11735_s11 = inlined_call_operand.hbm [shape: f32[1,1024], index: 11, kind: input, shape index: {}]   ;;  %s11736_s12 = inlined_call_operand.hbm [shape: bf16[4,64,512], index: 12, kind: input, shape index: {}]   ;;  %s11737_s13 = inlined_call_operand.vmem [shape: bf16[4,128,64], index: 13, kind: input, shape index: {}]   ;;  %s11738_s14 = inlined_call_operand.vmem [shape: bf16[128,64], index: 14, kind: input, shape index: {}]   ;;  %s11739_s15 = inlined_call_operand.vmem [shape: f32[1,64], index: 15, kind: input, shape index: {}]   ;;  %s11740_s16 = inlined_call_operand.vmem [shape: bf16[64,1], index: 16, kind: input, shape index: {}]   ;;  %s11741_s17 = inlined_call_operand.<no memory space> [shape: f32[1,1], index: 17, kind: input, shape index: {}]   ;;  %s11742_s18 = inlined_call_operand.vmem [shape: f32[2,1], index: 18, kind: output, shape index: {}]  }
   0x1   :  { %11746 = sst [smem:[#allocation14_spill]] %s11724_s0  ;;  %v23_v0 = vstv %s11741_s17 }
   0x2   :  { %11747 = sst [smem:[#allocation15_spill]] %s11725_s1  ;;  %24 = vst [vmem:[#allocation2] sm:$0x1] %v23_v0 }
   0x3   :  { %11748 = sst [smem:[#allocation16_spill]] %s11726_s2 }
   0x4   :  { %25 = vsyncpa [#allocation4], 0 }
   0x5   :  { %26 = vsyncpa [#allocation6], 0 }
   0x6   :  { %27 = vsyncpa [#allocation9], 0  ;;  %s9302_s29 = smov [#allocation5]   ;;  %s9303_s0 = smov [#allocation8]  }
   0x7   :  { %s59_s30 = sshll.u32 %s9302_s29, 4  ;;  %s84_s19 = sshll.u32 %s9303_s0, 4  ;;  %s60_s30 = int_to_ptr.vmem [resolvable:$true] %s59_s30  ;;  %s85_s19 = int_to_ptr.vmem [resolvable:$true] %s84_s19 }
   0x8   :  { %s9186_s21 = scalar_lea.hbm %s11732_s8, 4096 }
   0x9   :  { %p9187_p0 = scmp.ne.s32.totalorder %s11732_s8, %s9186_s21  ;;  %p9190_p1 = scmp.lt.u32.totalorder %s9186_s21, %s11732_s8 }
   0xb   :  { %p9192_p2 = pnand %p9190_p1, %p9187_p0 }
   0xd   :  { %9195 = shalt.err (!%p9192_p2)
}
   0xe   :  { %s9196_s24 = scalar_lea.vmem %s60_s30, 4096  ;;  %p9201_p4 = scmp.lt.s32.totalorder %s60_s30, %s60_s30 }
   0xf   :  { %p9197_p3 = scmp.ne.s32.totalorder %s60_s30, %s9196_s24  ;;  %p9202_p5 = scmp.lt.s32.totalorder %s9196_s24, %s9196_s24 }
  0x11   :  { %p9203_p6 = por %p9202_p5, %p9201_p4 }
  0x13   :  { %p9204_p7 = pnand %p9203_p6, %p9197_p3 }
  0x15   :  { %9207 = shalt.err (!%p9204_p7)
}
  0x16   :  { %s9304_s25 = smov 512   ;;  %s9305_s26 = smov 32  }
  0x17   :  { %65 = dma.hbm_to_vmem [thread:$0]  %s11732_s8, 4096, %s60_s30, [#allocation6], %s9304_s25, %s9304_s25, %s9305_s26  }
  0x18   :  { %s9208_s1 = scalar_lea.hbm %s11735_s11, 128 }
  0x19   :  { %p9209_p8 = scmp.ne.s32.totalorder %s11735_s11, %s9208_s1  ;;  %p9212_p9 = scmp.lt.u32.totalorder %s9208_s1, %s11735_s11 }
  0x1b   :  { %p9214_p10 = pnand %p9212_p9, %p9209_p8 }
  0x1d   :  { %9217 = shalt.err (!%p9214_p10)
}
  0x1e   :  { %s9218_s23 = scalar_lea.vmem %s85_s19, 128  ;;  %p9223_p12 = scmp.lt.s32.totalorder %s85_s19, %s85_s19 }
  0x1f   :  { %p9219_p11 = scmp.ne.s32.totalorder %s85_s19, %s9218_s23  ;;  %p9224_p13 = scmp.lt.s32.totalorder %s9218_s23, %s9218_s23 }
  0x21   :  { %p9225_p0 = por %p9224_p13, %p9223_p12 }
  0x23   :  { %p9226_p1 = pnand %p9225_p0, %p9219_p11 }
  0x25   :  { %9229 = shalt.err (!%p9226_p1)
}
  0x26   :  { %87 = dma.hbm_to_vmem [thread:$0]  %s11735_s11, 128, %s85_s19, [#allocation9]  }
  0x27   :  { %s9306_s17 = smov [#allocation3]   ;;  %s9307_s27 = smov [#allocation7]  }
  0x28   :  { %s37_s24 = sshll.u32 %s9306_s17, 4  ;;  %s72_s28 = sshll.u32 %s9307_s27, 4  ;;  %s38_s24 = int_to_ptr.vmem [resolvable:$true] %s37_s24  ;;  %s73_s28 = int_to_ptr.vmem [resolvable:$true] %s72_s28 }
  0x29   :  { %s11749_s1 = sld [smem:[#allocation16_spill]] }
  0x2f   :  { %s9230_s20 = scalar_lea.hbm %s11749_s1, 4096 }
  0x30   :  { %p9231_p2 = scmp.ne.s32.totalorder %s11749_s1, %s9230_s20  ;;  %p9234_p3 = scmp.lt.u32.totalorder %s9230_s20, %s11749_s1 }
  0x32   :  { %p9236_p4 = pnand %p9234_p3, %p9231_p2 }
  0x34   :  { %9239 = shalt.err (!%p9236_p4)
}
  0x35   :  { %s9240_s11 = scalar_lea.vmem %s38_s24, 4096  ;;  %p9245_p6 = scmp.lt.s32.totalorder %s38_s24, %s38_s24 }
  0x36   :  { %p9241_p5 = scmp.ne.s32.totalorder %s38_s24, %s9240_s11  ;;  %p9246_p7 = scmp.lt.s32.totalorder %s9240_s11, %s9240_s11 }
  0x38   :  { %p9247_p8 = por %p9246_p7, %p9245_p6 }
  0x3a   :  { %p9248_p9 = pnand %p9247_p8, %p9241_p5 }
  0x3c   :  { %9251 = shalt.err (!%p9248_p9)
}
  0x3d   :  { %43 = dma.hbm_to_vmem [thread:$0]  %s11749_s1, 4096, %s38_s24, [#allocation4], %s9304_s25, %s9304_s25, %s9305_s26  }
  0x3e   :  { %s9252_s27 = scalar_lea.hbm %s11733_s9, 128 }
  0x3f   :  { %p9253_p10 = scmp.ne.s32.totalorder %s11733_s9, %s9252_s27  ;;  %p9256_p11 = scmp.lt.u32.totalorder %s9252_s27, %s11733_s9 }
  0x41   :  { %p9258_p12 = pnand %p9256_p11, %p9253_p10 }
  0x43   :  { %9261 = shalt.err (!%p9258_p12)
}
  0x44   :  { %s9262_s22 = scalar_lea.vmem %s73_s28, 128  ;;  %p9267_p0 = scmp.lt.s32.totalorder %s73_s28, %s73_s28 }
  0x45   :  { %p9263_p13 = scmp.ne.s32.totalorder %s73_s28, %s9262_s22  ;;  %p9268_p1 = scmp.lt.s32.totalorder %s9262_s22, %s9262_s22 }
  0x47   :  { %p9269_p2 = por %p9268_p1, %p9267_p0 }
  0x49   :  { %p9270_p3 = pnand %p9269_p2, %p9263_p13 }
  0x4b   :  { %9273 = shalt.err (!%p9270_p3)
}
  0x4c   :  { %75 = dma.hbm_to_vmem [thread:$0]  %s11733_s9, 128, %s73_s28, [#allocation6]  }
  0x4d   :  { %s9308_s24 = smov [#allocation10]   ;;  %s9274_s11 = scalar_lea.hbm %s11736_s12, 8192 }
  0x4e   :  { %s93_s1 = sshll.u32 %s9308_s24, 4  ;;  %p9275_p4 = scmp.ne.s32.totalorder %s11736_s12, %s9274_s11  ;;  %s94_s1 = int_to_ptr.vmem [resolvable:$true] %s93_s1 }
  0x4f   :  { %p9278_p5 = scmp.lt.u32.totalorder %s9274_s11, %s11736_s12 }
  0x51   :  { %p9280_p6 = pnand %p9278_p5, %p9275_p4 }
  0x53   :  { %9283 = shalt.err (!%p9280_p6)
}
  0x54   :  { %s9284_s27 = scalar_lea.vmem %s94_s1, 8192  ;;  %p9289_p8 = scmp.lt.s32.totalorder %s94_s1, %s94_s1 }
  0x55   :  { %p9285_p7 = scmp.ne.s32.totalorder %s94_s1, %s9284_s27  ;;  %p9290_p9 = scmp.lt.s32.totalorder %s9284_s27, %s9284_s27 }
  0x57   :  { %p9291_p10 = por %p9290_p9, %p9289_p8 }
  0x59   :  { %p9292_p11 = pnand %p9291_p10, %p9285_p7 }
  0x5b   :  { %9295 = shalt.err (!%p9292_p11)
}
  0x5c   :  { %s9309_s9 = smov 256   ;;  %s9310_s28 = smov 16  }
  0x5d   :  { %99 = dma.hbm_to_vmem [thread:$0]  %s11736_s12, 8192, %s94_s1, [#allocation9], %s9309_s9, %s9309_s9, %s9310_s28  }
  0x5e   :  { %9296 = dma.done.wait [#allocation4], 4096  }
  0x5f   :  { %9297 = vsyncadd [#allocation4], 4294963200 }
  0x60   :  { %9298 = dma.done.wait [#allocation6], 4224  }
  0x61   :  { %9299 = vsyncadd [#allocation6], 4294963072 }
  0x62   :  { %9300 = dma.done.wait [#allocation9], 8320  }
  0x63   :  { %9301 = vsyncadd [#allocation9], 4294958976  ;;  %v9311_v1 = vmov 0   ;;  %v130_v2 = vld [vmem:[#allocation3] sm:$0xff]  ;;  %v131_v4 = vld [vmem:[#allocation3 + $0x8] sm:$0xff]  ;;  %s11750_s21 = sld [smem:[#allocation14_spill]] }
  0x64   :  { %405 = vmatprep.mubr.bf16.mxu0 %v9311_v1  ;;  %458 = vmatprep.mubr.bf16.mxu1 %v9311_v1  ;;  %v134_v3 = vld [vmem:[#allocation3 + $0x20] sm:$0xff]  ;;  %v135_v6 = vld [vmem:[#allocation3 + $0x28] sm:$0xff]  ;;  %v132_v32 = vld [vmem:[#allocation3 + $0x10] sm:$0xff]  ;;  %vm366_vm0 = vcmask 523264   ;;  %vm9313_vm1 = vmmov 0   ;;  %s9314_s30 = smov 64  }
  0x65   :  { %v6932_v5 = vcombine.high %v130_v2, %v134_v3  ;;  %v6931_v7 = vcombine.low %v130_v2, %v134_v3  ;;  %v138_v8 = vld [vmem:[#allocation3 + $0x40] sm:$0xff]  ;;  %v6934_v10 = vcombine.high %v131_v4, %v135_v6  ;;  %v6933_v11 = vcombine.low %v131_v4, %v135_v6  ;;  %v139_v13 = vld [vmem:[#allocation3 + $0x48] sm:$0xff]  ;;  %v136_v33 = vld [vmem:[#allocation3 + $0x30] sm:$0xff]  ;;  %s11751_s0 = sld [smem:[#allocation15_spill]] }
  0x66   :  { %v142_v9 = vld [vmem:[#allocation3 + $0x60] sm:$0xff]  ;;  %v143_v14 = vld [vmem:[#allocation3 + $0x68] sm:$0xff]  ;;  %v133_v35 = vld [vmem:[#allocation3 + $0x18] sm:$0xff]  ;;  %v6936_v40 = vcombine.high %v132_v32, %v136_v33  ;;  %v6935_v47 = vcombine.low %v132_v32, %v136_v33  ;;  %vm6738_vm2 = vcmask 1041409   ;;  %vm6922_vm4 = vcmask 1024  }
  0x67   :  { %v6940_v12 = vcombine.high %v138_v8, %v142_v9  ;;  %v146_v15 = vld [vmem:[#allocation3 + $0x80] sm:$0xff]  ;;  %373 = vmatprep.subr.bf16.mxu0 %v6932_v5  ;;  %v6942_v16 = vcombine.high %v139_v13, %v143_v14  ;;  %v147_v18 = vld [vmem:[#allocation3 + $0x88] sm:$0xff]  ;;  %426 = vmatprep.subr.bf16.mxu1 %v6934_v10  ;;  %v6939_v20 = vcombine.low %v138_v8, %v142_v9  ;;  %v137_v36 = vld [vmem:[#allocation3 + $0x38] sm:$0xff] }
  0x68   :  { %v150_v17 = vld [vmem:[#allocation3 + $0xa0] sm:$0xff]  ;;  %v151_v19 = vld [vmem:[#allocation3 + $0xa8] sm:$0xff]  ;;  %374 = vmatpush1.bf16.msra.mxu0 %v6931_v7  ;;  %427 = vmatpush1.bf16.msra.mxu1 %v6933_v11  ;;  %v6941_v21 = vcombine.low %v139_v13, %v143_v14  ;;  %v6938_v41 = vcombine.high %v133_v35, %v137_v36  ;;  %v140_v42 = vld [vmem:[#allocation3 + $0x50] sm:$0xff]  ;;  %v6937_v48 = vcombine.low %v133_v35, %v137_v36 }
  0x69   :  { %375 = vmatprep.subr.bf16.mxu0 %v6940_v12  ;;  %v6948_v22 = vcombine.high %v146_v15, %v150_v17  ;;  %428 = vmatprep.subr.bf16.mxu1 %v6942_v16  ;;  %v6950_v23 = vcombine.high %v147_v18, %v151_v19  ;;  %v154_v24 = vld [vmem:[#allocation3 + $0xc0] sm:$0xff]  ;;  %v155_v26 = vld [vmem:[#allocation3 + $0xc8] sm:$0xff]  ;;  %v6947_v28 = vcombine.low %v146_v15, %v150_v17  ;;  %v144_v43 = vld [vmem:[#allocation3 + $0x70] sm:$0xff] }
  0x6a   :  { %v158_v25 = vld [vmem:[#allocation3 + $0xe0] sm:$0xff]  ;;  %v159_v27 = vld [vmem:[#allocation3 + $0xe8] sm:$0xff]  ;;  %v6949_v29 = vcombine.low %v147_v18, %v151_v19  ;;  %v141_v45 = vld [vmem:[#allocation3 + $0x58] sm:$0xff]  ;;  %v6944_v49 = vcombine.high %v140_v42, %v144_v43  ;;  %v6943_v56 = vcombine.low %v140_v42, %v144_v43 }
  0x6b   :  { %v6956_v30 = vcombine.high %v154_v24, %v158_v25  ;;  %v6958_v31 = vcombine.high %v155_v26, %v159_v27  ;;  %v126_v34 = vld [vmem:[%s11750_s21] sm:$0xff]  ;;  %v6955_v37 = vcombine.low %v154_v24, %v158_v25  ;;  %v127_v38 = vld [vmem:[%s11750_s21 + $0x8] sm:$0xff]  ;;  %v6957_v39 = vcombine.low %v155_v26, %v159_v27  ;;  %v128_v51 = vld [vmem:[%s11750_s21 + $0x10] sm:$0xff] }
  0x6c   :  { %376 = vmatpush1.bf16.msra.mxu0 %v6939_v20  ;;  %429 = vmatpush1.bf16.msra.mxu1 %v6941_v21  ;;  %v9487_v44 = vpack.c.bf16 %v127_v38, %v126_v34  ;;  %v145_v46 = vld [vmem:[#allocation3 + $0x78] sm:$0xff]  ;;  %v148_v52 = vld [vmem:[#allocation3 + $0x90] sm:$0xff]  ;;  %v9312_v26 = vmov 0.0   ;;  %v9602_v27 = vld [vmem:[%s11731_s7 + $0x8] sm:$0xff]   ;;  %v166_v34 = vlaneseq }
  0x6d   :  { %377 = vmatprep.subr.bf16.mxu0 %v6948_v22  ;;  %430 = vmatprep.subr.bf16.mxu1 %v6950_v23  ;;  %v6946_v50 = vcombine.high %v141_v45, %v145_v46  ;;  %v152_v53 = vld [vmem:[#allocation3 + $0xb0] sm:$0xff]  ;;  %v149_v54 = vld [vmem:[#allocation3 + $0x98] sm:$0xff]  ;;  %v6945_v58 = vcombine.low %v141_v45, %v145_v46 }
  0x6e   :  { %v153_v55 = vld [vmem:[#allocation3 + $0xb8] sm:$0xff]  ;;  %v6952_v59 = vcombine.high %v148_v52, %v152_v53  ;;  %v156_v60 = vld [vmem:[#allocation3 + $0xd0] sm:$0xff]  ;;  %v6951_v3 = vcombine.low %v148_v52, %v152_v53  ;;  %v9650_v35 = vshrl.u32 %v166_v34, 7 }
  0x6f   :  { %v129_v57 = vld [vmem:[%s11750_s21 + $0x18] sm:$0xff]  ;;  %v6954_v61 = vcombine.high %v149_v54, %v153_v55  ;;  %v6953_v4 = vcombine.low %v149_v54, %v153_v55  ;;  %v9505_v7 = vld [vmem:[%s11730_s6 + $0x4] ss:$16 sps:$4 sm:$0xff]   ;;  %v9515_v11 = vld [vmem:[%s11730_s6] ss:$16 sps:$4 sm:$0xff]  }
  0x70   :  { %378 = vmatpush1.bf16.msra.mxu0 %v6947_v28  ;;  %431 = vmatpush1.bf16.msra.mxu1 %v6949_v29  ;;  %v160_v62 = vld [vmem:[#allocation3 + $0xf0] sm:$0xff]  ;;  %v157_v63 = vld [vmem:[#allocation3 + $0xd8] sm:$0xff]  ;;  %v163_v2 = vpack.c.bf16 %v129_v57, %v128_v51  ;;  %v9653_v36 = vsub.s32 0, %v9650_v35  ;;  %v9661_v38 = vsub.s32 1, %v9650_v35  ;;  %v9672_v42 = vsub.s32 3, %v9650_v35 }
  0x71   :  { %379 = vmatprep.subr.bf16.mxu0 %v6956_v30  ;;  %432 = vmatprep.subr.bf16.mxu1 %v6958_v31  ;;  %v161_v0 = vld [vmem:[#allocation3 + $0xf8] sm:$0xff]  ;;  %v6960_v5 = vcombine.high %v156_v60, %v160_v62  ;;  %v6959_v8 = vcombine.low %v156_v60, %v160_v62  ;;  %v9524_v13 = vld [vmem:[%s11730_s6 + $0x24] ss:$16 sps:$4 sm:$0xff]   ;;  %v9631_v31 = vld [vmem:[%s11731_s7 + $0x28] sm:$0xff]  }
  0x72   :  { %v6962_v6 = vcombine.high %v157_v63, %v161_v0  ;;  %v8407_v9 = vld [vmem:[%s11730_s6 + $0xc] ss:$16 sps:$4 sm:$0xff]   ;;  %v6961_v10 = vcombine.low %v157_v63, %v161_v0  ;;  %v8405_v12 = vld [vmem:[%s11730_s6 + $0x8] ss:$16 sps:$4 sm:$0xff]   ;;  %v9533_v15 = vld [vmem:[%s11730_s6 + $0x20] ss:$16 sps:$4 sm:$0xff]  }
  0x73   :  { %v8413_v14 = vld [vmem:[%s11730_s6 + $0x2c] ss:$16 sps:$4 sm:$0xff]   ;;  %v8411_v16 = vld [vmem:[%s11730_s6 + $0x28] ss:$16 sps:$4 sm:$0xff]   ;;  %v9543_v17 = vld [vmem:[%s11730_s6 + $0x44] ss:$16 sps:$4 sm:$0xff]  }
  0x74   :  { %380 = vmatpush1.bf16.msra.mxu0 %v6955_v37  ;;  %433 = vmatpush1.bf16.msra.mxu1 %v6957_v39  ;;  %v8419_v18 = vld [vmem:[%s11730_s6 + $0x4c] ss:$16 sps:$4 sm:$0xff]   ;;  %v9556_v19 = vld [vmem:[%s11730_s6 + $0x40] ss:$16 sps:$4 sm:$0xff]   ;;  %v8417_v20 = vld [vmem:[%s11730_s6 + $0x48] ss:$16 sps:$4 sm:$0xff]  }
  0x75   :  { %479 = vmatprep.subr.bf16.mxu0 %v6936_v40  ;;  %532 = vmatprep.subr.bf16.mxu1 %v6938_v41  ;;  %v9565_v21 = vld [vmem:[%s11730_s6 + $0x64] ss:$16 sps:$4 sm:$0xff]   ;;  %v8425_v22 = vld [vmem:[%s11730_s6 + $0x6c] ss:$16 sps:$4 sm:$0xff]   ;;  %v9575_v23 = vld [vmem:[%s11730_s6 + $0x60] ss:$16 sps:$4 sm:$0xff]  }
  0x76   :  { %v8423_v24 = vld [vmem:[%s11730_s6 + $0x68] ss:$16 sps:$4 sm:$0xff]   ;;  %v9593_v25 = vld [vmem:[%s11731_s7] sm:$0xff]   ;;  %v9609_v28 = vld [vmem:[%s11731_s7 + $0x10] sm:$0xff]  }
  0x77   :  { %6963 = vmatmul.mubr.msk.bf16.vlgmr.msra.gmra.mrb[0].mxu0 %vm366_vm0, %v9487_v44  ;;  %6965 = vmatmul.mubr.msk.bf16.vlgmr.msra.gmra.mrb[0].mxu1 %vm366_vm0, %v9487_v44  ;;  %v9616_v29 = vld [vmem:[%s11731_s7 + $0x18] sm:$0xff]   ;;  %v9623_v30 = vld [vmem:[%s11731_s7 + $0x20] sm:$0xff]   ;;  %v9638_v32 = vld [vmem:[%s11731_s7 + $0x30] sm:$0xff]  }
  0x78   :  { %480 = vmatpush1.bf16.msra.mxu0 %v6935_v47  ;;  %533 = vmatpush1.bf16.msra.mxu1 %v6937_v48  ;;  %v9645_v33 = vld [vmem:[%s11731_s7 + $0x38] sm:$0xff]   ;;  %v9658_v37 = vld [vmem:[%s11727_s3] sm:$0xff] }
  0x79   :  { %481 = vmatprep.subr.bf16.mxu0 %v6944_v49  ;;  %534 = vmatprep.subr.bf16.mxu1 %v6946_v50  ;;  %v9665_v39 = vrot.slane %v9658_v37, %v9653_v36  ;;  %v9669_v40 = vrot.slane %v9658_v37, %v9661_v38  ;;  %v9677_v50 = vsub.s32 2, %v9650_v35  ;;  %v9682_v55 = vrot.slane %v9658_v37, %v9672_v42 }
  0x7a   :  { %415 = vmatprep.mubr.bf16.mxu0 %v9311_v1  ;;  %468 = vmatprep.mubr.bf16.mxu1 %v9311_v1 }
  0x7b   :  { %v9687_v60 = vrot.slane %v9658_v37, %v9677_v50 }
  0x7c   :  { %482 = vmatpush1.bf16.msra.mxu0 %v6943_v56  ;;  %535 = vmatpush1.bf16.msra.mxu1 %v6945_v58 }
  0x7d   :  { %483 = vmatprep.subr.bf16.mxu0 %v6952_v59  ;;  %536 = vmatprep.subr.bf16.mxu1 %v6954_v61 }
  0x7f   :  { %6964 = vmatmul.mubr.msk.bf16.gmra.mrb[4].mxu0 %vm366_vm0, %v163_v2  ;;  %6966 = vmatmul.mubr.msk.bf16.gmra.mrb[4].mxu1 %vm366_vm0, %v163_v2 }
  0x80   :  { %484 = vmatpush1.bf16.msra.mxu0 %v6951_v3  ;;  %537 = vmatpush1.bf16.msra.mxu1 %v6953_v4 }
  0x81   :  { %485 = vmatprep.subr.bf16.mxu0 %v6960_v5  ;;  %538 = vmatprep.subr.bf16.mxu1 %v6962_v6 }
  0x82   :  { %511 = vmatprep.mubr.bf16.mxu0 %v9311_v1  ;;  %564 = vmatprep.mubr.bf16.mxu1 %v9311_v1 }
  0x84   :  { %486 = vmatpush1.bf16.msra.mxu0 %v6959_v8  ;;  %539 = vmatpush1.bf16.msra.mxu1 %v6961_v10 }
  0x85   :  { %684 = vmatprep.subr.bf16.mxu0 %v9505_v7  ;;  %727 = vmatprep.subr.bf16.mxu1 %v8407_v9 }
  0x87   :  { %6967 = vmatmul.mubr.msk.bf16.vlgmr.msra.gmra.mrb[8].mxu0 %vm366_vm0, %v9487_v44  ;;  %6969 = vmatmul.mubr.msk.bf16.vlgmr.msra.gmra.mrb[8].mxu1 %vm366_vm0, %v9487_v44 }
  0x88   :  { %685 = vmatpush1.bf16.msra.mxu0 %v9515_v11  ;;  %728 = vmatpush1.bf16.msra.mxu1 %v8405_v12 }
  0x89   :  { %686 = vmatprep.subr.bf16.mxu0 %v9524_v13  ;;  %729 = vmatprep.subr.bf16.mxu1 %v8413_v14 }
  0x8a   :  { %521 = vmatprep.mubr.bf16.mxu0 %v9311_v1  ;;  %574 = vmatprep.mubr.bf16.mxu1 %v9311_v1 }
  0x8c   :  { %687 = vmatpush1.bf16.msra.mxu0 %v9533_v15  ;;  %730 = vmatpush1.bf16.msra.mxu1 %v8411_v16 }
  0x8d   :  { %688 = vmatprep.subr.bf16.mxu0 %v9543_v17  ;;  %731 = vmatprep.subr.bf16.mxu1 %v8419_v18 }
  0x8f   :  { %6968 = vmatmul.mubr.msk.bf16.gmra.mrb[12].mxu0 %vm366_vm0, %v163_v2  ;;  %6970 = vmatmul.mubr.msk.bf16.gmra.mrb[12].mxu1 %vm366_vm0, %v163_v2 }
  0x90   :  { %689 = vmatpush1.bf16.msra.mxu0 %v9556_v19  ;;  %732 = vmatpush1.bf16.msra.mxu1 %v8417_v20 }
  0x91   :  { %690 = vmatprep.subr.bf16.mxu0 %v9565_v21  ;;  %733 = vmatprep.subr.bf16.mxu1 %v8425_v22 }
  0x92   :  { %716 = vmatprep.mubr.bf16.mxu0 %v9311_v1  ;;  %759 = vmatprep.mubr.bf16.mxu1 %v9311_v1 }
  0x94   :  { %691 = vmatpush1.bf16.msra.mxu0 %v9575_v23  ;;  %734 = vmatpush1.bf16.msra.mxu1 %v8423_v24 }
  0x95   :  { %979 = vmatprep.subr.bf16.mxu1 %v8407_v9  ;;  %7761 = vmatprep.subr.bf16.mxu0 %v9312_v26 }
  0x97   :  { %717 = vmatmul.mubr.bf16.vlgmr.msra.gmra.mrb[0].mxu0 %v9311_v1  ;;  %760 = vmatmul.mubr.bf16.vlgmr.msra.gmra.mrb[0].mxu1 %v9311_v1 }
  0x98   :  { %980 = vmatpush1.bf16.msra.mxu1 %v8405_v12  ;;  %1011 = vmatprep.mubr.bf16.mxu1 %v9311_v1 }
  0x99   :  { %981 = vmatprep.subr.bf16.mxu1 %v8413_v14  ;;  %7762 = vmatpush3.bf16.msra.mxu0 %v9593_v25 }
  0x9a   :  { %7763 = vmatprep.subr.bf16.mxu0 %v9312_v26  ;;  %7777 = vmatprep.mubr.msk.bf16.mxu0 %vm9313_vm1, %v9312_v26 }
  0x9c   :  { %982 = vmatpush1.bf16.msra.mxu1 %v8411_v16 }
  0x9d   :  { %983 = vmatprep.subr.bf16.mxu1 %v8419_v18  ;;  %7764 = vmatpush3.bf16.msra.mxu0 %v9602_v27 }
  0x9e   :  { %7765 = vmatprep.subr.bf16.mxu0 %v9312_v26 }
  0xa0   :  { %984 = vmatpush1.bf16.msra.mxu1 %v8417_v20 }
  0xa1   :  { %985 = vmatprep.subr.bf16.mxu1 %v8425_v22  ;;  %7766 = vmatpush3.bf16.msra.mxu0 %v9609_v28 }
  0xa2   :  { %7767 = vmatprep.subr.bf16.mxu0 %v9312_v26 }
  0xa4   :  { %986 = vmatpush1.bf16.msra.mxu1 %v8423_v24 }
  0xa5   :  { %7781 = vmatprep.subr.bf16.mxu1 %v9312_v26  ;;  %7768 = vmatpush3.bf16.msra.mxu0 %v9616_v29 }
  0xa6   :  { %7769 = vmatprep.subr.bf16.mxu0 %v9312_v26 }
  0xa9   :  { %7770 = vmatpush3.bf16.msra.mxu0 %v9623_v30 }
  0xaa   :  { %7771 = vmatprep.subr.bf16.mxu0 %v9312_v26 }
  0xad   :  { %7772 = vmatpush3.bf16.msra.mxu0 %v9631_v31 }
  0xae   :  { %7773 = vmatprep.subr.bf16.mxu0 %v9312_v26 }
  0xb1   :  { %7774 = vmatpush3.bf16.msra.mxu0 %v9638_v32 }
  0xb2   :  { %7775 = vmatprep.subr.bf16.mxu0 %v9312_v26 }
  0xb5   :  { %7776 = vmatpush3.bf16.msra.mxu0 %v9645_v33 }
  0xb6   :  { %936 = vmatprep.subr.bf16.mxu0 %v9505_v7 }
 0x16a   :  { %v718_v41 = vpop.f32.mrb[0].mxu0  ;;  %v761_v44 = vpop.f32.mrb[0].mxu1 }
 0x16b   :  { %v8113_v43 = vadd.f32 %v718_v41, %v9665_v39  ;;  %v720_v45 = vpop.f32.mrb[1].mxu0  ;;  %v763_v47 = vpop.f32.mrb[1].mxu1  ;;  %v8121_v62 = vadd.f32 %v761_v44, %v9687_v60 }
 0x16c   :  { %v8114_v46 = vadd.f32 %v720_v45, %v9669_v40  ;;  %v722_v48 = vpop.f32.mrb[2].mxu0  ;;  %v765_v52 = vpop.f32.mrb[2].mxu1  ;;  %v8122_v61 = vadd.f32 %v763_v47, %v9682_v55 }
 0x16d   :  { %v6987_v49 = vmul.f32 -1.442695, %v8113_v43  ;;  %v8115_v51 = vadd.f32 %v722_v48, %v9665_v39  ;;  %v724_v53 = vpop.f32.mrb[3].mxu0  ;;  %v767_v57 = vpop.f32.mrb[3].mxu1  ;;  %v8123_v2 = vadd.f32 %v765_v52, %v9687_v60 }
 0x16e   :  { %v6989_v54 = vmul.f32 -1.442695, %v8114_v46  ;;  %v8116_v56 = vadd.f32 %v724_v53, %v9669_v40  ;;  %v6991_v63 = vmul.f32 -1.442695, %v8122_v61  ;;  %v8124_v0 = vadd.f32 %v767_v57, %v9682_v55  ;;  %v9710_v61 = vld [vmem:[%s11730_s6 + $0x84] ss:$16 sps:$4 sm:$0xff]  }
 0x16f   :  { %8670 = vpow2.f32 %v6987_v49  ;;  %v6988_v58 = vmul.f32 -1.442695, %v8115_v51 }
 0x170   :  { %8672 = vpow2.f32 %v6989_v54  ;;  %v6990_v59 = vmul.f32 -1.442695, %v8116_v56  ;;  %v6992_v6 = vmul.f32 -1.442695, %v8124_v0  ;;  %v9752_v0 = vld [vmem:[%s11730_s6 + $0xc0] ss:$16 sps:$4 sm:$0xff]  }
 0x171   :  { %8674 = vpow2.f32 %v6988_v58 }
 0x172   :  { %8676 = vpow2.f32 %v6990_v59 }
 0x173   :  { %8678 = vtanh.f32 %v8121_v62 }
 0x174   :  { %8680 = vpow2.f32 %v6991_v63  ;;  %v9742_v63 = vld [vmem:[%s11730_s6 + $0xc4] ss:$16 sps:$4 sm:$0xff]  }
 0x175   :  { %8682 = vtanh.f32 %v8123_v2  ;;  %v9758_v2 = vld [vmem:[%s11730_s6 + $0xe4] ss:$16 sps:$4 sm:$0xff]  }
 0x179   :  { %v8671_v3 = vpop.eup %8670 }
 0x17a   :  { %v8673_v4 = vpop.eup %8672  ;;  %v784_v5 = vadd.f32 1.0, %v8671_v3 }
 0x17b   :  { %v796_v7 = vadd.f32 1.0, %v8673_v4  ;;  %v8675_v8 = vpop.eup %8674 }
 0x17c   :  { %8684 = vrcp.f32 %v784_v5  ;;  %v785_v9 = vadd.f32 1.0, %v8675_v8  ;;  %v8677_v10 = vpop.eup %8676 }
 0x17d   :  { %8686 = vrcp.f32 %v796_v7  ;;  %v797_v12 = vadd.f32 1.0, %v8677_v10  ;;  %v8679_v14 = vpop.eup %8678 }
 0x17e   :  { %8688 = vpow2.f32 %v6992_v6  ;;  %v8681_v16 = vpop.eup %8680 }
 0x17f   :  { %8690 = vrcp.f32 %v785_v9  ;;  %v8683_v18 = vpop.eup %8682  ;;  %v810_v44 = vadd.f32 1.0, %v8681_v16 }
 0x180   :  { %8692 = vrcp.f32 %v797_v12 }
 0x181   :  { %8694 = vrcp.f32 %v810_v44 }
 0x186   :  { %v8685_v20 = vpop.eup %8684 }
 0x187   :  { %v8687_v22 = vpop.eup %8686  ;;  %v818_v24 = vmul.f32 %v8685_v20, %v8679_v14 }
 0x188   :  { %v8689_v34 = vpop.eup %8688  ;;  %v816_v41 = vmul.f32 0.0, %v8687_v22 }
 0x189   :  { %v8691_v43 = vpop.eup %8690  ;;  %v811_v48 = vadd.f32 1.0, %v8689_v34 }
 0x18a   :  { %v9693_v45 = vadd.f32 %v818_v24, %v816_v41  ;;  %v819_v46 = vmul.f32 %v8691_v43, %v8683_v18  ;;  %v8693_v47 = vpop.eup %8692 }
 0x18b   :  { %v817_v49 = vmul.f32 0.0, %v8693_v47  ;;  %v8695_v52 = vpop.eup %8694 }
 0x18c   :  { %8696 = vtanh.f32 %v9693_v45 }
 0x18d   :  { %v9696_v51 = vadd.f32 %v819_v46, %v817_v49  ;;  %8698 = vrcp.f32 %v811_v48 }
 0x18f   :  { %8700 = vtanh.f32 %v9696_v51 }
 0x196   :  { %v8697_v53 = vpop.eup %8696 }
 0x197   :  { %v8699_v54 = vpop.eup %8698  ;;  %v824_v57 = vmul.f32 %v8697_v53, %v8695_v52 }
 0x199   :  { %v8701_v56 = vpop.eup %8700 }
 0x19a   :  { %v825_v58 = vmul.f32 %v8701_v56, %v8699_v54 }
 0x19c   :  { %v842_v59 = vpack.c.bf16 %v825_v58, %v824_v57 }
 0x19e   :  { %7778 = vmatmul.mubr.bf16.vlgmr.msra.gmra.mrb[16].mxu0 %v842_v59 }
 0x19f   :  { %937 = vmatpush1.bf16.msra.mxu0 %v9515_v11  ;;  %968 = vmatprep.mubr.bf16.mxu0 %v9311_v1 }
 0x1a0   :  { %938 = vmatprep.subr.bf16.mxu0 %v9524_v13 }
 0x1a3   :  { %939 = vmatpush1.bf16.msra.mxu0 %v9533_v15  ;;  %v9720_v15 = vld [vmem:[%s11730_s6 + $0x80] ss:$16 sps:$4 sm:$0xff]  }
 0x1a4   :  { %940 = vmatprep.subr.bf16.mxu0 %v9543_v17 }
 0x1a7   :  { %941 = vmatpush1.bf16.msra.mxu0 %v9556_v19 }
 0x1a8   :  { %942 = vmatprep.subr.bf16.mxu0 %v9565_v21  ;;  %v9727_v21 = vld [vmem:[%s11730_s6 + $0xa4] ss:$16 sps:$4 sm:$0xff]  }
 0x1ab   :  { %943 = vmatpush1.bf16.msra.mxu0 %v9575_v23  ;;  %v9735_v23 = vld [vmem:[%s11730_s6 + $0xa0] ss:$16 sps:$4 sm:$0xff]  }
 0x1ac   :  { %1217 = vmatprep.subr.bf16.mxu0 %v9710_v61 }
 0x271   :  { %v9713_v11 = vpop.f32.mrb[16].mxu0 }
 0x272   :  { %v7779_v13 = vpop.f32.mrb[17].mxu0 }
 0x273   :  { %v9715_v62 = vpop.f32.mrb[18].mxu0 }
 0x274   :  { %v932_v17 = vpack.c.bf16 %v9715_v62, %v9713_v11  ;;  %v7780_v19 = vpop.f32.mrb[19].mxu0 }
 0x276   :  { %7001 = vmatmul.mubr.msk.bf16.vlgmr.msra.gmra.mrb[4].mxu0 %vm366_vm0, %v932_v17  ;;  %7002 = vmatmul.mubr.msk.bf16.vlgmr.msra.gmra.mrb[4].mxu1 %vm366_vm0, %v932_v17 }
 0x277   :  { %1218 = vmatpush1.bf16.msra.mxu0 %v9720_v15  ;;  %1249 = vmatprep.mubr.bf16.mxu0 %v9311_v1 }
 0x278   :  { %1219 = vmatprep.subr.bf16.mxu0 %v9727_v21  ;;  %7782 = vmatpush3.bf16.msra.mxu1 %v9593_v25  ;;  %v9766_v25 = vld [vmem:[%s11730_s6 + $0xe0] ss:$16 sps:$4 sm:$0xff]  }
 0x279   :  { %7783 = vmatprep.subr.bf16.mxu1 %v9312_v26  ;;  %7797 = vmatprep.mubr.msk.bf16.mxu1 %vm9313_vm1, %v9312_v26 }
 0x27b   :  { %1220 = vmatpush1.bf16.msra.mxu0 %v9735_v23 }
 0x27c   :  { %1221 = vmatprep.subr.bf16.mxu0 %v9742_v63  ;;  %7784 = vmatpush3.bf16.msra.mxu1 %v9602_v27  ;;  %v9788_v27 = vld [vmem:[%s11730_s6 + $0x8c] ss:$16 sps:$4 sm:$0xff]  }
 0x27d   :  { %7785 = vmatprep.subr.bf16.mxu1 %v9312_v26 }
 0x27f   :  { %1222 = vmatpush1.bf16.msra.mxu0 %v9752_v0 }
 0x280   :  { %1223 = vmatprep.subr.bf16.mxu0 %v9758_v2  ;;  %7786 = vmatpush3.bf16.msra.mxu1 %v9609_v28 }
 0x281   :  { %7787 = vmatprep.subr.bf16.mxu1 %v9312_v26 }
 0x283   :  { %1224 = vmatpush1.bf16.msra.mxu0 %v9766_v25 }
 0x284   :  { %7788 = vmatpush3.bf16.msra.mxu1 %v9616_v29  ;;  %7801 = vmatprep.subr.bf16.mxu0 %v9312_v26 }
 0x285   :  { %7789 = vmatprep.subr.bf16.mxu1 %v9312_v26 }
 0x286   :  { %1250 = vmatmul.mubr.bf16.vlgmr.msra.gmra.mrb[12].mxu0 %v9311_v1 }
 0x287   :  { %7817 = vmatprep.mubr.msk.bf16.mxu0 %vm9313_vm1, %v9312_v26 }
 0x288   :  { %7790 = vmatpush3.bf16.msra.mxu1 %v9623_v30 }
 0x289   :  { %7791 = vmatprep.subr.bf16.mxu1 %v9312_v26 }
 0x28c   :  { %7792 = vmatpush3.bf16.msra.mxu1 %v9631_v31 }
 0x28d   :  { %7793 = vmatprep.subr.bf16.mxu1 %v9312_v26 }
 0x290   :  { %7794 = vmatpush3.bf16.msra.mxu1 %v9638_v32 }
 0x291   :  { %7795 = vmatprep.subr.bf16.mxu1 %v9312_v26 }
 0x294   :  { %7796 = vmatpush3.bf16.msra.mxu1 %v9645_v33 }
 0x295   :  { %1260 = vmatprep.subr.bf16.mxu1 %v9788_v27 }
 0x349   :  { %v970_v28 = vpop.f32.mrb[4].mxu0  ;;  %v1013_v29 = vpop.f32.mrb[4].mxu1 }
 0x34a   :  { %v8117_v30 = vadd.f32 %v970_v28, %v9665_v39  ;;  %v972_v31 = vpop.f32.mrb[5].mxu0  ;;  %v1015_v3 = vpop.f32.mrb[5].mxu1  ;;  %v8125_v18 = vadd.f32 %v1013_v29, %v9687_v60 }
 0x34b   :  { %v8118_v4 = vadd.f32 %v972_v31, %v9669_v40  ;;  %v974_v32 = vpop.f32.mrb[6].mxu0  ;;  %v1017_v5 = vpop.f32.mrb[6].mxu1  ;;  %v8126_v16 = vadd.f32 %v1015_v3, %v9682_v55 }
 0x34c   :  { %v7003_v6 = vmul.f32 -1.442695, %v8117_v30  ;;  %v8119_v33 = vadd.f32 %v974_v32, %v9665_v39  ;;  %v976_v7 = vpop.f32.mrb[7].mxu0  ;;  %v1019_v8 = vpop.f32.mrb[7].mxu1  ;;  %v8127_v39 = vadd.f32 %v1017_v5, %v9687_v60 }
 0x34d   :  { %v7005_v9 = vmul.f32 -1.442695, %v8118_v4  ;;  %v8120_v10 = vadd.f32 %v976_v7, %v9669_v40  ;;  %v7007_v20 = vmul.f32 -1.442695, %v8126_v16  ;;  %v8128_v22 = vadd.f32 %v1019_v8, %v9682_v55  ;;  %v8452_v16 = vld [vmem:[%s11730_s6 + $0xc8] ss:$16 sps:$4 sm:$0xff]  }
 0x34e   :  { %8702 = vpow2.f32 %v7003_v6  ;;  %v7004_v12 = vmul.f32 -1.442695, %v8119_v33 }
 0x34f   :  { %8704 = vpow2.f32 %v7005_v9  ;;  %v7006_v14 = vmul.f32 -1.442695, %v8120_v10  ;;  %v7008_v40 = vmul.f32 -1.442695, %v8128_v22  ;;  %v9838_v22 = vld [vmem:[%s11731_s7 + $0x40] sm:$0xff]  }
 0x350   :  { %8706 = vpow2.f32 %v7004_v12  ;;  %v8451_v12 = vld [vmem:[%s11730_s6 + $0xac] ss:$16 sps:$4 sm:$0xff]   ;;  %7802 = vmatpush3.bf16.msra.mxu0 %v9838_v22 }
 0x351   :  { %8708 = vpow2.f32 %v7006_v14  ;;  %v8454_v14 = vld [vmem:[%s11730_s6 + $0xcc] ss:$16 sps:$4 sm:$0xff]   ;;  %7803 = vmatprep.subr.bf16.mxu0 %v9312_v26 }
 0x352   :  { %8710 = vtanh.f32 %v8125_v18  ;;  %v8457_v18 = vld [vmem:[%s11730_s6 + $0xec] ss:$16 sps:$4 sm:$0xff]  }
 0x353   :  { %8712 = vpow2.f32 %v7007_v20  ;;  %v8455_v20 = vld [vmem:[%s11730_s6 + $0xe8] ss:$16 sps:$4 sm:$0xff]  }
 0x354   :  { %8714 = vtanh.f32 %v8127_v39  ;;  %v9852_v39 = vld [vmem:[%s11731_s7 + $0x50] sm:$0xff]  }
 0x358   :  { %v8703_v24 = vpop.eup %8702 }
 0x359   :  { %v8705_v34 = vpop.eup %8704  ;;  %v1036_v41 = vadd.f32 1.0, %v8703_v24  ;;  %v9799_v43 = vpop.f32.mrb[12].mxu0  ;;  %v9859_v24 = vld [vmem:[%s11731_s7 + $0x58] sm:$0xff]  }
 0x35a   :  { %v1048_v44 = vadd.f32 1.0, %v8705_v34  ;;  %v9801_v46 = vpop.f32.mrb[13].mxu0  ;;  %v8707_v47 = vpop.eup %8706  ;;  %v9866_v34 = vld [vmem:[%s11731_s7 + $0x60] sm:$0xff]  }
 0x35b   :  { %8716 = vrcp.f32 %v1036_v41  ;;  %v9803_v48 = vpop.f32.mrb[14].mxu0  ;;  %v1037_v55 = vadd.f32 1.0, %v8707_v47  ;;  %v8709_v60 = vpop.eup %8708  ;;  %v9872_v41 = vld [vmem:[%s11731_s7 + $0x68] sm:$0xff]   ;;  %v9892_v47 = vsub.s32 4, %v9650_v35 }
 0x35c   :  { %8718 = vrcp.f32 %v1048_v44  ;;  %v9805_v49 = vpop.f32.mrb[15].mxu0  ;;  %v1049_v52 = vadd.f32 1.0, %v8709_v60  ;;  %v8711_v53 = vpop.eup %8710  ;;  %v9886_v44 = vld [vmem:[%s11731_s7 + $0x78] sm:$0xff]  }
 0x35d   :  { %8720 = vpow2.f32 %v7008_v40  ;;  %v8713_v54 = vpop.eup %8712  ;;  %v9879_v40 = vld [vmem:[%s11731_s7 + $0x70] sm:$0xff]   ;;  %v9899_v60 = vrot.slane %v9658_v37, %v9892_v47 }
 0x35e   :  { %8722 = vrcp.f32 %v1037_v55  ;;  %v8715_v56 = vpop.eup %8714  ;;  %v1062_v13 = vadd.f32 1.0, %v8713_v54  ;;  %v9895_v55 = vsub.s32 5, %v9650_v35 }
 0x35f   :  { %8724 = vrcp.f32 %v1049_v52 }
 0x360   :  { %8726 = vrcp.f32 %v1062_v13  ;;  %v9903_v52 = vrot.slane %v9658_v37, %v9895_v55 }
 0x362   :  { %v8136_v54 = vadd.f32 %v9805_v49, %v9903_v52  ;;  %v9918_v49 = vsub.s32 6, %v9650_v35 }
 0x365   :  { %v8717_v57 = vpop.eup %8716 }
 0x366   :  { %v8719_v58 = vpop.eup %8718  ;;  %v1070_v59 = vmul.f32 %v8717_v57, %v8711_v53  ;;  %v8133_v53 = vadd.f32 %v9799_v43, %v9899_v60  ;;  %v8135_v57 = vadd.f32 %v9803_v48, %v9899_v60  ;;  %v9921_v48 = vsub.s32 7, %v9650_v35 }
 0x367   :  { %v8721_v17 = vpop.eup %8720  ;;  %v1068_v19 = vmul.f32 %v8719_v58, %v9693_v45  ;;  %v8446_v45 = vld [vmem:[%s11730_s6 + $0x88] ss:$16 sps:$4 sm:$0xff]  }
 0x368   :  { %v8723_v28 = vpop.eup %8722  ;;  %v1063_v3 = vadd.f32 1.0, %v8721_v17  ;;  %v7042_v13 = vmul.f32 -1.442695, %v8135_v57 }
 0x369   :  { %v1072_v29 = vadd.f32 %v1070_v59, %v1068_v19  ;;  %v1071_v30 = vmul.f32 %v8723_v28, %v8715_v56  ;;  %v8725_v31 = vpop.eup %8724  ;;  %v7041_v56 = vmul.f32 -1.442695, %v8133_v53  ;;  %v7044_v59 = vmul.f32 -1.442695, %v8136_v54 }
 0x36a   :  { %v1069_v4 = vmul.f32 %v8725_v31, %v9696_v51  ;;  %v8727_v5 = vpop.eup %8726  ;;  %v8449_v51 = vld [vmem:[%s11730_s6 + $0xa8] ss:$16 sps:$4 sm:$0xff]  }
 0x36b   :  { %8728 = vtanh.f32 %v1072_v29 }
 0x36c   :  { %v1073_v32 = vadd.f32 %v1071_v30, %v1069_v4  ;;  %8730 = vrcp.f32 %v1063_v3 }
 0x36e   :  { %8732 = vtanh.f32 %v1073_v32  ;;  %v9925_v32 = vrot.slane %v9658_v37, %v9918_v49 }
 0x36f   :  { %8734 = vpow2.f32 %v7041_v56 }
 0x375   :  { %v8729_v6 = vpop.eup %8728 }
 0x376   :  { %v1076_v33 = vmul.f32 %v8729_v6, %v8727_v5  ;;  %v8731_v7 = vpop.eup %8730  ;;  %v9929_v6 = vrot.slane %v9658_v37, %v9921_v48 }
 0x378   :  { %v8733_v8 = vpop.eup %8732 }
 0x379   :  { %v1077_v9 = vmul.f32 %v8733_v8, %v8731_v7  ;;  %v8735_v28 = vpop.eup %8734 }
 0x37a   :  { %v1317_v31 = vadd.f32 1.0, %v8735_v28 }
 0x37b   :  { %v1078_v10 = vpack.c.bf16 %v1077_v9, %v1076_v33 }
 0x37d   :  { %7798 = vmatmul.mubr.bf16.vlgmr.msra.gmra.mrb[16].mxu1 %v1078_v10 }
 0x37e   :  { %1261 = vmatpush1.bf16.msra.mxu1 %v8446_v45  ;;  %1292 = vmatprep.mubr.bf16.mxu1 %v9311_v1 }
 0x37f   :  { %1262 = vmatprep.subr.bf16.mxu1 %v8451_v12 }
 0x382   :  { %1263 = vmatpush1.bf16.msra.mxu1 %v8449_v51 }
 0x383   :  { %1264 = vmatprep.subr.bf16.mxu1 %v8454_v14 }
 0x386   :  { %1265 = vmatpush1.bf16.msra.mxu1 %v8452_v16 }
 0x387   :  { %1266 = vmatprep.subr.bf16.mxu1 %v8457_v18 }
 0x38a   :  { %1267 = vmatpush1.bf16.msra.mxu1 %v8455_v20 }
 0x38b   :  { %1513 = vmatprep.subr.bf16.mxu1 %v9788_v27  ;;  %v9845_v27 = vld [vmem:[%s11731_s7 + $0x48] sm:$0xff]  }
 0x38c   :  { %7804 = vmatpush3.bf16.msra.mxu0 %v9845_v27 }
 0x38d   :  { %1293 = vmatmul.mubr.bf16.vlgmr.msra.gmra.mrb[12].mxu1 %v9311_v1  ;;  %7805 = vmatprep.subr.bf16.mxu0 %v9312_v26 }
 0x38e   :  { %1514 = vmatpush1.bf16.msra.mxu1 %v8446_v45  ;;  %1545 = vmatprep.mubr.bf16.mxu1 %v9311_v1 }
 0x38f   :  { %1515 = vmatprep.subr.bf16.mxu1 %v8451_v12 }
 0x390   :  { %7806 = vmatpush3.bf16.msra.mxu0 %v9852_v39 }
 0x391   :  { %7807 = vmatprep.subr.bf16.mxu0 %v9312_v26 }
 0x392   :  { %1516 = vmatpush1.bf16.msra.mxu1 %v8449_v51 }
 0x393   :  { %1517 = vmatprep.subr.bf16.mxu1 %v8454_v14 }
 0x394   :  { %7808 = vmatpush3.bf16.msra.mxu0 %v9859_v24 }
 0x395   :  { %7809 = vmatprep.subr.bf16.mxu0 %v9312_v26 }
 0x396   :  { %1518 = vmatpush1.bf16.msra.mxu1 %v8452_v16 }
 0x397   :  { %1519 = vmatprep.subr.bf16.mxu1 %v8457_v18 }
 0x398   :  { %7810 = vmatpush3.bf16.msra.mxu0 %v9866_v34 }
 0x399   :  { %7811 = vmatprep.subr.bf16.mxu0 %v9312_v26 }
 0x39a   :  { %1520 = vmatpush1.bf16.msra.mxu1 %v8455_v20 }
 0x39b   :  { %7821 = vmatprep.subr.bf16.mxu1 %v9312_v26 }
 0x39c   :  { %7812 = vmatpush3.bf16.msra.mxu0 %v9872_v41 }
 0x39d   :  { %7813 = vmatprep.subr.bf16.mxu0 %v9312_v26 }
 0x3a0   :  { %7814 = vmatpush3.bf16.msra.mxu0 %v9879_v40 }
 0x3a1   :  { %7815 = vmatprep.subr.bf16.mxu0 %v9312_v26 }
 0x3a4   :  { %7816 = vmatpush3.bf16.msra.mxu0 %v9886_v44 }
 0x3a5   :  { %1470 = vmatprep.subr.bf16.mxu0 %v9710_v61  ;;  %v8134_v61 = vadd.f32 %v9801_v46, %v9903_v52 }
 0x3a7   :  { %v7043_v58 = vmul.f32 -1.442695, %v8134_v61 }
 0x3a9   :  { %8736 = vpow2.f32 %v7043_v58 }
 0x3aa   :  { %8738 = vpow2.f32 %v7044_v59 }
 0x3ab   :  { %8740 = vpow2.f32 %v7042_v13 }
 0x3ac   :  { %8742 = vrcp.f32 %v1317_v31 }
 0x3b3   :  { %v8737_v29 = vpop.eup %8736 }
 0x3b4   :  { %v8739_v30 = vpop.eup %8738  ;;  %v1329_v4 = vadd.f32 1.0, %v8737_v29 }
 0x3b5   :  { %v8741_v3 = vpop.eup %8740  ;;  %v1330_v5 = vadd.f32 1.0, %v8739_v30 }
 0x3b6   :  { %v1318_v33 = vadd.f32 1.0, %v8741_v3  ;;  %8744 = vrcp.f32 %v1329_v4  ;;  %v8743_v16 = vpop.eup %8742 }
 0x3b7   :  { %8746 = vrcp.f32 %v1330_v5 }
 0x3c0   :  { %v8745_v18 = vpop.eup %8744 }
 0x3c1   :  { %v8747_v20 = vpop.eup %8746  ;;  %v1349_v54 = vmul.f32 0.0, %v8745_v18 }
 0x3c2   :  { %v1350_v59 = vmul.f32 0.0, %v8747_v20 }
 0x450   :  { %v9913_v17 = vpop.f32.mrb[16].mxu1 }
 0x451   :  { %v7799_v19 = vpop.f32.mrb[17].mxu1 }
 0x452   :  { %v9915_v43 = vpop.f32.mrb[18].mxu1 }
 0x453   :  { %v7800_v46 = vpop.f32.mrb[19].mxu1 }
 0x460   :  { %v1294_v7 = vpop.f32.mrb[12].mxu1 }
 0x461   :  { %v8141_v35 = vadd.f32 %v1294_v7, %v9925_v32  ;;  %v1296_v8 = vpop.f32.mrb[13].mxu1 }
 0x462   :  { %v8142_v9 = vadd.f32 %v1296_v8, %v9929_v6  ;;  %v1298_v45 = vpop.f32.mrb[14].mxu1 }
 0x463   :  { %8748 = vtanh.f32 %v8141_v35  ;;  %v8143_v10 = vadd.f32 %v1298_v45, %v9925_v32  ;;  %v1300_v12 = vpop.f32.mrb[15].mxu1 }
 0x464   :  { %8750 = vrcp.f32 %v1318_v33  ;;  %v7045_v51 = vmul.f32 -1.442695, %v8142_v9  ;;  %v8144_v37 = vadd.f32 %v1300_v12, %v9929_v6 }
 0x465   :  { %8752 = vtanh.f32 %v8143_v10 }
 0x466   :  { %8754 = vpow2.f32 %v7045_v51  ;;  %v7046_v14 = vmul.f32 -1.442695, %v8144_v37 }
 0x468   :  { %8756 = vpow2.f32 %v7046_v14 }
 0x46d   :  { %v8749_v53 = vpop.eup %8748 }
 0x46e   :  { %v8751_v61 = vpop.eup %8750  ;;  %v1351_v56 = vmul.f32 %v8749_v53, %v8743_v16 }
 0x46f   :  { %v8753_v57 = vpop.eup %8752 }
 0x470   :  { %v8755_v58 = vpop.eup %8754  ;;  %v9935_v13 = vadd.f32 %v1351_v56, %v1349_v54  ;;  %v1352_v19 = vmul.f32 %v8753_v57, %v8751_v61 }
 0x471   :  { %v1343_v46 = vadd.f32 1.0, %v8755_v58 }
 0x472   :  { %v8757_v28 = vpop.eup %8756  ;;  %8758 = vtanh.f32 %v9935_v13  ;;  %v9938_v29 = vadd.f32 %v1352_v19, %v1350_v59 }
 0x473   :  { %8760 = vrcp.f32 %v1343_v46  ;;  %v1344_v30 = vadd.f32 1.0, %v8757_v28 }
 0x474   :  { %8762 = vtanh.f32 %v9938_v29 }
 0x475   :  { %8764 = vrcp.f32 %v1344_v30 }
 0x47c   :  { %v8759_v31 = vpop.eup %8758 }
 0x47d   :  { %v8761_v3 = vpop.eup %8760 }
 0x47e   :  { %v8763_v4 = vpop.eup %8762  ;;  %v1357_v33 = vmul.f32 %v8761_v3, %v8759_v31 }
 0x47f   :  { %v8765_v5 = vpop.eup %8764 }
 0x480   :  { %v1358_v7 = vmul.f32 %v8765_v5, %v8763_v4 }
 0x482   :  { %v1376_v35 = vpack.c.bf16 %v1358_v7, %v1357_v33 }
 0x484   :  { %7818 = vmatmul.mubr.bf16.vlgmr.msra.gmra.mrb[20].mxu0 %v1376_v35 }
 0x485   :  { %1471 = vmatpush1.bf16.msra.mxu0 %v9720_v15  ;;  %1502 = vmatprep.mubr.bf16.mxu0 %v9311_v1 }
 0x486   :  { %1472 = vmatprep.subr.bf16.mxu0 %v9727_v21 }
 0x489   :  { %1473 = vmatpush1.bf16.msra.mxu0 %v9735_v23 }
 0x48a   :  { %1474 = vmatprep.subr.bf16.mxu0 %v9742_v63 }
 0x48d   :  { %1475 = vmatpush1.bf16.msra.mxu0 %v9752_v0 }
 0x48e   :  { %1476 = vmatprep.subr.bf16.mxu0 %v9758_v2 }
 0x491   :  { %1477 = vmatpush1.bf16.msra.mxu0 %v9766_v25 }
 0x557   :  { %v9949_v8 = vpop.f32.mrb[20].mxu0 }
 0x558   :  { %v7819_v9 = vpop.f32.mrb[21].mxu0 }
 0x559   :  { %v9951_v45 = vpop.f32.mrb[22].mxu0 }
 0x55a   :  { %v8387_v15 = vpack.i.bf16 %v9951_v45, %v9949_v8  ;;  %v1466_v21 = vpack.c.bf16 %v9951_v45, %v9949_v8  ;;  %v7820_v23 = vpop.f32.mrb[23].mxu0  ;;  %v1689_v8 = vld [vmem:[%s11728_s4 + $0x78] sm:$0xff] }
 0x55c   :  { %7071 = vmatmul.mubr.msk.bf16.vlgmr.msra.gmra.mrb[8].mxu0 %vm366_vm0, %v1466_v21  ;;  %7072 = vmatmul.mubr.msk.bf16.vlgmr.msra.gmra.mrb[8].mxu1 %vm366_vm0, %v1466_v21 }
 0x55d   :  { %7822 = vmatpush3.bf16.msra.mxu1 %v9838_v22  ;;  %7837 = vmatprep.mubr.msk.bf16.mxu1 %vm9313_vm1, %v9312_v26 }
 0x55e   :  { %7823 = vmatprep.subr.bf16.mxu1 %v9312_v26  ;;  %2134 = vmatprep.mubr.bf16.mxu0 %v9311_v1 }
 0x561   :  { %7824 = vmatpush3.bf16.msra.mxu1 %v9845_v27 }
 0x562   :  { %7825 = vmatprep.subr.bf16.mxu1 %v9312_v26 }
 0x565   :  { %7826 = vmatpush3.bf16.msra.mxu1 %v9852_v39 }
 0x566   :  { %7827 = vmatprep.subr.bf16.mxu1 %v9312_v26 }
 0x569   :  { %7828 = vmatpush3.bf16.msra.mxu1 %v9859_v24 }
 0x56a   :  { %7829 = vmatprep.subr.bf16.mxu1 %v9312_v26 }
 0x56d   :  { %7830 = vmatpush3.bf16.msra.mxu1 %v9866_v34 }
 0x56e   :  { %7831 = vmatprep.subr.bf16.mxu1 %v9312_v26 }
 0x571   :  { %7832 = vmatpush3.bf16.msra.mxu1 %v9872_v41 }
 0x572   :  { %7833 = vmatprep.subr.bf16.mxu1 %v9312_v26 }
 0x575   :  { %7834 = vmatpush3.bf16.msra.mxu1 %v9879_v40 }
 0x576   :  { %7835 = vmatprep.subr.bf16.mxu1 %v9312_v26 }
 0x579   :  { %7836 = vmatpush3.bf16.msra.mxu1 %v9886_v44 }
 0x62f   :  { %v1504_v63 = vpop.f32.mrb[8].mxu0  ;;  %v1547_v0 = vpop.f32.mrb[8].mxu1 }
 0x630   :  { %v8129_v2 = vadd.f32 %v1504_v63, %v9899_v60  ;;  %v1506_v25 = vpop.f32.mrb[9].mxu0  ;;  %v1549_v22 = vpop.f32.mrb[9].mxu1  ;;  %v8137_v16 = vadd.f32 %v1547_v0, %v9925_v32 }
 0x631   :  { %v8130_v27 = vadd.f32 %v1506_v25, %v9903_v52  ;;  %v1508_v39 = vpop.f32.mrb[10].mxu0  ;;  %v1551_v24 = vpop.f32.mrb[10].mxu1  ;;  %v8138_v14 = vadd.f32 %v1549_v22, %v9929_v6 }
 0x632   :  { %v7073_v34 = vmul.f32 -1.442695, %v8129_v2  ;;  %v8131_v41 = vadd.f32 %v1508_v39, %v9899_v60  ;;  %v1510_v10 = vpop.f32.mrb[11].mxu0  ;;  %v1553_v12 = vpop.f32.mrb[11].mxu1  ;;  %v8139_v60 = vadd.f32 %v1551_v24, %v9925_v32 }
 0x633   :  { %v7075_v40 = vmul.f32 -1.442695, %v8130_v27  ;;  %v8132_v51 = vadd.f32 %v1510_v10, %v9903_v52  ;;  %v7077_v18 = vmul.f32 -1.442695, %v8138_v14  ;;  %v8140_v20 = vadd.f32 %v1553_v12, %v9929_v6  ;;  %v1679_v12 = vld [vmem:[%s11728_s4 + $0x28] sm:$0xff] }
 0x634   :  { %8766 = vpow2.f32 %v7073_v34  ;;  %v7074_v44 = vmul.f32 -1.442695, %v8131_v41  ;;  %v1675_v34 = vld [vmem:[%s11728_s4 + $0x8] sm:$0xff] }
 0x635   :  { %8768 = vpow2.f32 %v7075_v40  ;;  %v7076_v37 = vmul.f32 -1.442695, %v8132_v51  ;;  %v7078_v52 = vmul.f32 -1.442695, %v8140_v20  ;;  %v1682_v40 = vld [vmem:[%s11728_s4 + $0x40] sm:$0xff] }
 0x636   :  { %8770 = vpow2.f32 %v7074_v44  ;;  %v1686_v51 = vld [vmem:[%s11728_s4 + $0x60] sm:$0xff]  ;;  %v7081_v44 = vcombine.low %v1675_v34, %v1679_v12 }
 0x637   :  { %8772 = vpow2.f32 %v7076_v37  ;;  %v7082_v37 = vcombine.high %v1675_v34, %v1679_v12  ;;  %v7088_v14 = vcombine.high %v1682_v40, %v1686_v51  ;;  %v1690_v20 = vld [vmem:[%s11728_s4 + $0x80] sm:$0xff]  ;;  %v1727_v34 = vld [vmem:[%s11728_s4 + $0x1a8] sm:$0xff] }
 0x638   :  { %8774 = vtanh.f32 %v8137_v16  ;;  %v1683_v16 = vld [vmem:[%s11728_s4 + $0x48] sm:$0xff] }
 0x639   :  { %8776 = vpow2.f32 %v7077_v18  ;;  %v1687_v18 = vld [vmem:[%s11728_s4 + $0x68] sm:$0xff]  ;;  %2155 = vmatprep.subr.bf16.mxu1 %v7082_v37  ;;  %v1730_v37 = vld [vmem:[%s11728_s4 + $0x1c0] sm:$0xff] }
 0x63a   :  { %8778 = vtanh.f32 %v8139_v60  ;;  %v7090_v60 = vcombine.high %v1683_v16, %v1687_v18 }
 0x63e   :  { %v8767_v53 = vpop.eup %8766 }
 0x63f   :  { %v8769_v61 = vpop.eup %8768  ;;  %v1570_v54 = vadd.f32 1.0, %v8767_v53  ;;  %v1694_v53 = vld [vmem:[%s11728_s4 + $0xa0] sm:$0xff] }
 0x640   :  { %v1582_v56 = vadd.f32 1.0, %v8769_v61  ;;  %v8771_v57 = vpop.eup %8770  ;;  %v1691_v61 = vld [vmem:[%s11728_s4 + $0x88] sm:$0xff] }
 0x641   :  { %8780 = vrcp.f32 %v1570_v54  ;;  %v1571_v58 = vadd.f32 1.0, %v8771_v57  ;;  %v8773_v59 = vpop.eup %8772  ;;  %v1695_v54 = vld [vmem:[%s11728_s4 + $0xa8] sm:$0xff]  ;;  %v7096_v57 = vcombine.high %v1690_v20, %v1694_v53 }
 0x642   :  { %8782 = vrcp.f32 %v1582_v56  ;;  %v1583_v19 = vadd.f32 1.0, %v8773_v59  ;;  %v8775_v6 = vpop.eup %8774  ;;  %v7089_v56 = vcombine.low %v1683_v16, %v1687_v18  ;;  %v1698_v59 = vld [vmem:[%s11728_s4 + $0xc0] sm:$0xff]  ;;  %v1731_v16 = vld [vmem:[%s11728_s4 + $0x1c8] sm:$0xff] }
 0x643   :  { %8784 = vpow2.f32 %v7078_v52  ;;  %v8777_v46 = vpop.eup %8776  ;;  %v7087_v52 = vcombine.low %v1682_v40, %v1686_v51 }
 0x644   :  { %8786 = vrcp.f32 %v1571_v58  ;;  %v8779_v32 = vpop.eup %8778  ;;  %v1596_v3 = vadd.f32 1.0, %v8777_v46  ;;  %v7098_v58 = vcombine.high %v1691_v61, %v1695_v54  ;;  %v1703_v46 = vld [vmem:[%s11728_s4 + $0xe8] sm:$0xff] }
 0x645   :  { %8788 = vrcp.f32 %v1583_v19  ;;  %v1702_v19 = vld [vmem:[%s11728_s4 + $0xe0] sm:$0xff] }
 0x646   :  { %8790 = vrcp.f32 %v1596_v3  ;;  %v1706_v3 = vld [vmem:[%s11728_s4 + $0x100] sm:$0xff] }
 0x64b   :  { %v8781_v28 = vpop.eup %8780 }
 0x64c   :  { %v8783_v30 = vpop.eup %8782  ;;  %v1604_v31 = vmul.f32 %v8781_v28, %v8775_v6  ;;  %v1699_v6 = vld [vmem:[%s11728_s4 + $0xc8] sm:$0xff]  ;;  %v7097_v28 = vcombine.low %v1691_v61, %v1695_v54  ;;  %v1676_v54 = vld [vmem:[%s11728_s4 + $0x10] sm:$0xff] }
 0x64d   :  { %v8785_v4 = vpop.eup %8784  ;;  %v1602_v5 = vmul.f32 %v8783_v30, %v9935_v13  ;;  %v1674_v13 = vld [vmem:[%s11728_s4] sm:$0xff]  ;;  %v7104_v30 = vcombine.high %v1698_v59, %v1702_v19 }
 0x64e   :  { %v8787_v33 = vpop.eup %8786  ;;  %v1597_v21 = vadd.f32 1.0, %v8785_v4  ;;  %v1710_v4 = vld [vmem:[%s11728_s4 + $0x120] sm:$0xff] }
 0x64f   :  { %v1606_v7 = vadd.f32 %v1604_v31, %v1602_v5  ;;  %v1605_v35 = vmul.f32 %v8787_v33, %v8779_v32  ;;  %v8789_v9 = vpop.eup %8788  ;;  %v7095_v32 = vcombine.low %v1690_v20, %v1694_v53  ;;  %v7106_v31 = vcombine.high %v1699_v6, %v1703_v46  ;;  %v1707_v5 = vld [vmem:[%s11728_s4 + $0x108] sm:$0xff] }
 0x650   :  { %v1603_v23 = vmul.f32 %v8789_v9, %v9938_v29  ;;  %v8791_v0 = vpop.eup %8790  ;;  %v1678_v29 = vld [vmem:[%s11728_s4 + $0x20] sm:$0xff]  ;;  %v1711_v33 = vld [vmem:[%s11728_s4 + $0x128] sm:$0xff]  ;;  %v7112_v9 = vcombine.high %v1706_v3, %v1710_v4 }
 0x651   :  { %8792 = vtanh.f32 %v1606_v7  ;;  %v7079_v41 = vcombine.low %v1674_v13, %v1678_v29  ;;  %v7080_v10 = vcombine.high %v1674_v13, %v1678_v29  ;;  %v7103_v7 = vcombine.low %v1698_v59, %v1702_v19  ;;  %v1726_v13 = vld [vmem:[%s11728_s4 + $0x1a0] sm:$0xff]  ;;  %v1723_v29 = vld [vmem:[%s11728_s4 + $0x188] sm:$0xff] }
 0x652   :  { %v1607_v63 = vadd.f32 %v1605_v35, %v1603_v23  ;;  %8794 = vrcp.f32 %v1597_v21  ;;  %v7105_v35 = vcombine.low %v1699_v6, %v1703_v46  ;;  %v7114_v21 = vcombine.high %v1707_v5, %v1711_v33  ;;  %v1714_v23 = vld [vmem:[%s11728_s4 + $0x140] sm:$0xff]  ;;  %v1735_v20 = vld [vmem:[%s11728_s4 + $0x1e8] sm:$0xff] }
 0x653   :  { %2102 = vmatprep.subr.bf16.mxu0 %v7080_v10  ;;  %v7130_v40 = vcombine.high %v1723_v29, %v1727_v34  ;;  %v7137_v53 = vcombine.low %v1731_v16, %v1735_v20  ;;  %v7138_v61 = vcombine.high %v1731_v16, %v1735_v20  ;;  %v1712_v16 = vld [vmem:[%s11728_s4 + $0x130] sm:$0xff]  ;;  %v1713_v20 = vld [vmem:[%s11728_s4 + $0x138] sm:$0xff] }
 0x654   :  { %8796 = vtanh.f32 %v1607_v63  ;;  %2103 = vmatpush1.bf16.msra.mxu0 %v7079_v41  ;;  %v1718_v63 = vld [vmem:[%s11728_s4 + $0x160] sm:$0xff] }
 0x655   :  { %2104 = vmatprep.subr.bf16.mxu0 %v7088_v14  ;;  %v7119_v41 = vcombine.low %v1714_v23, %v1718_v63  ;;  %v1734_v14 = vld [vmem:[%s11728_s4 + $0x1e0] sm:$0xff] }
 0x656   :  { %v7136_v18 = vcombine.high %v1730_v37, %v1734_v14 }
 0x658   :  { %2105 = vmatpush1.bf16.msra.mxu0 %v7087_v52  ;;  %v1680_v52 = vld [vmem:[%s11728_s4 + $0x30] sm:$0xff] }
 0x659   :  { %2106 = vmatprep.subr.bf16.mxu0 %v7096_v57  ;;  %v7084_v57 = vcombine.high %v1676_v54, %v1680_v52  ;;  %v7083_v59 = vcombine.low %v1676_v54, %v1680_v52  ;;  %v1716_v52 = vld [vmem:[%s11728_s4 + $0x150] sm:$0xff] }
 0x65b   :  { %v8793_v2 = vpop.eup %8792 }
 0x65c   :  { %v1610_v25 = vmul.f32 %v8793_v2, %v8791_v0  ;;  %v8795_v22 = vpop.eup %8794  ;;  %2107 = vmatpush1.bf16.msra.mxu0 %v7095_v32  ;;  %v1715_v0 = vld [vmem:[%s11728_s4 + $0x148] sm:$0xff] }
 0x65d   :  { %2108 = vmatprep.subr.bf16.mxu0 %v7104_v30  ;;  %v1719_v2 = vld [vmem:[%s11728_s4 + $0x168] sm:$0xff] }
 0x65e   :  { %v8797_v27 = vpop.eup %8796  ;;  %v7121_v10 = vcombine.low %v1715_v0, %v1719_v2 }
 0x65f   :  { %v1611_v39 = vmul.f32 %v8797_v27, %v8795_v22  ;;  %v7113_v22 = vcombine.low %v1707_v5, %v1711_v33  ;;  %v7120_v27 = vcombine.high %v1714_v23, %v1718_v63 }
 0x660   :  { %2109 = vmatpush1.bf16.msra.mxu0 %v7103_v7  ;;  %v1688_v7 = vld [vmem:[%s11728_s4 + $0x70] sm:$0xff] }
 0x661   :  { %v1612_v24 = vpack.c.bf16 %v1611_v39, %v1610_v25  ;;  %v7111_v25 = vcombine.low %v1706_v3, %v1710_v4  ;;  %2110 = vmatprep.subr.bf16.mxu0 %v7112_v9  ;;  %v7122_v39 = vcombine.high %v1715_v0, %v1719_v2  ;;  %v1684_v4 = vld [vmem:[%s11728_s4 + $0x50] sm:$0xff] }
 0x662   :  { %v7092_v23 = vcombine.high %v1684_v4, %v1688_v7  ;;  %v1692_v0 = vld [vmem:[%s11728_s4 + $0x90] sm:$0xff] }
 0x663   :  { %7838 = vmatmul.mubr.bf16.vlgmr.msra.gmra.mrb[20].mxu1 %v1612_v24  ;;  %v1722_v24 = vld [vmem:[%s11728_s4 + $0x180] sm:$0xff] }
 0x664   :  { %2187 = vmatprep.mubr.bf16.mxu1 %v9311_v1  ;;  %2156 = vmatpush1.bf16.msra.mxu1 %v7081_v44  ;;  %v7128_v12 = vcombine.high %v1722_v24, %v1726_v13  ;;  %v7127_v51 = vcombine.low %v1722_v24, %v1726_v13  ;;  %v7129_v44 = vcombine.low %v1723_v29, %v1727_v34 }
 0x665   :  { %2157 = vmatprep.subr.bf16.mxu1 %v7090_v60  ;;  %2111 = vmatpush1.bf16.msra.mxu0 %v7111_v25  ;;  %v7135_v60 = vcombine.low %v1730_v37, %v1734_v14  ;;  %v1708_v14 = vld [vmem:[%s11728_s4 + $0x110] sm:$0xff] }
 0x666   :  { %2112 = vmatprep.subr.bf16.mxu0 %v7120_v27  ;;  %v7091_v27 = vcombine.low %v1684_v4, %v1688_v7  ;;  %v1732_v7 = vld [vmem:[%s11728_s4 + $0x1d0] sm:$0xff] }
 0x668   :  { %2158 = vmatpush1.bf16.msra.mxu1 %v7089_v56  ;;  %v1677_v56 = vld [vmem:[%s11728_s4 + $0x18] sm:$0xff] }
 0x669   :  { %2159 = vmatprep.subr.bf16.mxu1 %v7098_v58  ;;  %2113 = vmatpush1.bf16.msra.mxu0 %v7119_v41  ;;  %v1681_v58 = vld [vmem:[%s11728_s4 + $0x38] sm:$0xff] }
 0x66a   :  { %2114 = vmatprep.subr.bf16.mxu0 %v7128_v12  ;;  %v7085_v19 = vcombine.low %v1677_v56, %v1681_v58  ;;  %v7086_v6 = vcombine.high %v1677_v56, %v1681_v58  ;;  %v1705_v12 = vld [vmem:[%s11728_s4 + $0xf8] sm:$0xff]  ;;  %v1720_v56 = vld [vmem:[%s11728_s4 + $0x170] sm:$0xff] }
 0x66b   :  { %v1721_v58 = vld [vmem:[%s11728_s4 + $0x178] sm:$0xff] }
 0x66c   :  { %2160 = vmatpush1.bf16.msra.mxu1 %v7097_v28 }
 0x66d   :  { %2161 = vmatprep.subr.bf16.mxu1 %v7106_v31  ;;  %2115 = vmatpush1.bf16.msra.mxu0 %v7127_v51 }
 0x66e   :  { %2116 = vmatprep.subr.bf16.mxu0 %v7136_v18  ;;  %v1709_v18 = vld [vmem:[%s11728_s4 + $0x118] sm:$0xff] }
 0x66f   :  { %v7118_v54 = vcombine.high %v1709_v18, %v1713_v20 }
 0x670   :  { %2162 = vmatpush1.bf16.msra.mxu1 %v7105_v35  ;;  %v1685_v35 = vld [vmem:[%s11728_s4 + $0x58] sm:$0xff] }
 0x671   :  { %2163 = vmatprep.subr.bf16.mxu1 %v7114_v21  ;;  %2117 = vmatpush1.bf16.msra.mxu0 %v7135_v60  ;;  %v7094_v63 = vcombine.high %v1685_v35, %v1689_v8  ;;  %v7093_v13 = vcombine.low %v1685_v35, %v1689_v8  ;;  %v1736_v35 = vld [vmem:[%s11728_s4 + $0x1f0] sm:$0xff]  ;;  %v1733_v8 = vld [vmem:[%s11728_s4 + $0x1d8] sm:$0xff] }
 0x672   :  { %2208 = vmatprep.subr.bf16.mxu0 %v7084_v57  ;;  %v1717_v57 = vld [vmem:[%s11728_s4 + $0x158] sm:$0xff] }
 0x673   :  { %v7125_v4 = vcombine.low %v1717_v57, %v1721_v58 }
 0x674   :  { %2164 = vmatpush1.bf16.msra.mxu1 %v7113_v22  ;;  %v1696_v22 = vld [vmem:[%s11728_s4 + $0xb0] sm:$0xff] }
 0x675   :  { %2165 = vmatprep.subr.bf16.mxu1 %v7122_v39  ;;  %v7100_v34 = vcombine.high %v1692_v0, %v1696_v22 }
 0x678   :  { %2166 = vmatpush1.bf16.msra.mxu1 %v7121_v10  ;;  %v1700_v10 = vld [vmem:[%s11728_s4 + $0xd0] sm:$0xff] }
 0x679   :  { %2167 = vmatprep.subr.bf16.mxu1 %v7130_v40  ;;  %v7099_v40 = vcombine.low %v1692_v0, %v1696_v22  ;;  %v7139_v0 = vcombine.low %v1732_v7, %v1736_v35  ;;  %v8471_v22 = vld [vmem:[%s11730_s6 + $0x10c] ss:$16 sps:$4 sm:$0xff]  }
 0x67c   :  { %2168 = vmatpush1.bf16.msra.mxu1 %v7129_v44 }
 0x67d   :  { %2169 = vmatprep.subr.bf16.mxu1 %v7138_v61  ;;  %v7116_v61 = vcombine.high %v1708_v14, %v1712_v16 }
 0x680   :  { %2170 = vmatpush1.bf16.msra.mxu1 %v7137_v53 }
 0x681   :  { %2261 = vmatprep.subr.bf16.mxu1 %v7086_v6  ;;  %v7124_v6 = vcombine.high %v1716_v52, %v1720_v56 }
 0x736   :  { %v1647_v46 = vpop.f32.mrb[20].mxu1 }
 0x737   :  { %v7839_v32 = vpop.f32.mrb[21].mxu1 }
 0x738   :  { %v1650_v28 = vpop.f32.mrb[22].mxu1  ;;  %v1724_v32 = vld [vmem:[%s11728_s4 + $0x190] sm:$0xff] }
 0x739   :  { %v8382_v30 = vpack.i.bf16 %v1650_v28, %v1647_v46  ;;  %v7840_v31 = vpop.f32.mrb[23].mxu1  ;;  %v7126_v46 = vcombine.high %v1717_v57, %v1721_v58  ;;  %v1728_v28 = vld [vmem:[%s11728_s4 + $0x1b0] sm:$0xff] }
 0x73a   :  { %v1729_v31 = vld [vmem:[%s11728_s4 + $0x1b8] sm:$0xff] }
 0x73b   :  { %8383 = vrot.lane.b32.xlu0 %v8382_v30, %s9314_s30  ;;  %v1725_v30 = vld [vmem:[%s11728_s4 + $0x198] sm:$0xff] }
 0x73f   :  { %8388 = vrot.lane.b32.xlu0 %v8387_v15, %s9314_s30 }
 0x7ad   :  { %v8384_v3 = vpop.permute.xlu0 %8383 }
 0x7ae   :  { %v8386_v5 = vunpack.i.h.bf16 %v8384_v3  ;;  %v8385_v33 = vunpack.i.l.bf16 %v8384_v3  ;;  %v7123_v3 = vcombine.low %v1716_v52, %v1720_v56 }
 0x7b0   :  { %v1671_v45 = vsel %vm366_vm0, %v9715_v62, %v8386_v5  ;;  %v1670_v15 = vsel %vm366_vm0, %v9713_v11, %v8385_v33  ;;  %v1693_v62 = vld [vmem:[%s11728_s4 + $0x98] sm:$0xff]  ;;  %v7132_v5 = vcombine.high %v1724_v32, %v1728_v28  ;;  %v7134_v33 = vcombine.high %v1725_v30, %v1729_v31 }
 0x7b1   :  { %v10117_v9 = vpack.c.bf16 %v1671_v45, %v1670_v15  ;;  %v8389_v21 = vpop.permute.xlu0 %8388  ;;  %v1697_v11 = vld [vmem:[%s11728_s4 + $0xb8] sm:$0xff]  ;;  %v7131_v15 = vcombine.low %v1724_v32, %v1728_v28 }
 0x7b2   :  { %v8391_v2 = vunpack.i.h.bf16 %v8389_v21  ;;  %v8390_v25 = vunpack.i.l.bf16 %v8389_v21  ;;  %v7102_v41 = vcombine.high %v1693_v62, %v1697_v11  ;;  %v7101_v51 = vcombine.low %v1693_v62, %v1697_v11  ;;  %v1737_v45 = vld [vmem:[%s11728_s4 + $0x1f8] sm:$0xff]  ;;  %v10216_v62 = vld [vmem:[%s11730_s6 + $0x100] ss:$16 sps:$4 sm:$0xff]  }
 0x7b3   :  { %2135 = vmatmul.mubr.bf16.vlgmr.msra.gmra.mrb[24].mxu0 %v10117_v9  ;;  %2188 = vmatmul.mubr.bf16.vlgmr.msra.gmra.mrb[24].mxu1 %v10117_v9  ;;  %v7133_v21 = vcombine.low %v1725_v30, %v1729_v31  ;;  %v8469_v11 = vld [vmem:[%s11730_s6 + $0x108] ss:$16 sps:$4 sm:$0xff]  }
 0x7b4   :  { %v1673_v39 = vsel %vm366_vm0, %v9915_v43, %v8391_v2  ;;  %v1672_v24 = vsel %vm366_vm0, %v9913_v17, %v8390_v25  ;;  %2209 = vmatpush1.bf16.msra.mxu0 %v7083_v59  ;;  %2262 = vmatpush1.bf16.msra.mxu1 %v7085_v19  ;;  %v1704_v17 = vld [vmem:[%s11728_s4 + $0xf0] sm:$0xff]  ;;  %v1701_v43 = vld [vmem:[%s11728_s4 + $0xd8] sm:$0xff]  ;;  %v7115_v59 = vcombine.low %v1708_v14, %v1712_v16  ;;  %v10323_v14 = vld [vmem:[%s11731_s7 + $0xa0] sm:$0xff]  }
 0x7b5   :  { %v10137_v29 = vpack.c.bf16 %v1673_v39, %v1672_v24  ;;  %2210 = vmatprep.subr.bf16.mxu0 %v7092_v23  ;;  %2263 = vmatprep.subr.bf16.mxu1 %v7094_v63  ;;  %v7108_v44 = vcombine.high %v1700_v10, %v1704_v17  ;;  %v7110_v37 = vcombine.high %v1701_v43, %v1705_v12  ;;  %v10208_v25 = vld [vmem:[%s11730_s6 + $0x104] ss:$16 sps:$4 sm:$0xff]   ;;  %v8477_v39 = vld [vmem:[%s11730_s6 + $0x12c] ss:$16 sps:$4 sm:$0xff]   ;;  %v10236_v24 = vld [vmem:[%s11730_s6 + $0x120] ss:$16 sps:$4 sm:$0xff]  }
 0x7b6   :  { %2144 = vmatprep.mubr.bf16.mxu0 %v9311_v1  ;;  %2197 = vmatprep.mubr.bf16.mxu1 %v9311_v1  ;;  %v7107_v60 = vcombine.low %v1700_v10, %v1704_v17  ;;  %v7109_v53 = vcombine.low %v1701_v43, %v1705_v12  ;;  %v7117_v19 = vcombine.low %v1709_v18, %v1713_v20  ;;  %v8481_v10 = vld [vmem:[%s11730_s6 + $0x148] ss:$16 sps:$4 sm:$0xff]   ;;  %v10265_v17 = vld [vmem:[%s11730_s6 + $0x164] ss:$16 sps:$4 sm:$0xff]   ;;  %v8489_v43 = vld [vmem:[%s11730_s6 + $0x16c] ss:$16 sps:$4 sm:$0xff]  }
 0x7b7   :  { %v7140_v23 = vcombine.high %v1732_v7, %v1736_v35  ;;  %v7142_v63 = vcombine.high %v1733_v8, %v1737_v45  ;;  %v7141_v2 = vcombine.low %v1733_v8, %v1737_v45  ;;  %v10276_v12 = vld [vmem:[%s11730_s6 + $0x160] ss:$16 sps:$4 sm:$0xff]   ;;  %v10329_v16 = vld [vmem:[%s11731_s7 + $0xa8] sm:$0xff]   ;;  %v10343_v20 = vld [vmem:[%s11731_s7 + $0xb8] sm:$0xff]  }
 0x7b8   :  { %2211 = vmatpush1.bf16.msra.mxu0 %v7091_v27  ;;  %2264 = vmatpush1.bf16.msra.mxu1 %v7093_v13  ;;  %v10225_v27 = vld [vmem:[%s11730_s6 + $0x124] ss:$16 sps:$4 sm:$0xff]   ;;  %v8475_v13 = vld [vmem:[%s11730_s6 + $0x128] ss:$16 sps:$4 sm:$0xff]  }
 0x7b9   :  { %2212 = vmatprep.subr.bf16.mxu0 %v7100_v34  ;;  %2265 = vmatprep.subr.bf16.mxu1 %v7102_v41  ;;  %v10245_v34 = vld [vmem:[%s11730_s6 + $0x144] ss:$16 sps:$4 sm:$0xff]   ;;  %v10256_v41 = vld [vmem:[%s11730_s6 + $0x140] ss:$16 sps:$4 sm:$0xff]  }
 0x7ba   :  { %v10336_v18 = vld [vmem:[%s11731_s7 + $0xb0] sm:$0xff]  }
 0x7bb   :  { %2145 = vmatmul.mubr.bf16.gmra.mrb[28].mxu0 %v10137_v29  ;;  %2198 = vmatmul.mubr.bf16.gmra.mrb[28].mxu1 %v10137_v29 }
 0x7bc   :  { %2213 = vmatpush1.bf16.msra.mxu0 %v7099_v40  ;;  %2266 = vmatpush1.bf16.msra.mxu1 %v7101_v51  ;;  %v8487_v40 = vld [vmem:[%s11730_s6 + $0x168] ss:$16 sps:$4 sm:$0xff]  }
 0x7bd   :  { %2214 = vmatprep.subr.bf16.mxu0 %v7108_v44  ;;  %2267 = vmatprep.subr.bf16.mxu1 %v7110_v37  ;;  %v10302_v51 = vld [vmem:[%s11731_s7 + $0x88] sm:$0xff]   ;;  %v10309_v44 = vld [vmem:[%s11731_s7 + $0x90] sm:$0xff]   ;;  %v10316_v37 = vld [vmem:[%s11731_s7 + $0x98] sm:$0xff]  }
 0x7be   :  { %2240 = vmatprep.mubr.bf16.mxu0 %v9311_v1  ;;  %2293 = vmatprep.mubr.bf16.mxu1 %v9311_v1 }
 0x7c0   :  { %2215 = vmatpush1.bf16.msra.mxu0 %v7107_v60  ;;  %2268 = vmatpush1.bf16.msra.mxu1 %v7109_v53  ;;  %v10351_v60 = vld [vmem:[%s11729_s5] sm:$0xff] }
 0x7c1   :  { %2216 = vmatprep.subr.bf16.mxu0 %v7116_v61  ;;  %2269 = vmatprep.subr.bf16.mxu1 %v7118_v54  ;;  %v10355_v53 = vrot.slane %v10351_v60, %v9653_v36  ;;  %v10359_v61 = vrot.slane %v10351_v60, %v9661_v38  ;;  %v10371_v7 = vrot.slane %v10351_v60, %v9677_v50 }
 0x7c4   :  { %2217 = vmatpush1.bf16.msra.mxu0 %v7115_v59  ;;  %2270 = vmatpush1.bf16.msra.mxu1 %v7117_v19 }
 0x7c5   :  { %2218 = vmatprep.subr.bf16.mxu0 %v7124_v6  ;;  %2271 = vmatprep.subr.bf16.mxu1 %v7126_v46 }
 0x7c8   :  { %2219 = vmatpush1.bf16.msra.mxu0 %v7123_v3  ;;  %2272 = vmatpush1.bf16.msra.mxu1 %v7125_v4  ;;  %v10366_v3 = vrot.slane %v10351_v60, %v9672_v42 }
 0x7c9   :  { %2220 = vmatprep.subr.bf16.mxu0 %v7132_v5  ;;  %2273 = vmatprep.subr.bf16.mxu1 %v7134_v33 }
 0x7cc   :  { %2221 = vmatpush1.bf16.msra.mxu0 %v7131_v15  ;;  %2274 = vmatpush1.bf16.msra.mxu1 %v7133_v21 }
 0x7cd   :  { %2222 = vmatprep.subr.bf16.mxu0 %v7140_v23  ;;  %2275 = vmatprep.subr.bf16.mxu1 %v7142_v63 }
 0x7d0   :  { %2223 = vmatpush1.bf16.msra.mxu0 %v7139_v0  ;;  %2276 = vmatpush1.bf16.msra.mxu1 %v7141_v2 }
 0x7d1   :  { %2411 = vmatprep.subr.bf16.mxu0 %v10208_v25  ;;  %2454 = vmatprep.subr.bf16.mxu1 %v8471_v22 }
 0x7d3   :  { %2241 = vmatmul.mubr.bf16.vlgmr.msra.gmra.mrb[32].mxu0 %v10117_v9  ;;  %2294 = vmatmul.mubr.bf16.vlgmr.msra.gmra.mrb[32].mxu1 %v10117_v9  ;;  %v8483_v9 = vld [vmem:[%s11730_s6 + $0x14c] ss:$16 sps:$4 sm:$0xff]  }
 0x7d4   :  { %2412 = vmatpush1.bf16.msra.mxu0 %v10216_v62  ;;  %2455 = vmatpush1.bf16.msra.mxu1 %v8469_v11 }
 0x7d5   :  { %2413 = vmatprep.subr.bf16.mxu0 %v10225_v27  ;;  %2456 = vmatprep.subr.bf16.mxu1 %v8477_v39 }
 0x7d6   :  { %2250 = vmatprep.mubr.bf16.mxu0 %v9311_v1  ;;  %2303 = vmatprep.mubr.bf16.mxu1 %v9311_v1 }
 0x7d8   :  { %2414 = vmatpush1.bf16.msra.mxu0 %v10236_v24  ;;  %2457 = vmatpush1.bf16.msra.mxu1 %v8475_v13 }
 0x7d9   :  { %2415 = vmatprep.subr.bf16.mxu0 %v10245_v34  ;;  %2458 = vmatprep.subr.bf16.mxu1 %v8483_v9 }
 0x7db   :  { %2251 = vmatmul.mubr.bf16.gmra.mrb[36].mxu0 %v10137_v29  ;;  %2304 = vmatmul.mubr.bf16.gmra.mrb[36].mxu1 %v10137_v29  ;;  %v10295_v29 = vld [vmem:[%s11731_s7 + $0x80] sm:$0xff]  }
 0x7dc   :  { %2416 = vmatpush1.bf16.msra.mxu0 %v10256_v41  ;;  %2459 = vmatpush1.bf16.msra.mxu1 %v8481_v10 }
 0x7dd   :  { %2417 = vmatprep.subr.bf16.mxu0 %v10265_v17  ;;  %2460 = vmatprep.subr.bf16.mxu1 %v8489_v43 }
 0x7de   :  { %2443 = vmatprep.mubr.bf16.mxu0 %v9311_v1  ;;  %2486 = vmatprep.mubr.bf16.mxu1 %v9311_v1 }
 0x7e0   :  { %2418 = vmatpush1.bf16.msra.mxu0 %v10276_v12  ;;  %2461 = vmatpush1.bf16.msra.mxu1 %v8487_v40 }
 0x7e1   :  { %7841 = vmatprep.subr.bf16.mxu0 %v9312_v26  ;;  %2707 = vmatprep.subr.bf16.mxu1 %v8471_v22 }
 0x7e3   :  { %2444 = vmatmul.mubr.bf16.vlgmr.msra.gmra.mrb[24].mxu0 %v9311_v1  ;;  %2487 = vmatmul.mubr.bf16.vlgmr.msra.gmra.mrb[24].mxu1 %v9311_v1 }
 0x7e4   :  { %7857 = vmatprep.mubr.msk.bf16.mxu0 %vm9313_vm1, %v9312_v26  ;;  %2708 = vmatpush1.bf16.msra.mxu1 %v8469_v11 }
 0x7e5   :  { %2709 = vmatprep.subr.bf16.mxu1 %v8477_v39  ;;  %2739 = vmatprep.mubr.bf16.mxu1 %v9311_v1 }
 0x7e6   :  { %7842 = vmatpush3.bf16.msra.mxu0 %v10295_v29 }
 0x7e7   :  { %7843 = vmatprep.subr.bf16.mxu0 %v9312_v26 }
 0x7e8   :  { %2710 = vmatpush1.bf16.msra.mxu1 %v8475_v13 }
 0x7e9   :  { %2711 = vmatprep.subr.bf16.mxu1 %v8483_v9 }
 0x7ea   :  { %7844 = vmatpush3.bf16.msra.mxu0 %v10302_v51 }
 0x7eb   :  { %7845 = vmatprep.subr.bf16.mxu0 %v9312_v26 }
 0x7ec   :  { %2712 = vmatpush1.bf16.msra.mxu1 %v8481_v10 }
 0x7ed   :  { %2713 = vmatprep.subr.bf16.mxu1 %v8489_v43 }
 0x7ee   :  { %7846 = vmatpush3.bf16.msra.mxu0 %v10309_v44 }
 0x7ef   :  { %7847 = vmatprep.subr.bf16.mxu0 %v9312_v26 }
 0x7f0   :  { %2714 = vmatpush1.bf16.msra.mxu1 %v8487_v40 }
 0x7f1   :  { %7861 = vmatprep.subr.bf16.mxu1 %v9312_v26 }
 0x7f2   :  { %7848 = vmatpush3.bf16.msra.mxu0 %v10316_v37 }
 0x7f3   :  { %7849 = vmatprep.subr.bf16.mxu0 %v9312_v26 }
 0x7f6   :  { %7850 = vmatpush3.bf16.msra.mxu0 %v10323_v14 }
 0x7f7   :  { %7851 = vmatprep.subr.bf16.mxu0 %v9312_v26 }
 0x7fa   :  { %7852 = vmatpush3.bf16.msra.mxu0 %v10329_v16 }
 0x7fb   :  { %7853 = vmatprep.subr.bf16.mxu0 %v9312_v26 }
 0x7fe   :  { %7854 = vmatpush3.bf16.msra.mxu0 %v10336_v18 }
 0x7ff   :  { %7855 = vmatprep.subr.bf16.mxu0 %v9312_v26 }
 0x802   :  { %7856 = vmatpush3.bf16.msra.mxu0 %v10343_v20 }
 0x803   :  { %2664 = vmatprep.subr.bf16.mxu0 %v10208_v25 }
 0x8b6   :  { %v2445_v54 = vpop.f32.mrb[24].mxu0  ;;  %v2488_v52 = vpop.f32.mrb[24].mxu1 }
 0x8b7   :  { %v8145_v56 = vadd.f32 %v2445_v54, %v10355_v53  ;;  %v2447_v57 = vpop.f32.mrb[25].mxu0  ;;  %v2490_v58 = vpop.f32.mrb[25].mxu1  ;;  %v8153_v8 = vadd.f32 %v2488_v52, %v10371_v7 }
 0x8b8   :  { %v8146_v59 = vadd.f32 %v2447_v57, %v10359_v61  ;;  %v2449_v19 = vpop.f32.mrb[26].mxu0  ;;  %v2492_v6 = vpop.f32.mrb[26].mxu1  ;;  %v8154_v35 = vadd.f32 %v2490_v58, %v10366_v3 }
 0x8b9   :  { %v7175_v46 = vmul.f32 -1.442695, %v8145_v56  ;;  %v8147_v32 = vadd.f32 %v2449_v19, %v10355_v53  ;;  %v2451_v28 = vpop.f32.mrb[27].mxu0  ;;  %v2494_v30 = vpop.f32.mrb[27].mxu1  ;;  %v8155_v21 = vadd.f32 %v2492_v6, %v10371_v7 }
 0x8ba   :  { %v7177_v31 = vmul.f32 -1.442695, %v8146_v59  ;;  %v8148_v4 = vadd.f32 %v2451_v28, %v10359_v61  ;;  %v7179_v45 = vmul.f32 -1.442695, %v8154_v35  ;;  %v8156_v15 = vadd.f32 %v2494_v30, %v10366_v3 }
 0x8bb   :  { %8798 = vpow2.f32 %v7175_v46  ;;  %v7176_v5 = vmul.f32 -1.442695, %v8147_v32 }
 0x8bc   :  { %8800 = vpow2.f32 %v7177_v31  ;;  %v7178_v33 = vmul.f32 -1.442695, %v8148_v4  ;;  %v7180_v2 = vmul.f32 -1.442695, %v8156_v15  ;;  %v10394_v15 = vld [vmem:[%s11730_s6 + $0x184] ss:$16 sps:$4 sm:$0xff]  }
 0x8bd   :  { %8802 = vpow2.f32 %v7176_v5 }
 0x8be   :  { %8804 = vpow2.f32 %v7178_v33 }
 0x8bf   :  { %8806 = vtanh.f32 %v8153_v8 }
 0x8c0   :  { %8808 = vpow2.f32 %v7179_v45 }
 0x8c1   :  { %8810 = vtanh.f32 %v8155_v21 }
 0x8c5   :  { %v8799_v23 = vpop.eup %8798 }
 0x8c6   :  { %v8801_v63 = vpop.eup %8800  ;;  %v2511_v0 = vadd.f32 1.0, %v8799_v23  ;;  %v10426_v23 = vld [vmem:[%s11730_s6 + $0x1c4] ss:$16 sps:$4 sm:$0xff]  }
 0x8c7   :  { %v2523_v25 = vadd.f32 1.0, %v8801_v63  ;;  %v8803_v22 = vpop.eup %8802  ;;  %v10436_v63 = vld [vmem:[%s11730_s6 + $0x1c0] ss:$16 sps:$4 sm:$0xff]  }
 0x8c8   :  { %8812 = vrcp.f32 %v2511_v0  ;;  %v2512_v11 = vadd.f32 1.0, %v8803_v22  ;;  %v8805_v39 = vpop.eup %8804  ;;  %v10442_v0 = vld [vmem:[%s11730_s6 + $0x1e4] ss:$16 sps:$4 sm:$0xff]  }
 0x8c9   :  { %8814 = vrcp.f32 %v2523_v25  ;;  %v2524_v13 = vadd.f32 1.0, %v8805_v39  ;;  %v8807_v9 = vpop.eup %8806 }
 0x8ca   :  { %8816 = vpow2.f32 %v7180_v2  ;;  %v8809_v10 = vpop.eup %8808 }
 0x8cb   :  { %8818 = vrcp.f32 %v2512_v11  ;;  %v8811_v43 = vpop.eup %8810  ;;  %v2537_v59 = vadd.f32 1.0, %v8809_v10 }
 0x8cc   :  { %8820 = vrcp.f32 %v2524_v13 }
 0x8cd   :  { %8822 = vrcp.f32 %v2537_v59 }
 0x8d2   :  { %v8813_v40 = vpop.eup %8812 }
 0x8d3   :  { %v8815_v54 = vpop.eup %8814  ;;  %v2545_v52 = vmul.f32 %v8813_v40, %v8807_v9 }
 0x8d4   :  { %v8817_v56 = vpop.eup %8816  ;;  %v2543_v57 = vmul.f32 0.0, %v8815_v54 }
 0x8d5   :  { %v8819_v58 = vpop.eup %8818  ;;  %v2538_v32 = vadd.f32 1.0, %v8817_v56 }
 0x8d6   :  { %v10377_v19 = vadd.f32 %v2545_v52, %v2543_v57  ;;  %v2546_v6 = vmul.f32 %v8819_v58, %v8811_v43  ;;  %v8821_v46 = vpop.eup %8820 }
 0x8d7   :  { %v2544_v28 = vmul.f32 0.0, %v8821_v46  ;;  %v8823_v31 = vpop.eup %8822 }
 0x8d8   :  { %8824 = vtanh.f32 %v10377_v19 }
 0x8d9   :  { %v10380_v30 = vadd.f32 %v2546_v6, %v2544_v28  ;;  %8826 = vrcp.f32 %v2538_v32 }
 0x8db   :  { %8828 = vtanh.f32 %v10380_v30 }
 0x8e2   :  { %v8825_v4 = vpop.eup %8824 }
 0x8e3   :  { %v8827_v5 = vpop.eup %8826  ;;  %v2551_v35 = vmul.f32 %v8825_v4, %v8823_v31 }
 0x8e5   :  { %v8829_v33 = vpop.eup %8828 }
 0x8e6   :  { %v2552_v8 = vmul.f32 %v8829_v33, %v8827_v5 }
 0x8e8   :  { %v2570_v45 = vpack.c.bf16 %v2552_v8, %v2551_v35 }
 0x8ea   :  { %7858 = vmatmul.mubr.bf16.vlgmr.msra.gmra.mrb[40].mxu0 %v2570_v45 }
 0x8eb   :  { %2665 = vmatpush1.bf16.msra.mxu0 %v10216_v62  ;;  %2696 = vmatprep.mubr.bf16.mxu0 %v9311_v1 }
 0x8ec   :  { %2666 = vmatprep.subr.bf16.mxu0 %v10225_v27 }
 0x8ef   :  { %2667 = vmatpush1.bf16.msra.mxu0 %v10236_v24  ;;  %v10404_v24 = vld [vmem:[%s11730_s6 + $0x180] ss:$16 sps:$4 sm:$0xff]  }
 0x8f0   :  { %2668 = vmatprep.subr.bf16.mxu0 %v10245_v34 }
 0x8f3   :  { %2669 = vmatpush1.bf16.msra.mxu0 %v10256_v41 }
 0x8f4   :  { %2670 = vmatprep.subr.bf16.mxu0 %v10265_v17  ;;  %v10411_v17 = vld [vmem:[%s11730_s6 + $0x1a4] ss:$16 sps:$4 sm:$0xff]  }
 0x8f7   :  { %2671 = vmatpush1.bf16.msra.mxu0 %v10276_v12  ;;  %v10419_v12 = vld [vmem:[%s11730_s6 + $0x1a0] ss:$16 sps:$4 sm:$0xff]  }
 0x8f8   :  { %2945 = vmatprep.subr.bf16.mxu0 %v10394_v15 }
 0x9bd   :  { %v10397_v62 = vpop.f32.mrb[40].mxu0 }
 0x9be   :  { %v7859_v27 = vpop.f32.mrb[41].mxu0 }
 0x9bf   :  { %v10399_v21 = vpop.f32.mrb[42].mxu0 }
 0x9c0   :  { %v2660_v34 = vpack.c.bf16 %v10399_v21, %v10397_v62  ;;  %v7860_v41 = vpop.f32.mrb[43].mxu0 }
 0x9c2   :  { %7205 = vmatmul.mubr.msk.bf16.vlgmr.msra.gmra.mrb[28].mxu0 %vm366_vm0, %v2660_v34  ;;  %7206 = vmatmul.mubr.msk.bf16.vlgmr.msra.gmra.mrb[28].mxu1 %vm366_vm0, %v2660_v34 }
 0x9c3   :  { %2946 = vmatpush1.bf16.msra.mxu0 %v10404_v24  ;;  %2977 = vmatprep.mubr.bf16.mxu0 %v9311_v1 }
 0x9c4   :  { %2947 = vmatprep.subr.bf16.mxu0 %v10411_v17  ;;  %7862 = vmatpush3.bf16.msra.mxu1 %v10295_v29  ;;  %v10450_v29 = vld [vmem:[%s11730_s6 + $0x1e0] ss:$16 sps:$4 sm:$0xff]  }
 0x9c5   :  { %7863 = vmatprep.subr.bf16.mxu1 %v9312_v26  ;;  %7877 = vmatprep.mubr.msk.bf16.mxu1 %vm9313_vm1, %v9312_v26 }
 0x9c7   :  { %2948 = vmatpush1.bf16.msra.mxu0 %v10419_v12 }
 0x9c8   :  { %2949 = vmatprep.subr.bf16.mxu0 %v10426_v23  ;;  %7864 = vmatpush3.bf16.msra.mxu1 %v10302_v51  ;;  %v10472_v51 = vld [vmem:[%s11730_s6 + $0x18c] ss:$16 sps:$4 sm:$0xff]  }
 0x9c9   :  { %7865 = vmatprep.subr.bf16.mxu1 %v9312_v26 }
 0x9cb   :  { %2950 = vmatpush1.bf16.msra.mxu0 %v10436_v63 }
 0x9cc   :  { %2951 = vmatprep.subr.bf16.mxu0 %v10442_v0  ;;  %7866 = vmatpush3.bf16.msra.mxu1 %v10309_v44 }
 0x9cd   :  { %7867 = vmatprep.subr.bf16.mxu1 %v9312_v26 }
 0x9cf   :  { %2952 = vmatpush1.bf16.msra.mxu0 %v10450_v29 }
 0x9d0   :  { %7868 = vmatpush3.bf16.msra.mxu1 %v10316_v37  ;;  %7881 = vmatprep.subr.bf16.mxu0 %v9312_v26 }
 0x9d1   :  { %7869 = vmatprep.subr.bf16.mxu1 %v9312_v26 }
 0x9d2   :  { %2978 = vmatmul.mubr.bf16.vlgmr.msra.gmra.mrb[36].mxu0 %v9311_v1 }
 0x9d3   :  { %7897 = vmatprep.mubr.msk.bf16.mxu0 %vm9313_vm1, %v9312_v26 }
 0x9d4   :  { %7870 = vmatpush3.bf16.msra.mxu1 %v10323_v14 }
 0x9d5   :  { %7871 = vmatprep.subr.bf16.mxu1 %v9312_v26 }
 0x9d8   :  { %7872 = vmatpush3.bf16.msra.mxu1 %v10329_v16 }
 0x9d9   :  { %7873 = vmatprep.subr.bf16.mxu1 %v9312_v26 }
 0x9dc   :  { %7874 = vmatpush3.bf16.msra.mxu1 %v10336_v18 }
 0x9dd   :  { %7875 = vmatprep.subr.bf16.mxu1 %v9312_v26 }
 0x9e0   :  { %7876 = vmatpush3.bf16.msra.mxu1 %v10343_v20 }
 0x9e1   :  { %2988 = vmatprep.subr.bf16.mxu1 %v10472_v51 }
 0xa95   :  { %v2698_v44 = vpop.f32.mrb[28].mxu0  ;;  %v2741_v37 = vpop.f32.mrb[28].mxu1 }
 0xa96   :  { %v8149_v14 = vadd.f32 %v2698_v44, %v10355_v53  ;;  %v2700_v16 = vpop.f32.mrb[29].mxu0  ;;  %v2743_v2 = vpop.f32.mrb[29].mxu1  ;;  %v8157_v52 = vadd.f32 %v2741_v37, %v10371_v7 }
 0xa97   :  { %v8150_v25 = vadd.f32 %v2700_v16, %v10359_v61  ;;  %v2702_v18 = vpop.f32.mrb[30].mxu0  ;;  %v2745_v22 = vpop.f32.mrb[30].mxu1  ;;  %v8158_v54 = vadd.f32 %v2743_v2, %v10366_v3 }
 0xa98   :  { %v7207_v11 = vmul.f32 -1.442695, %v8149_v14  ;;  %v8151_v20 = vadd.f32 %v2702_v18, %v10355_v53  ;;  %v2704_v39 = vpop.f32.mrb[31].mxu0  ;;  %v2747_v13 = vpop.f32.mrb[31].mxu1  ;;  %v8159_v53 = vadd.f32 %v2745_v22, %v10371_v7 }
 0xa99   :  { %v7209_v9 = vmul.f32 -1.442695, %v8150_v25  ;;  %v8152_v10 = vadd.f32 %v2704_v39, %v10359_v61  ;;  %v7211_v56 = vmul.f32 -1.442695, %v8158_v54  ;;  %v8160_v57 = vadd.f32 %v2747_v13, %v10366_v3 }
 0xa9a   :  { %8830 = vpow2.f32 %v7207_v11  ;;  %v7208_v43 = vmul.f32 -1.442695, %v8151_v20 }
 0xa9b   :  { %8832 = vpow2.f32 %v7209_v9  ;;  %v7210_v40 = vmul.f32 -1.442695, %v8152_v10  ;;  %v7212_v61 = vmul.f32 -1.442695, %v8160_v57  ;;  %v8516_v57 = vld [vmem:[%s11730_s6 + $0x1c8] ss:$16 sps:$4 sm:$0xff]  }
 0xa9c   :  { %8834 = vpow2.f32 %v7208_v43 }
 0xa9d   :  { %8836 = vpow2.f32 %v7210_v40 }
 0xa9e   :  { %8838 = vtanh.f32 %v8157_v52  ;;  %v8515_v52 = vld [vmem:[%s11730_s6 + $0x1ac] ss:$16 sps:$4 sm:$0xff]  }
 0xa9f   :  { %8840 = vpow2.f32 %v7211_v56  ;;  %v8518_v56 = vld [vmem:[%s11730_s6 + $0x1cc] ss:$16 sps:$4 sm:$0xff]  }
 0xaa0   :  { %8842 = vtanh.f32 %v8159_v53  ;;  %v8521_v53 = vld [vmem:[%s11730_s6 + $0x1ec] ss:$16 sps:$4 sm:$0xff]  }
 0xaa4   :  { %v8831_v58 = vpop.eup %8830 }
 0xaa5   :  { %v8833_v59 = vpop.eup %8832  ;;  %v2764_v6 = vadd.f32 1.0, %v8831_v58  ;;  %v10483_v46 = vpop.f32.mrb[36].mxu0  ;;  %v8519_v58 = vld [vmem:[%s11730_s6 + $0x1e8] ss:$16 sps:$4 sm:$0xff]  }
 0xaa6   :  { %v2776_v32 = vadd.f32 1.0, %v8833_v59  ;;  %v10485_v28 = vpop.f32.mrb[37].mxu0  ;;  %v8835_v31 = vpop.eup %8834  ;;  %v10522_v59 = vld [vmem:[%s11731_s7 + $0xc0] sm:$0xff]  }
 0xaa7   :  { %8844 = vrcp.f32 %v2764_v6  ;;  %v10487_v4 = vpop.f32.mrb[38].mxu0  ;;  %v2765_v3 = vadd.f32 1.0, %v8835_v31  ;;  %v8837_v7 = vpop.eup %8836  ;;  %7882 = vmatpush3.bf16.msra.mxu0 %v10522_v59  ;;  %v10536_v6 = vld [vmem:[%s11731_s7 + $0xd0] sm:$0xff]   ;;  %v10556_v31 = vld [vmem:[%s11731_s7 + $0xe8] sm:$0xff]  }
 0xaa8   :  { %8846 = vrcp.f32 %v2776_v32  ;;  %v10489_v5 = vpop.f32.mrb[39].mxu0  ;;  %v2777_v33 = vadd.f32 1.0, %v8837_v7  ;;  %v8839_v35 = vpop.eup %8838  ;;  %7883 = vmatprep.subr.bf16.mxu0 %v9312_v26  ;;  %v10550_v32 = vld [vmem:[%s11731_s7 + $0xe0] sm:$0xff]   ;;  %v10570_v7 = vld [vmem:[%s11731_s7 + $0xf8] sm:$0xff]  }
 0xaa9   :  { %8848 = vpow2.f32 %v7212_v61  ;;  %v8841_v8 = vpop.eup %8840  ;;  %v10543_v61 = vld [vmem:[%s11731_s7 + $0xd8] sm:$0xff]  }
 0xaaa   :  { %8850 = vrcp.f32 %v2765_v3  ;;  %v8843_v45 = vpop.eup %8842  ;;  %v2790_v44 = vadd.f32 1.0, %v8841_v8  ;;  %v10563_v3 = vld [vmem:[%s11731_s7 + $0xf0] sm:$0xff]  }
 0xaab   :  { %8852 = vrcp.f32 %v2777_v33  ;;  %v10577_v33 = vrot.slane %v10351_v60, %v9892_v47 }
 0xaac   :  { %8854 = vrcp.f32 %v2790_v44 }
 0xaad   :  { %v8165_v8 = vadd.f32 %v10483_v46, %v10577_v33 }
 0xab1   :  { %v8845_v27 = vpop.eup %8844 }
 0xab2   :  { %v8847_v34 = vpop.eup %8846  ;;  %v2798_v41 = vmul.f32 %v8845_v27, %v8839_v35  ;;  %v10581_v35 = vrot.slane %v10351_v60, %v9895_v55 }
 0xab3   :  { %v8849_v37 = vpop.eup %8848  ;;  %v2796_v14 = vmul.f32 %v8847_v34, %v10377_v19  ;;  %v8510_v19 = vld [vmem:[%s11730_s6 + $0x188] ss:$16 sps:$4 sm:$0xff]   ;;  %v7245_v34 = vmul.f32 -1.442695, %v8165_v8 }
 0xab4   :  { %v8851_v16 = vpop.eup %8850  ;;  %v2791_v22 = vadd.f32 1.0, %v8849_v37  ;;  %v8168_v27 = vadd.f32 %v10489_v5, %v10581_v35 }
 0xab5   :  { %v2800_v2 = vadd.f32 %v2798_v41, %v2796_v14  ;;  %v2799_v25 = vmul.f32 %v8851_v16, %v8843_v45  ;;  %v8853_v18 = vpop.eup %8852  ;;  %v8166_v45 = vadd.f32 %v10485_v28, %v10581_v35 }
 0xab6   :  { %v2797_v11 = vmul.f32 %v8853_v18, %v10380_v30  ;;  %v8855_v39 = vpop.eup %8854  ;;  %v8513_v30 = vld [vmem:[%s11730_s6 + $0x1a8] ss:$16 sps:$4 sm:$0xff]   ;;  %v7248_v44 = vmul.f32 -1.442695, %v8168_v27 }
 0xab7   :  { %8856 = vtanh.f32 %v2800_v2  ;;  %v7247_v41 = vmul.f32 -1.442695, %v8166_v45 }
 0xab8   :  { %v2801_v20 = vadd.f32 %v2799_v25, %v2797_v11  ;;  %8858 = vrcp.f32 %v2791_v22 }
 0xaba   :  { %8860 = vtanh.f32 %v2801_v20 }
 0xabb   :  { %8862 = vpow2.f32 %v7245_v34 }
 0xabc   :  { %8864 = vpow2.f32 %v7247_v41 }
 0xabd   :  { %8866 = vpow2.f32 %v7248_v44 }
 0xac1   :  { %v8857_v13 = vpop.eup %8856 }
 0xac2   :  { %v2804_v9 = vmul.f32 %v8857_v13, %v8855_v39  ;;  %v8859_v10 = vpop.eup %8858  ;;  %v10601_v39 = vrot.slane %v10351_v60, %v9921_v48 }
 0xac4   :  { %v8861_v43 = vpop.eup %8860 }
 0xac5   :  { %v2805_v40 = vmul.f32 %v8861_v43, %v8859_v10  ;;  %v8863_v2 = vpop.eup %8862 }
 0xac6   :  { %v8865_v25 = vpop.eup %8864  ;;  %v3045_v18 = vadd.f32 1.0, %v8863_v2 }
 0xac7   :  { %v2806_v54 = vpack.c.bf16 %v2805_v40, %v2804_v9  ;;  %v8867_v5 = vpop.eup %8866  ;;  %v3057_v11 = vadd.f32 1.0, %v8865_v25 }
 0xac8   :  { %v3058_v20 = vadd.f32 1.0, %v8867_v5 }
 0xac9   :  { %7878 = vmatmul.mubr.bf16.vlgmr.msra.gmra.mrb[40].mxu1 %v2806_v54 }
 0xaca   :  { %2989 = vmatpush1.bf16.msra.mxu1 %v8510_v19  ;;  %3020 = vmatprep.mubr.bf16.mxu1 %v9311_v1 }
 0xacb   :  { %2990 = vmatprep.subr.bf16.mxu1 %v8515_v52 }
 0xace   :  { %2991 = vmatpush1.bf16.msra.mxu1 %v8513_v30 }
 0xacf   :  { %2992 = vmatprep.subr.bf16.mxu1 %v8518_v56 }
 0xad2   :  { %2993 = vmatpush1.bf16.msra.mxu1 %v8516_v57 }
 0xad3   :  { %2994 = vmatprep.subr.bf16.mxu1 %v8521_v53 }
 0xad6   :  { %2995 = vmatpush1.bf16.msra.mxu1 %v8519_v58 }
 0xad7   :  { %3241 = vmatprep.subr.bf16.mxu1 %v10472_v51  ;;  %v10529_v51 = vld [vmem:[%s11731_s7 + $0xc8] sm:$0xff]  }
 0xad8   :  { %7884 = vmatpush3.bf16.msra.mxu0 %v10529_v51 }
 0xad9   :  { %3021 = vmatmul.mubr.bf16.vlgmr.msra.gmra.mrb[36].mxu1 %v9311_v1  ;;  %7885 = vmatprep.subr.bf16.mxu0 %v9312_v26 }
 0xada   :  { %3242 = vmatpush1.bf16.msra.mxu1 %v8510_v19  ;;  %3273 = vmatprep.mubr.bf16.mxu1 %v9311_v1 }
 0xadb   :  { %3243 = vmatprep.subr.bf16.mxu1 %v8515_v52 }
 0xadc   :  { %7886 = vmatpush3.bf16.msra.mxu0 %v10536_v6 }
 0xadd   :  { %7887 = vmatprep.subr.bf16.mxu0 %v9312_v26 }
 0xade   :  { %3244 = vmatpush1.bf16.msra.mxu1 %v8513_v30 }
 0xadf   :  { %3245 = vmatprep.subr.bf16.mxu1 %v8518_v56 }
 0xae0   :  { %7888 = vmatpush3.bf16.msra.mxu0 %v10543_v61 }
 0xae1   :  { %7889 = vmatprep.subr.bf16.mxu0 %v9312_v26 }
 0xae2   :  { %3246 = vmatpush1.bf16.msra.mxu1 %v8516_v57 }
 0xae3   :  { %3247 = vmatprep.subr.bf16.mxu1 %v8521_v53 }
 0xae4   :  { %7890 = vmatpush3.bf16.msra.mxu0 %v10550_v32 }
 0xae5   :  { %7891 = vmatprep.subr.bf16.mxu0 %v9312_v26 }
 0xae6   :  { %3248 = vmatpush1.bf16.msra.mxu1 %v8519_v58 }
 0xae7   :  { %7901 = vmatprep.subr.bf16.mxu1 %v9312_v26 }
 0xae8   :  { %7892 = vmatpush3.bf16.msra.mxu0 %v10556_v31 }
 0xae9   :  { %7893 = vmatprep.subr.bf16.mxu0 %v9312_v26 }
 0xaec   :  { %7894 = vmatpush3.bf16.msra.mxu0 %v10563_v3 }
 0xaed   :  { %7895 = vmatprep.subr.bf16.mxu0 %v9312_v26 }
 0xaf0   :  { %7896 = vmatpush3.bf16.msra.mxu0 %v10570_v7 }
 0xaf1   :  { %3198 = vmatprep.subr.bf16.mxu0 %v10394_v15  ;;  %v8167_v15 = vadd.f32 %v10487_v4, %v10577_v33  ;;  %v10597_v4 = vrot.slane %v10351_v60, %v9918_v49 }
 0xaf3   :  { %v7246_v37 = vmul.f32 -1.442695, %v8167_v15 }
 0xaf5   :  { %8868 = vpow2.f32 %v7246_v37 }
 0xaf6   :  { %8870 = vrcp.f32 %v3045_v18 }
 0xaf7   :  { %8872 = vrcp.f32 %v3057_v11 }
 0xaf8   :  { %8874 = vrcp.f32 %v3058_v20 }
 0xaff   :  { %v8869_v22 = vpop.eup %8868 }
 0xb00   :  { %v3046_v13 = vadd.f32 1.0, %v8869_v22  ;;  %v8871_v57 = vpop.eup %8870 }
 0xb01   :  { %v8873_v53 = vpop.eup %8872 }
 0xb02   :  { %v8875_v58 = vpop.eup %8874  ;;  %v3077_v27 = vmul.f32 0.0, %v8873_v53 }
 0xb03   :  { %v3078_v44 = vmul.f32 0.0, %v8875_v58  ;;  %v3429_v58 = vld [vmem:[#allocation5 + $0x30] sm:$0xff] }
 0xb9c   :  { %v10591_v14 = vpop.f32.mrb[40].mxu1 }
 0xb9d   :  { %v7879_v16 = vpop.f32.mrb[41].mxu1 }
 0xb9e   :  { %v10593_v46 = vpop.f32.mrb[42].mxu1 }
 0xb9f   :  { %v7880_v28 = vpop.f32.mrb[43].mxu1 }
 0xbac   :  { %v3022_v9 = vpop.f32.mrb[36].mxu1 }
 0xbad   :  { %v8173_v10 = vadd.f32 %v3022_v9, %v10597_v4  ;;  %v3024_v43 = vpop.f32.mrb[37].mxu1 }
 0xbae   :  { %v8174_v40 = vadd.f32 %v3024_v43, %v10601_v39  ;;  %v3026_v19 = vpop.f32.mrb[38].mxu1 }
 0xbaf   :  { %8876 = vtanh.f32 %v8173_v10  ;;  %v8175_v54 = vadd.f32 %v3026_v19, %v10597_v4  ;;  %v3028_v52 = vpop.f32.mrb[39].mxu1 }
 0xbb0   :  { %8878 = vrcp.f32 %v3046_v13  ;;  %v7249_v30 = vmul.f32 -1.442695, %v8174_v40  ;;  %v8176_v60 = vadd.f32 %v3028_v52, %v10601_v39 }
 0xbb1   :  { %8880 = vtanh.f32 %v8175_v54 }
 0xbb2   :  { %8882 = vpow2.f32 %v7249_v30  ;;  %v7250_v56 = vmul.f32 -1.442695, %v8176_v60  ;;  %v3419_v60 = vld [vmem:[%s11751_s0] sm:$0xff] }
 0xbb4   :  { %8884 = vpow2.f32 %v7250_v56  ;;  %v3420_v56 = vld [vmem:[%s11751_s0 + $0x8] sm:$0xff] }
 0xbb5   :  { %v10653_v53 = vpack.c.bf16 %v3420_v56, %v3419_v60 }
 0xbb9   :  { %v8877_v8 = vpop.eup %8876 }
 0xbba   :  { %v8879_v45 = vpop.eup %8878  ;;  %v3079_v34 = vmul.f32 %v8877_v8, %v8871_v57  ;;  %v3425_v57 = vld [vmem:[#allocation5 + $0x10] sm:$0xff] }
 0xbbb   :  { %v8881_v15 = vpop.eup %8880  ;;  %v7287_v8 = vcombine.low %v3425_v57, %v3429_v58 }
 0xbbc   :  { %v8883_v41 = vpop.eup %8882  ;;  %v10607_v37 = vadd.f32 %v3079_v34, %v3077_v27  ;;  %v3080_v16 = vmul.f32 %v8881_v15, %v8879_v45  ;;  %v7288_v45 = vcombine.high %v3425_v57, %v3429_v58  ;;  %v3433_v27 = vld [vmem:[#allocation5 + $0x50] sm:$0xff] }
 0xbbd   :  { %v3071_v28 = vadd.f32 1.0, %v8883_v41  ;;  %v3437_v34 = vld [vmem:[#allocation5 + $0x70] sm:$0xff] }
 0xbbe   :  { %v8885_v2 = vpop.eup %8884  ;;  %8886 = vtanh.f32 %v10607_v37  ;;  %v10610_v25 = vadd.f32 %v3080_v16, %v3078_v44  ;;  %v7296_v15 = vcombine.high %v3433_v27, %v3437_v34  ;;  %v7295_v41 = vcombine.low %v3433_v27, %v3437_v34  ;;  %v3421_v44 = vld [vmem:[%s11751_s0 + $0x10] sm:$0xff]  ;;  %v3422_v16 = vld [vmem:[%s11751_s0 + $0x18] sm:$0xff] }
 0xbbf   :  { %8888 = vrcp.f32 %v3071_v28  ;;  %v3072_v5 = vadd.f32 1.0, %v8885_v2  ;;  %v3441_v28 = vld [vmem:[#allocation5 + $0x90] sm:$0xff]  ;;  %v10664_v2 = vpack.c.bf16 %v3422_v16, %v3421_v44 }
 0xbc0   :  { %8890 = vtanh.f32 %v10610_v25 }
 0xbc1   :  { %8892 = vrcp.f32 %v3072_v5  ;;  %v3445_v5 = vld [vmem:[#allocation5 + $0xb0] sm:$0xff] }
 0xbc8   :  { %v8887_v18 = vpop.eup %8886 }
 0xbc9   :  { %v8889_v22 = vpop.eup %8888 }
 0xbca   :  { %v8891_v11 = vpop.eup %8890  ;;  %v3085_v13 = vmul.f32 %v8889_v22, %v8887_v18  ;;  %v7303_v18 = vcombine.low %v3441_v28, %v3445_v5  ;;  %v7304_v22 = vcombine.high %v3441_v28, %v3445_v5 }
 0xbcb   :  { %v8893_v20 = vpop.eup %8892 }
 0xbcc   :  { %v3086_v9 = vmul.f32 %v8893_v20, %v8891_v11  ;;  %v3449_v11 = vld [vmem:[#allocation5 + $0xd0] sm:$0xff] }
 0xbcd   :  { %v3453_v20 = vld [vmem:[#allocation5 + $0xf0] sm:$0xff] }
 0xbce   :  { %v3104_v10 = vpack.c.bf16 %v3086_v9, %v3085_v13  ;;  %v7312_v13 = vcombine.high %v3449_v11, %v3453_v20  ;;  %v7311_v9 = vcombine.low %v3449_v11, %v3453_v20 }
 0xbd0   :  { %7898 = vmatmul.mubr.bf16.vlgmr.msra.gmra.mrb[44].mxu0 %v3104_v10  ;;  %v10669_v10 = vld [vmem:[#allocation10 + $0x4] ss:$16 sps:$4 sm:$0xff]  }
 0xbd1   :  { %3199 = vmatpush1.bf16.msra.mxu0 %v10404_v24  ;;  %3230 = vmatprep.mubr.bf16.mxu0 %v9311_v1 }
 0xbd2   :  { %3200 = vmatprep.subr.bf16.mxu0 %v10411_v17  ;;  %v3423_v17 = vld [vmem:[#allocation5] sm:$0xff] }
 0xbd5   :  { %3201 = vmatpush1.bf16.msra.mxu0 %v10419_v12  ;;  %v3427_v12 = vld [vmem:[#allocation5 + $0x20] sm:$0xff] }
 0xbd6   :  { %3202 = vmatprep.subr.bf16.mxu0 %v10426_v23  ;;  %v7284_v23 = vcombine.high %v3423_v17, %v3427_v12 }
 0xbd9   :  { %3203 = vmatpush1.bf16.msra.mxu0 %v10436_v63  ;;  %v7283_v63 = vcombine.low %v3423_v17, %v3427_v12  ;;  %v10682_v17 = vld [vmem:[#allocation10 + $0x44] ss:$16 sps:$4 sm:$0xff]   ;;  %v10685_v12 = vld [vmem:[#allocation5 + $0x8] sm:$0xff] }
 0xbda   :  { %3204 = vmatprep.subr.bf16.mxu0 %v10442_v0  ;;  %v3431_v0 = vld [vmem:[#allocation5 + $0x40] sm:$0xff] }
 0xbdd   :  { %3205 = vmatpush1.bf16.msra.mxu0 %v10450_v29  ;;  %v3435_v29 = vld [vmem:[#allocation5 + $0x60] sm:$0xff] }
 0xbde   :  { %3665 = vmatprep.subr.bf16.mxu0 %v7284_v23  ;;  %v10687_v23 = vld [vmem:[#allocation5 + $0x28] sm:$0xff] }
 0xca3   :  { %v10621_v43 = vpop.f32.mrb[44].mxu0 }
 0xca4   :  { %v7899_v40 = vpop.f32.mrb[45].mxu0 }
 0xca5   :  { %v10623_v19 = vpop.f32.mrb[46].mxu0  ;;  %v10671_v40 = vld [vmem:[#allocation10] ss:$16 sps:$4 sm:$0xff]  }
 0xca6   :  { %v3194_v24 = vpack.c.bf16 %v10623_v19, %v10621_v43  ;;  %v7900_v54 = vpop.f32.mrb[47].mxu0 }
 0xca7   :  { %v10679_v54 = vld [vmem:[#allocation10 + $0x24] ss:$16 sps:$4 sm:$0xff]  }
 0xca8   :  { %7275 = vmatmul.mubr.msk.bf16.vlgmr.msra.gmra.mrb[32].mxu0 %vm366_vm0, %v3194_v24  ;;  %7276 = vmatmul.mubr.msk.bf16.vlgmr.msra.gmra.mrb[32].mxu1 %vm366_vm0, %v3194_v24  ;;  %v10677_v24 = vld [vmem:[#allocation10 + $0x20] ss:$16 sps:$4 sm:$0xff]  }
 0xca9   :  { %3697 = vmatprep.mubr.bf16.mxu0 %v9311_v1  ;;  %7902 = vmatpush3.bf16.msra.mxu1 %v10522_v59  ;;  %v7292_v59 = vcombine.high %v3431_v0, %v3435_v29 }
 0xcaa   :  { %7903 = vmatprep.subr.bf16.mxu1 %v9312_v26  ;;  %7917 = vmatprep.mubr.msk.bf16.mxu1 %vm9313_vm1, %v9312_v26 }
 0xcab   :  { %3666 = vmatpush1.bf16.msra.mxu0 %v7283_v63  ;;  %v7285_v63 = vcombine.low %v10685_v12, %v10687_v23 }
 0xcac   :  { %3667 = vmatprep.subr.bf16.mxu0 %v7292_v59  ;;  %v10697_v59 = vld [vmem:[#allocation10 + $0x64] ss:$16 sps:$4 sm:$0xff]  }
 0xcad   :  { %7904 = vmatpush3.bf16.msra.mxu1 %v10529_v51  ;;  %v7291_v51 = vcombine.low %v3431_v0, %v3435_v29  ;;  %v7286_v0 = vcombine.high %v10685_v12, %v10687_v23  ;;  %v10694_v29 = vld [vmem:[#allocation10 + $0x40] ss:$16 sps:$4 sm:$0xff]   ;;  %v3438_v12 = vld [vmem:[#allocation5 + $0x78] sm:$0xff] }
 0xcae   :  { %7905 = vmatprep.subr.bf16.mxu1 %v9312_v26 }
 0xcaf   :  { %3668 = vmatpush1.bf16.msra.mxu0 %v7291_v51  ;;  %v10702_v51 = vld [vmem:[#allocation10 + $0x60] ss:$16 sps:$4 sm:$0xff]  }
 0xcb1   :  { %7906 = vmatpush3.bf16.msra.mxu1 %v10536_v6  ;;  %v3439_v6 = vld [vmem:[#allocation5 + $0x80] sm:$0xff] }
 0xcb2   :  { %7907 = vmatprep.subr.bf16.mxu1 %v9312_v26 }
 0xcb5   :  { %7908 = vmatpush3.bf16.msra.mxu1 %v10543_v61  ;;  %v3443_v61 = vld [vmem:[#allocation5 + $0xa0] sm:$0xff] }
 0xcb6   :  { %7909 = vmatprep.subr.bf16.mxu1 %v9312_v26 }
 0xcb9   :  { %7910 = vmatpush3.bf16.msra.mxu1 %v10550_v32  ;;  %v7300_v32 = vcombine.high %v3439_v6, %v3443_v61 }
 0xcba   :  { %7911 = vmatprep.subr.bf16.mxu1 %v9312_v26 }
 0xcbb   :  { %3669 = vmatprep.subr.bf16.mxu0 %v7300_v32 }
 0xcbd   :  { %7912 = vmatpush3.bf16.msra.mxu1 %v10556_v31  ;;  %v7299_v31 = vcombine.low %v3439_v6, %v3443_v61 }
 0xcbe   :  { %7913 = vmatprep.subr.bf16.mxu1 %v9312_v26 }
 0xcbf   :  { %3670 = vmatpush1.bf16.msra.mxu0 %v7299_v31 }
 0xcc1   :  { %7914 = vmatpush3.bf16.msra.mxu1 %v10563_v3  ;;  %v3447_v3 = vld [vmem:[#allocation5 + $0xc0] sm:$0xff] }
 0xcc2   :  { %7915 = vmatprep.subr.bf16.mxu1 %v9312_v26 }
 0xcc5   :  { %7916 = vmatpush3.bf16.msra.mxu1 %v10570_v7  ;;  %v3451_v7 = vld [vmem:[#allocation5 + $0xe0] sm:$0xff] }
 0xcc6   :  { %v7308_v52 = vcombine.high %v3447_v3, %v3451_v7  ;;  %v7307_v30 = vcombine.low %v3447_v3, %v3451_v7  ;;  %3718 = vmatprep.subr.bf16.mxu1 %v7286_v0 }
 0xcc8   :  { %3671 = vmatprep.subr.bf16.mxu0 %v7308_v52 }
 0xcc9   :  { %3672 = vmatpush1.bf16.msra.mxu0 %v7307_v30 }
 0xcca   :  { %3771 = vmatprep.subr.bf16.mxu0 %v7288_v45 }
 0xccc   :  { %7315 = vmatmul.mubr.msk.bf16.vlgmr.msra.gmra.mrb[48].mxu0 %vm366_vm0, %v10653_v53 }
 0xccd   :  { %3707 = vmatprep.mubr.bf16.mxu0 %v9311_v1  ;;  %3772 = vmatpush1.bf16.msra.mxu0 %v7287_v8 }
 0xcce   :  { %3773 = vmatprep.subr.bf16.mxu0 %v7296_v15 }
 0xcd1   :  { %3774 = vmatpush1.bf16.msra.mxu0 %v7295_v41 }
 0xcd2   :  { %3775 = vmatprep.subr.bf16.mxu0 %v7304_v22 }
 0xcd4   :  { %7316 = vmatmul.mubr.msk.bf16.gmra.mrb[52].mxu0 %vm366_vm0, %v10664_v2 }
 0xcd5   :  { %3803 = vmatprep.mubr.bf16.mxu0 %v9311_v1  ;;  %3776 = vmatpush1.bf16.msra.mxu0 %v7303_v18 }
 0xcd6   :  { %3777 = vmatprep.subr.bf16.mxu0 %v7312_v13 }
 0xcd9   :  { %3778 = vmatpush1.bf16.msra.mxu0 %v7311_v9 }
 0xcda   :  { %3973 = vmatprep.subr.bf16.mxu0 %v10669_v10 }
 0xcdc   :  { %7319 = vmatmul.mubr.msk.bf16.vlgmr.msra.gmra.mrb[56].mxu0 %vm366_vm0, %v10653_v53 }
 0xcdd   :  { %3974 = vmatpush1.bf16.msra.mxu0 %v10671_v40  ;;  %3813 = vmatprep.mubr.bf16.mxu0 %v9311_v1 }
 0xcde   :  { %3975 = vmatprep.subr.bf16.mxu0 %v10679_v54 }
 0xce1   :  { %3976 = vmatpush1.bf16.msra.mxu0 %v10677_v24 }
 0xce2   :  { %3977 = vmatprep.subr.bf16.mxu0 %v10682_v17 }
 0xce4   :  { %7320 = vmatmul.mubr.msk.bf16.gmra.mrb[60].mxu0 %vm366_vm0, %v10664_v2 }
 0xce5   :  { %3978 = vmatpush1.bf16.msra.mxu0 %v10694_v29  ;;  %4005 = vmatprep.mubr.bf16.mxu0 %v9311_v1 }
 0xce6   :  { %3979 = vmatprep.subr.bf16.mxu0 %v10697_v59 }
 0xce9   :  { %3980 = vmatpush1.bf16.msra.mxu0 %v10702_v51 }
 0xcea   :  { %7921 = vmatprep.subr.bf16.mxu0 %v9312_v26 }
 0xcec   :  { %4006 = vmatmul.mubr.bf16.vlgmr.msra.gmra.mrb[48].mxu0 %v9311_v1 }
 0xced   :  { %7937 = vmatprep.mubr.msk.bf16.mxu0 %vm9313_vm1, %v9312_v26 }
 0xd7b   :  { %v3232_v6 = vpop.f32.mrb[32].mxu0  ;;  %v3275_v61 = vpop.f32.mrb[32].mxu1 }
 0xd7c   :  { %v8161_v32 = vadd.f32 %v3232_v6, %v10577_v33  ;;  %v3234_v31 = vpop.f32.mrb[33].mxu0  ;;  %v3277_v3 = vpop.f32.mrb[33].mxu1  ;;  %v8169_v41 = vadd.f32 %v3275_v61, %v10597_v4 }
 0xd7d   :  { %v8162_v7 = vadd.f32 %v3234_v31, %v10581_v35  ;;  %v3236_v52 = vpop.f32.mrb[34].mxu0  ;;  %v3279_v30 = vpop.f32.mrb[34].mxu1  ;;  %v8170_v15 = vadd.f32 %v3277_v3, %v10601_v39 }
 0xd7e   :  { %v7277_v60 = vmul.f32 -1.442695, %v8161_v32  ;;  %v8163_v56 = vadd.f32 %v3236_v52, %v10577_v33  ;;  %v3238_v57 = vpop.f32.mrb[35].mxu0  ;;  %v3281_v58 = vpop.f32.mrb[35].mxu1  ;;  %v8171_v33 = vadd.f32 %v3279_v30, %v10597_v4 }
 0xd7f   :  { %v7279_v8 = vmul.f32 -1.442695, %v8162_v7  ;;  %v8164_v45 = vadd.f32 %v3238_v57, %v10581_v35  ;;  %v7281_v44 = vmul.f32 -1.442695, %v8170_v15  ;;  %v8172_v16 = vadd.f32 %v3281_v58, %v10601_v39 }
 0xd80   :  { %8894 = vpow2.f32 %v7277_v60  ;;  %v7278_v27 = vmul.f32 -1.442695, %v8163_v56 }
 0xd81   :  { %8896 = vpow2.f32 %v7279_v8  ;;  %v7280_v34 = vmul.f32 -1.442695, %v8164_v45  ;;  %v7282_v35 = vmul.f32 -1.442695, %v8172_v16  ;;  %v3436_v16 = vld [vmem:[#allocation5 + $0x68] sm:$0xff] }
 0xd82   :  { %8898 = vpow2.f32 %v7278_v27 }
 0xd83   :  { %8900 = vpow2.f32 %v7280_v34 }
 0xd84   :  { %8902 = vtanh.f32 %v8169_v41 }
 0xd85   :  { %8904 = vpow2.f32 %v7281_v44  ;;  %v3432_v44 = vld [vmem:[#allocation5 + $0x48] sm:$0xff] }
 0xd86   :  { %8906 = vtanh.f32 %v8171_v33 }
 0xd8a   :  { %v8895_v28 = vpop.eup %8894 }
 0xd8b   :  { %v8897_v5 = vpop.eup %8896  ;;  %v3298_v18 = vadd.f32 1.0, %v8895_v28  ;;  %v7294_v28 = vcombine.high %v3432_v44, %v3436_v16 }
 0xd8c   :  { %v3310_v22 = vadd.f32 1.0, %v8897_v5  ;;  %v8899_v11 = vpop.eup %8898  ;;  %v3440_v5 = vld [vmem:[#allocation5 + $0x88] sm:$0xff] }
 0xd8d   :  { %8908 = vrcp.f32 %v3298_v18  ;;  %v3299_v20 = vadd.f32 1.0, %v8899_v11  ;;  %v8901_v13 = vpop.eup %8900  ;;  %v3444_v18 = vld [vmem:[#allocation5 + $0xa8] sm:$0xff] }
 0xd8e   :  { %8910 = vrcp.f32 %v3310_v22  ;;  %v3311_v9 = vadd.f32 1.0, %v8901_v13  ;;  %v8903_v39 = vpop.eup %8902  ;;  %v3448_v22 = vld [vmem:[#allocation5 + $0xc8] sm:$0xff] }
 0xd8f   :  { %8912 = vpow2.f32 %v7282_v35  ;;  %v8905_v0 = vpop.eup %8904  ;;  %v7302_v35 = vcombine.high %v3440_v5, %v3444_v18  ;;  %v3452_v11 = vld [vmem:[#allocation5 + $0xe8] sm:$0xff] }
 0xd90   :  { %8914 = vrcp.f32 %v3299_v20  ;;  %v8907_v4 = vpop.eup %8906  ;;  %v3324_v31 = vadd.f32 1.0, %v8905_v0  ;;  %v7301_v20 = vcombine.low %v3440_v5, %v3444_v18  ;;  %v7310_v13 = vcombine.high %v3448_v22, %v3452_v11  ;;  %v10764_v5 = vld [vmem:[%s11737_s13 + $0x18] sm:$0xff]   ;;  %v10771_v18 = vld [vmem:[%s11737_s13 + $0x20] sm:$0xff]  }
 0xd91   :  { %8916 = vrcp.f32 %v3311_v9  ;;  %v3426_v9 = vld [vmem:[#allocation5 + $0x18] sm:$0xff]  ;;  %v7309_v0 = vcombine.low %v3448_v22, %v3452_v11 }
 0xd92   :  { %8918 = vrcp.f32 %v3324_v31  ;;  %v10791_v22 = vld [vmem:[%s11737_s13 + $0x38] sm:$0xff]  }
 0xd97   :  { %v8909_v6 = vpop.eup %8908 }
 0xd98   :  { %v8911_v61 = vpop.eup %8910  ;;  %v3332_v32 = vmul.f32 %v8909_v6, %v8903_v39  ;;  %v3430_v39 = vld [vmem:[#allocation5 + $0x38] sm:$0xff] }
 0xd99   :  { %v8913_v3 = vpop.eup %8912  ;;  %v3330_v7 = vmul.f32 %v8911_v61, %v10607_v37  ;;  %v3434_v6 = vld [vmem:[#allocation5 + $0x58] sm:$0xff]  ;;  %v7289_v23 = vcombine.low %v3426_v9, %v3430_v39 }
 0xd9a   :  { %v8915_v52 = vpop.eup %8914  ;;  %v3325_v57 = vadd.f32 1.0, %v8913_v3  ;;  %v3442_v61 = vld [vmem:[#allocation5 + $0x98] sm:$0xff]  ;;  %v7297_v31 = vcombine.low %v3434_v6, %v3438_v12 }
 0xd9b   :  { %v3334_v30 = vadd.f32 %v3332_v32, %v3330_v7  ;;  %v3333_v60 = vmul.f32 %v8915_v52, %v8907_v4  ;;  %v8917_v56 = vpop.eup %8916  ;;  %v7290_v4 = vcombine.high %v3426_v9, %v3430_v39  ;;  %v3446_v32 = vld [vmem:[#allocation5 + $0xb8] sm:$0xff]  ;;  %v10801_v39 = vld [vmem:[#allocation7] sm:$0xff] }
 0xd9c   :  { %v3331_v58 = vmul.f32 %v8917_v56, %v10610_v25  ;;  %v8919_v45 = vpop.eup %8918  ;;  %v7293_v25 = vcombine.low %v3432_v44, %v3436_v16  ;;  %v7306_v3 = vcombine.high %v3442_v61, %v3446_v32  ;;  %v3450_v7 = vld [vmem:[#allocation5 + $0xd8] sm:$0xff] }
 0xd9d   :  { %8920 = vtanh.f32 %v3334_v30  ;;  %v3454_v52 = vld [vmem:[#allocation5 + $0xf8] sm:$0xff]  ;;  %v7305_v30 = vcombine.low %v3442_v61, %v3446_v32 }
 0xd9e   :  { %v3335_v8 = vadd.f32 %v3333_v60, %v3331_v58  ;;  %8922 = vrcp.f32 %v3325_v57  ;;  %v7314_v60 = vcombine.high %v3450_v7, %v3454_v52  ;;  %v7313_v56 = vcombine.low %v3450_v7, %v3454_v52  ;;  %v8544_v57 = vld [vmem:[#allocation10 + $0xc] ss:$16 sps:$4 sm:$0xff]   ;;  %v8542_v58 = vld [vmem:[#allocation10 + $0x8] ss:$16 sps:$4 sm:$0xff]  }
 0xda0   :  { %8924 = vtanh.f32 %v3335_v8  ;;  %v8547_v8 = vld [vmem:[#allocation10 + $0x2c] ss:$16 sps:$4 sm:$0xff]  }
 0xda7   :  { %v8921_v27 = vpop.eup %8920 }
 0xda8   :  { %v3338_v34 = vmul.f32 %v8921_v27, %v8919_v45  ;;  %v8923_v15 = vpop.eup %8922  ;;  %v8545_v45 = vld [vmem:[#allocation10 + $0x28] ss:$16 sps:$4 sm:$0xff]   ;;  %v8550_v27 = vld [vmem:[#allocation10 + $0x4c] ss:$16 sps:$4 sm:$0xff]  }
 0xdaa   :  { %v8925_v41 = vpop.eup %8924 }
 0xdab   :  { %v3339_v37 = vmul.f32 %v8925_v41, %v8923_v15  ;;  %v8553_v15 = vld [vmem:[#allocation10 + $0x6c] ss:$16 sps:$4 sm:$0xff]   ;;  %v8551_v41 = vld [vmem:[#allocation10 + $0x68] ss:$16 sps:$4 sm:$0xff]  }
 0xdad   :  { %v3340_v33 = vpack.c.bf16 %v3339_v37, %v3338_v34  ;;  %v8548_v34 = vld [vmem:[#allocation10 + $0x48] ss:$16 sps:$4 sm:$0xff]   ;;  %v10743_v37 = vld [vmem:[%s11737_s13] sm:$0xff]  }
 0xdae   :  { %7922 = vmatpush3.bf16.msra.mxu0 %v10743_v37 }
 0xdaf   :  { %7918 = vmatmul.mubr.bf16.vlgmr.msra.gmra.mrb[44].mxu1 %v3340_v33  ;;  %7923 = vmatprep.subr.bf16.mxu0 %v9312_v26  ;;  %v10750_v33 = vld [vmem:[%s11737_s13 + $0x8] sm:$0xff]  }
 0xdb0   :  { %3719 = vmatpush1.bf16.msra.mxu1 %v7285_v63  ;;  %3750 = vmatprep.mubr.bf16.mxu1 %v9311_v1  ;;  %v7298_v63 = vcombine.high %v3434_v6, %v3438_v12 }
 0xdb1   :  { %3720 = vmatprep.subr.bf16.mxu1 %v7294_v28  ;;  %v10757_v28 = vld [vmem:[%s11737_s13 + $0x10] sm:$0xff]  }
 0xdb2   :  { %7924 = vmatpush3.bf16.msra.mxu0 %v10750_v33 }
 0xdb3   :  { %7925 = vmatprep.subr.bf16.mxu0 %v9312_v26 }
 0xdb4   :  { %3721 = vmatpush1.bf16.msra.mxu1 %v7293_v25  ;;  %v10777_v25 = vld [vmem:[%s11737_s13 + $0x28] sm:$0xff]  }
 0xdb5   :  { %3722 = vmatprep.subr.bf16.mxu1 %v7302_v35  ;;  %v10784_v35 = vld [vmem:[%s11737_s13 + $0x30] sm:$0xff]  }
 0xdb6   :  { %7926 = vmatpush3.bf16.msra.mxu0 %v10757_v28 }
 0xdb7   :  { %7927 = vmatprep.subr.bf16.mxu0 %v9312_v26 }
 0xdb8   :  { %3723 = vmatpush1.bf16.msra.mxu1 %v7301_v20 }
 0xdb9   :  { %3724 = vmatprep.subr.bf16.mxu1 %v7310_v13 }
 0xdba   :  { %7928 = vmatpush3.bf16.msra.mxu0 %v10764_v5 }
 0xdbb   :  { %7929 = vmatprep.subr.bf16.mxu0 %v9312_v26 }
 0xdbc   :  { %3725 = vmatpush1.bf16.msra.mxu1 %v7309_v0  ;;  %v10805_v0 = vrot.slane %v10801_v39, %v9653_v36 }
 0xdbd   :  { %3824 = vmatprep.subr.bf16.mxu1 %v7290_v4  ;;  %v10809_v4 = vrot.slane %v10801_v39, %v9661_v38 }
 0xdbe   :  { %7930 = vmatpush3.bf16.msra.mxu0 %v10771_v18 }
 0xdbf   :  { %7317 = vmatmul.mubr.msk.bf16.vlgmr.msra.gmra.mrb[48].mxu1 %vm366_vm0, %v10653_v53  ;;  %7931 = vmatprep.subr.bf16.mxu0 %v9312_v26 }
 0xdc0   :  { %3825 = vmatpush1.bf16.msra.mxu1 %v7289_v23  ;;  %3760 = vmatprep.mubr.bf16.mxu1 %v9311_v1 }
 0xdc1   :  { %3826 = vmatprep.subr.bf16.mxu1 %v7298_v63 }
 0xdc2   :  { %7932 = vmatpush3.bf16.msra.mxu0 %v10777_v25 }
 0xdc3   :  { %7933 = vmatprep.subr.bf16.mxu0 %v9312_v26 }
 0xdc4   :  { %3827 = vmatpush1.bf16.msra.mxu1 %v7297_v31 }
 0xdc5   :  { %3828 = vmatprep.subr.bf16.mxu1 %v7306_v3 }
 0xdc6   :  { %7934 = vmatpush3.bf16.msra.mxu0 %v10784_v35 }
 0xdc7   :  { %7318 = vmatmul.mubr.msk.bf16.gmra.mrb[52].mxu1 %vm366_vm0, %v10664_v2  ;;  %7935 = vmatprep.subr.bf16.mxu0 %v9312_v26 }
 0xdc8   :  { %3829 = vmatpush1.bf16.msra.mxu1 %v7305_v30  ;;  %3856 = vmatprep.mubr.bf16.mxu1 %v9311_v1 }
 0xdc9   :  { %3830 = vmatprep.subr.bf16.mxu1 %v7314_v60 }
 0xdca   :  { %7936 = vmatpush3.bf16.msra.mxu0 %v10791_v22 }
 0xdcb   :  { %4225 = vmatprep.subr.bf16.mxu0 %v10669_v10 }
 0xdcc   :  { %3831 = vmatpush1.bf16.msra.mxu1 %v7313_v56  ;;  %v10817_v56 = vrot.slane %v10801_v39, %v9677_v50 }
 0xdcd   :  { %4016 = vmatprep.subr.bf16.mxu1 %v8544_v57 }
 0xdcf   :  { %7321 = vmatmul.mubr.msk.bf16.vlgmr.msra.gmra.mrb[56].mxu1 %vm366_vm0, %v10653_v53  ;;  %v4007_v53 = vpop.f32.mrb[48].mxu0 }
 0xdd0   :  { %4017 = vmatpush1.bf16.msra.mxu1 %v8542_v58  ;;  %3866 = vmatprep.mubr.bf16.mxu1 %v9311_v1  ;;  %v8177_v10 = vadd.f32 %v4007_v53, %v10805_v0 }
 0xdd1   :  { %4018 = vmatprep.subr.bf16.mxu1 %v8547_v8 }
 0xdd2   :  { %v7339_v23 = vmul.f32 -1.442695, %v8177_v10 }
 0xdd4   :  { %4019 = vmatpush1.bf16.msra.mxu1 %v8545_v45  ;;  %8926 = vpow2.f32 %v7339_v23 }
 0xdd5   :  { %4020 = vmatprep.subr.bf16.mxu1 %v8550_v27 }
 0xdd7   :  { %7322 = vmatmul.mubr.msk.bf16.gmra.mrb[60].mxu1 %vm366_vm0, %v10664_v2  ;;  %v4009_v2 = vpop.f32.mrb[49].mxu0 }
 0xdd8   :  { %4021 = vmatpush1.bf16.msra.mxu1 %v8548_v34  ;;  %4048 = vmatprep.mubr.bf16.mxu1 %v9311_v1  ;;  %v4011_v44 = vpop.f32.mrb[50].mxu0  ;;  %v8178_v6 = vadd.f32 %v4009_v2, %v10809_v4 }
 0xdd9   :  { %4022 = vmatprep.subr.bf16.mxu1 %v8553_v15  ;;  %v4013_v16 = vpop.f32.mrb[51].mxu0  ;;  %v8179_v63 = vadd.f32 %v4011_v44, %v10805_v0 }
 0xdda   :  { %v8180_v12 = vadd.f32 %v4013_v16, %v10809_v4 }
 0xddb   :  { %v7340_v32 = vmul.f32 -1.442695, %v8179_v63 }
 0xddc   :  { %4023 = vmatpush1.bf16.msra.mxu1 %v8551_v41  ;;  %v7342_v61 = vmul.f32 -1.442695, %v8180_v12 }
 0xddd   :  { %4268 = vmatprep.subr.bf16.mxu1 %v8544_v57 }
 0xdde   :  { %v8927_v31 = vpop.eup %8926 }
 0xddf   :  { %4049 = vmatmul.mubr.bf16.vlgmr.msra.gmra.mrb[48].mxu1 %v9311_v1  ;;  %v4073_v52 = vadd.f32 1.0, %v8927_v31 }
 0xde0   :  { %4269 = vmatpush1.bf16.msra.mxu1 %v8542_v58  ;;  %4300 = vmatprep.mubr.bf16.mxu1 %v9311_v1  ;;  %v10821_v58 = vrot.slane %v10801_v39, %v9672_v42 }
 0xde1   :  { %4270 = vmatprep.subr.bf16.mxu1 %v8547_v8 }
 0xde4   :  { %4271 = vmatpush1.bf16.msra.mxu1 %v8545_v45 }
 0xde5   :  { %4272 = vmatprep.subr.bf16.mxu1 %v8550_v27 }
 0xde8   :  { %4273 = vmatpush1.bf16.msra.mxu1 %v8548_v34 }
 0xde9   :  { %4274 = vmatprep.subr.bf16.mxu1 %v8553_v15 }
 0xdec   :  { %4275 = vmatpush1.bf16.msra.mxu1 %v8551_v41 }
 0xded   :  { %7941 = vmatprep.subr.bf16.mxu1 %v9312_v26 }
 0xe82   :  { %v3375_v11 = vpop.f32.mrb[44].mxu1 }
 0xe83   :  { %3386 = vrot.lane.b32.xlu0 %v3375_v11, %s9314_s30  ;;  %v7919_v20 = vpop.f32.mrb[45].mxu1 }
 0xe84   :  { %v10797_v13 = vpop.f32.mrb[46].mxu1 }
 0xe85   :  { %v7920_v9 = vpop.f32.mrb[47].mxu1 }
 0xe87   :  { %3390 = vrot.lane.b32.xlu0 %v10621_v43, %s9314_s30  ;;  %v7341_v43 = vmul.f32 -1.442695, %v8178_v6 }
 0xe89   :  { %8928 = vpow2.f32 %v7341_v43 }
 0xe8a   :  { %8930 = vpow2.f32 %v7342_v61 }
 0xe8b   :  { %8932 = vpow2.f32 %v7340_v32 }
 0xe8c   :  { %8934 = vrcp.f32 %v4073_v52 }
 0xe93   :  { %v8929_v3 = vpop.eup %8928 }
 0xe94   :  { %v8931_v7 = vpop.eup %8930  ;;  %v4085_v60 = vadd.f32 1.0, %v8929_v3 }
 0xe95   :  { %v8933_v30 = vpop.eup %8932  ;;  %v4086_v57 = vadd.f32 1.0, %v8931_v7 }
 0xe96   :  { %v4074_v8 = vadd.f32 1.0, %v8933_v30  ;;  %8936 = vrcp.f32 %v4085_v60  ;;  %v8935_v20 = vpop.eup %8934 }
 0xe97   :  { %8938 = vrcp.f32 %v4086_v57 }
 0xea0   :  { %v8937_v9 = vpop.eup %8936 }
 0xea1   :  { %v8939_v10 = vpop.eup %8938  ;;  %v4105_v23 = vmul.f32 0.0, %v8937_v9 }
 0xea2   :  { %v4106_v32 = vmul.f32 0.0, %v8939_v10 }
 0xeb2   :  { %v4050_v45 = vpop.f32.mrb[48].mxu1 }
 0xeb3   :  { %v8185_v27 = vadd.f32 %v4050_v45, %v10817_v56  ;;  %v4052_v34 = vpop.f32.mrb[49].mxu1 }
 0xeb4   :  { %v8186_v15 = vadd.f32 %v4052_v34, %v10821_v58  ;;  %v4054_v41 = vpop.f32.mrb[50].mxu1 }
 0xeb5   :  { %8940 = vtanh.f32 %v8185_v27  ;;  %v8187_v53 = vadd.f32 %v4054_v41, %v10817_v56  ;;  %v4056_v2 = vpop.f32.mrb[51].mxu1 }
 0xeb6   :  { %8942 = vrcp.f32 %v4074_v8  ;;  %v7343_v44 = vmul.f32 -1.442695, %v8186_v15  ;;  %v8188_v16 = vadd.f32 %v4056_v2, %v10821_v58 }
 0xeb7   :  { %8944 = vtanh.f32 %v8187_v53  ;;  %v10841_v53 = vld [vmem:[#allocation10 + $0x84] ss:$16 sps:$4 sm:$0xff]  }
 0xeb8   :  { %8946 = vpow2.f32 %v7343_v44  ;;  %v7344_v11 = vmul.f32 -1.442695, %v8188_v16  ;;  %v10868_v16 = vld [vmem:[#allocation10 + $0xc0] ss:$16 sps:$4 sm:$0xff]  }
 0xeba   :  { %8948 = vpow2.f32 %v7344_v11  ;;  %v10871_v11 = vld [vmem:[#allocation10 + $0xe4] ss:$16 sps:$4 sm:$0xff]  }
 0xebf   :  { %v8941_v6 = vpop.eup %8940 }
 0xec0   :  { %v8943_v12 = vpop.eup %8942  ;;  %v4107_v63 = vmul.f32 %v8941_v6, %v8935_v20 }
 0xec1   :  { %v8945_v43 = vpop.eup %8944 }
 0xec2   :  { %v8947_v61 = vpop.eup %8946  ;;  %v10827_v31 = vadd.f32 %v4107_v63, %v4105_v23  ;;  %v4108_v3 = vmul.f32 %v8945_v43, %v8943_v12 }
 0xec3   :  { %v4099_v7 = vadd.f32 1.0, %v8947_v61 }
 0xec4   :  { %v8949_v52 = vpop.eup %8948  ;;  %8950 = vtanh.f32 %v10827_v31  ;;  %v10830_v30 = vadd.f32 %v4108_v3, %v4106_v32 }
 0xec5   :  { %8952 = vrcp.f32 %v4099_v7  ;;  %v4100_v60 = vadd.f32 1.0, %v8949_v52 }
 0xec6   :  { %8954 = vtanh.f32 %v10830_v30 }
 0xec7   :  { %8956 = vrcp.f32 %v4100_v60 }
 0xece   :  { %v8951_v57 = vpop.eup %8950 }
 0xecf   :  { %v8953_v8 = vpop.eup %8952 }
 0xed0   :  { %v8955_v45 = vpop.eup %8954  ;;  %v4113_v34 = vmul.f32 %v8953_v8, %v8951_v57 }
 0xed1   :  { %v8957_v27 = vpop.eup %8956 }
 0xed2   :  { %v4114_v15 = vmul.f32 %v8957_v27, %v8955_v45 }
 0xed4   :  { %v4131_v41 = vpack.c.bf16 %v4114_v15, %v4113_v34 }
 0xed6   :  { %7938 = vmatmul.mubr.bf16.vlgmr.msra.gmra.mrb[64].mxu0 %v4131_v41 }
 0xed7   :  { %4226 = vmatpush1.bf16.msra.mxu0 %v10671_v40  ;;  %4257 = vmatprep.mubr.bf16.mxu0 %v9311_v1 }
 0xed8   :  { %4227 = vmatprep.subr.bf16.mxu0 %v10679_v54  ;;  %v10848_v54 = vld [vmem:[#allocation10 + $0x80] ss:$16 sps:$4 sm:$0xff]  }
 0xedb   :  { %4228 = vmatpush1.bf16.msra.mxu0 %v10677_v24 }
 0xedc   :  { %4229 = vmatprep.subr.bf16.mxu0 %v10682_v17 }
 0xedf   :  { %4230 = vmatpush1.bf16.msra.mxu0 %v10694_v29  ;;  %v10852_v29 = vld [vmem:[#allocation10 + $0xa4] ss:$16 sps:$4 sm:$0xff]  }
 0xee0   :  { %4231 = vmatprep.subr.bf16.mxu0 %v10697_v59  ;;  %v10857_v59 = vld [vmem:[#allocation10 + $0xa0] ss:$16 sps:$4 sm:$0xff]  }
 0xee3   :  { %4232 = vmatpush1.bf16.msra.mxu0 %v10702_v51  ;;  %v10861_v51 = vld [vmem:[#allocation10 + $0xc4] ss:$16 sps:$4 sm:$0xff]  }
 0xee4   :  { %4506 = vmatprep.subr.bf16.mxu0 %v10841_v53 }
 0xfa9   :  { %v10844_v2 = vpop.f32.mrb[64].mxu0 }
 0xfaa   :  { %v7939_v40 = vpop.f32.mrb[65].mxu0 }
 0xfab   :  { %v10846_v44 = vpop.f32.mrb[66].mxu0 }
 0xfac   :  { %v4221_v24 = vpack.c.bf16 %v10846_v44, %v10844_v2  ;;  %v7940_v17 = vpop.f32.mrb[67].mxu0 }
 0xfae   :  { %7353 = vmatmul.mubr.msk.bf16.vlgmr.msra.gmra.mrb[52].mxu0 %vm366_vm0, %v4221_v24  ;;  %7354 = vmatmul.mubr.msk.bf16.vlgmr.msra.gmra.mrb[52].mxu1 %vm366_vm0, %v4221_v24 }
 0xfaf   :  { %4507 = vmatpush1.bf16.msra.mxu0 %v10848_v54  ;;  %4538 = vmatprep.mubr.bf16.mxu0 %v9311_v1 }
 0xfb0   :  { %4508 = vmatprep.subr.bf16.mxu0 %v10852_v29  ;;  %7942 = vmatpush3.bf16.msra.mxu1 %v10743_v37  ;;  %v10876_v37 = vld [vmem:[#allocation10 + $0xe0] ss:$16 sps:$4 sm:$0xff]  }
 0xfb1   :  { %7943 = vmatprep.subr.bf16.mxu1 %v9312_v26  ;;  %7957 = vmatprep.mubr.msk.bf16.mxu1 %vm9313_vm1, %v9312_v26 }
 0xfb3   :  { %4509 = vmatpush1.bf16.msra.mxu0 %v10857_v59 }
 0xfb4   :  { %4510 = vmatprep.subr.bf16.mxu0 %v10861_v51  ;;  %7944 = vmatpush3.bf16.msra.mxu1 %v10750_v33  ;;  %v10895_v33 = vld [vmem:[#allocation10 + $0x8c] ss:$16 sps:$4 sm:$0xff]  }
 0xfb5   :  { %7945 = vmatprep.subr.bf16.mxu1 %v9312_v26 }
 0xfb7   :  { %4511 = vmatpush1.bf16.msra.mxu0 %v10868_v16 }
 0xfb8   :  { %4512 = vmatprep.subr.bf16.mxu0 %v10871_v11  ;;  %7946 = vmatpush3.bf16.msra.mxu1 %v10757_v28 }
 0xfb9   :  { %7947 = vmatprep.subr.bf16.mxu1 %v9312_v26 }
 0xfbb   :  { %4513 = vmatpush1.bf16.msra.mxu0 %v10876_v37 }
 0xfbc   :  { %7948 = vmatpush3.bf16.msra.mxu1 %v10764_v5  ;;  %7961 = vmatprep.subr.bf16.mxu0 %v9312_v26 }
 0xfbd   :  { %7949 = vmatprep.subr.bf16.mxu1 %v9312_v26 }
 0xfbe   :  { %4539 = vmatmul.mubr.bf16.vlgmr.msra.gmra.mrb[60].mxu0 %v9311_v1 }
 0xfbf   :  { %7977 = vmatprep.mubr.msk.bf16.mxu0 %vm9313_vm1, %v9312_v26 }
 0xfc0   :  { %7950 = vmatpush3.bf16.msra.mxu1 %v10771_v18 }
 0xfc1   :  { %7951 = vmatprep.subr.bf16.mxu1 %v9312_v26 }
 0xfc4   :  { %7952 = vmatpush3.bf16.msra.mxu1 %v10777_v25 }
 0xfc5   :  { %7953 = vmatprep.subr.bf16.mxu1 %v9312_v26 }
 0xfc8   :  { %7954 = vmatpush3.bf16.msra.mxu1 %v10784_v35 }
 0xfc9   :  { %7955 = vmatprep.subr.bf16.mxu1 %v9312_v26 }
 0xfcc   :  { %7956 = vmatpush3.bf16.msra.mxu1 %v10791_v22 }
 0xfcd   :  { %4549 = vmatprep.subr.bf16.mxu1 %v10895_v33 }
0x1081   :  { %v4259_v28 = vpop.f32.mrb[52].mxu0  ;;  %v4302_v5 = vpop.f32.mrb[52].mxu1 }
0x1082   :  { %v8181_v18 = vadd.f32 %v4259_v28, %v10805_v0  ;;  %v4261_v20 = vpop.f32.mrb[53].mxu0  ;;  %v4304_v9 = vpop.f32.mrb[53].mxu1  ;;  %v8189_v7 = vadd.f32 %v4302_v5, %v10817_v56 }
0x1083   :  { %v8182_v25 = vadd.f32 %v4261_v20, %v10809_v4  ;;  %v4263_v10 = vpop.f32.mrb[54].mxu0  ;;  %v4306_v6 = vpop.f32.mrb[54].mxu1  ;;  %v8190_v3 = vadd.f32 %v4304_v9, %v10821_v58 }
0x1084   :  { %v7355_v12 = vmul.f32 -1.442695, %v8181_v18  ;;  %v8183_v35 = vadd.f32 %v4263_v10, %v10805_v0  ;;  %v4265_v23 = vpop.f32.mrb[55].mxu0  ;;  %v4308_v63 = vpop.f32.mrb[55].mxu1  ;;  %v8191_v0 = vadd.f32 %v4306_v6, %v10817_v56 }
0x1085   :  { %v7357_v22 = vmul.f32 -1.442695, %v8182_v25  ;;  %v8184_v43 = vadd.f32 %v4265_v23, %v10809_v4  ;;  %v7359_v52 = vmul.f32 -1.442695, %v8190_v3  ;;  %v8192_v60 = vadd.f32 %v4308_v63, %v10821_v58 }
0x1086   :  { %8958 = vpow2.f32 %v7355_v12  ;;  %v7356_v61 = vmul.f32 -1.442695, %v8183_v35 }
0x1087   :  { %8960 = vpow2.f32 %v7357_v22  ;;  %v7358_v32 = vmul.f32 -1.442695, %v8184_v43  ;;  %v7360_v4 = vmul.f32 -1.442695, %v8192_v60 }
0x1088   :  { %8962 = vpow2.f32 %v7356_v61 }
0x1089   :  { %8964 = vpow2.f32 %v7358_v32 }
0x108a   :  { %8966 = vtanh.f32 %v8189_v7 }
0x108b   :  { %8968 = vpow2.f32 %v7359_v52 }
0x108c   :  { %8970 = vtanh.f32 %v8191_v0 }
0x1090   :  { %v8959_v57 = vpop.eup %8958 }
0x1091   :  { %v8961_v8 = vpop.eup %8960  ;;  %v4325_v45 = vadd.f32 1.0, %v8959_v57  ;;  %v10906_v27 = vpop.f32.mrb[60].mxu0 }
0x1092   :  { %v4337_v34 = vadd.f32 1.0, %v8961_v8  ;;  %v10908_v15 = vpop.f32.mrb[61].mxu0  ;;  %v8963_v41 = vpop.eup %8962  ;;  %v8574_v8 = vld [vmem:[#allocation10 + $0x88] ss:$16 sps:$4 sm:$0xff]  }
0x1093   :  { %8972 = vrcp.f32 %v4325_v45  ;;  %v10910_v40 = vpop.f32.mrb[62].mxu0  ;;  %v4326_v58 = vadd.f32 1.0, %v8963_v41  ;;  %v8965_v56 = vpop.eup %8964  ;;  %v8579_v45 = vld [vmem:[#allocation10 + $0xac] ss:$16 sps:$4 sm:$0xff]  }
0x1094   :  { %8974 = vrcp.f32 %v4337_v34  ;;  %v10912_v24 = vpop.f32.mrb[63].mxu0  ;;  %v4338_v17 = vadd.f32 1.0, %v8965_v56  ;;  %v8967_v28 = vpop.eup %8966  ;;  %v8582_v34 = vld [vmem:[#allocation10 + $0xcc] ss:$16 sps:$4 sm:$0xff]  }
0x1095   :  { %8976 = vpow2.f32 %v7360_v4  ;;  %v8969_v5 = vpop.eup %8968  ;;  %v8577_v4 = vld [vmem:[#allocation10 + $0xa8] ss:$16 sps:$4 sm:$0xff]   ;;  %v8585_v41 = vld [vmem:[#allocation10 + $0xec] ss:$16 sps:$4 sm:$0xff]  }
0x1096   :  { %8978 = vrcp.f32 %v4326_v58  ;;  %v8971_v18 = vpop.eup %8970  ;;  %v4351_v10 = vadd.f32 1.0, %v8969_v5  ;;  %v8583_v58 = vld [vmem:[#allocation10 + $0xe8] ss:$16 sps:$4 sm:$0xff]   ;;  %v10924_v56 = vld [vmem:[%s11737_s13 + $0x40] sm:$0xff]  }
0x1097   :  { %8980 = vrcp.f32 %v4338_v17  ;;  %7962 = vmatpush3.bf16.msra.mxu0 %v10924_v56  ;;  %v10938_v17 = vld [vmem:[%s11737_s13 + $0x50] sm:$0xff]   ;;  %v10952_v5 = vld [vmem:[%s11737_s13 + $0x60] sm:$0xff]  }
0x1098   :  { %8982 = vrcp.f32 %v4351_v10  ;;  %7963 = vmatprep.subr.bf16.mxu0 %v9312_v26  ;;  %v10983_v10 = vrot.slane %v10801_v39, %v9895_v55 }
0x109d   :  { %v8973_v20 = vpop.eup %8972 }
0x109e   :  { %v8975_v9 = vpop.eup %8974  ;;  %v4359_v25 = vmul.f32 %v8973_v20, %v8967_v28  ;;  %v10945_v28 = vld [vmem:[%s11737_s13 + $0x58] sm:$0xff]   ;;  %v10965_v20 = vld [vmem:[%s11737_s13 + $0x70] sm:$0xff]  }
0x109f   :  { %v8977_v6 = vpop.eup %8976  ;;  %v4357_v12 = vmul.f32 %v8975_v9, %v10827_v31  ;;  %v10972_v9 = vld [vmem:[%s11737_s13 + $0x78] sm:$0xff]  }
0x10a0   :  { %v8979_v35 = vpop.eup %8978  ;;  %v4352_v43 = vadd.f32 1.0, %v8977_v6 }
0x10a1   :  { %v4361_v23 = vadd.f32 %v4359_v25, %v4357_v12  ;;  %v4360_v63 = vmul.f32 %v8979_v35, %v8971_v18  ;;  %v8981_v22 = vpop.eup %8980  ;;  %v10958_v18 = vld [vmem:[%s11737_s13 + $0x68] sm:$0xff]   ;;  %v10979_v25 = vrot.slane %v10801_v39, %v9892_v47  ;;  %v8198_v12 = vadd.f32 %v10908_v15, %v10983_v10 }
0x10a2   :  { %v4358_v61 = vmul.f32 %v8981_v22, %v10830_v30  ;;  %v8983_v3 = vpop.eup %8982  ;;  %v8580_v30 = vld [vmem:[#allocation10 + $0xc8] ss:$16 sps:$4 sm:$0xff]   ;;  %v8200_v35 = vadd.f32 %v10912_v24, %v10983_v10 }
0x10a3   :  { %8984 = vtanh.f32 %v4361_v23  ;;  %v8197_v6 = vadd.f32 %v10906_v27, %v10979_v25 }
0x10a4   :  { %v4362_v32 = vadd.f32 %v4360_v63, %v4358_v61  ;;  %8986 = vrcp.f32 %v4352_v43  ;;  %v7379_v63 = vmul.f32 -1.442695, %v8198_v12  ;;  %v7380_v22 = vmul.f32 -1.442695, %v8200_v35 }
0x10a5   :  { %v7377_v23 = vmul.f32 -1.442695, %v8197_v6 }
0x10a6   :  { %8988 = vtanh.f32 %v4362_v32 }
0x10a7   :  { %8990 = vpow2.f32 %v7377_v23 }
0x10a8   :  { %8992 = vpow2.f32 %v7379_v63 }
0x10a9   :  { %8994 = vpow2.f32 %v7380_v22 }
0x10ad   :  { %v8985_v7 = vpop.eup %8984 }
0x10ae   :  { %v4365_v52 = vmul.f32 %v8985_v7, %v8983_v3  ;;  %v8987_v60 = vpop.eup %8986 }
0x10b0   :  { %v8989_v0 = vpop.eup %8988 }
0x10b1   :  { %v4366_v57 = vmul.f32 %v8989_v0, %v8987_v60  ;;  %v8991_v3 = vpop.eup %8990 }
0x10b2   :  { %v8993_v7 = vpop.eup %8992 }
0x10b3   :  { %v4367_v31 = vpack.c.bf16 %v4366_v57, %v4365_v52  ;;  %v8995_v24 = vpop.eup %8994  ;;  %v4606_v52 = vadd.f32 1.0, %v8991_v3  ;;  %v4618_v0 = vadd.f32 1.0, %v8993_v7 }
0x10b4   :  { %v4619_v57 = vadd.f32 1.0, %v8995_v24 }
0x10b5   :  { %7958 = vmatmul.mubr.bf16.vlgmr.msra.gmra.mrb[64].mxu1 %v4367_v31 }
0x10b6   :  { %4550 = vmatpush1.bf16.msra.mxu1 %v8574_v8  ;;  %4581 = vmatprep.mubr.bf16.mxu1 %v9311_v1 }
0x10b7   :  { %4551 = vmatprep.subr.bf16.mxu1 %v8579_v45 }
0x10ba   :  { %4552 = vmatpush1.bf16.msra.mxu1 %v8577_v4 }
0x10bb   :  { %4553 = vmatprep.subr.bf16.mxu1 %v8582_v34 }
0x10be   :  { %4554 = vmatpush1.bf16.msra.mxu1 %v8580_v30 }
0x10bf   :  { %4555 = vmatprep.subr.bf16.mxu1 %v8585_v41 }
0x10c2   :  { %4556 = vmatpush1.bf16.msra.mxu1 %v8583_v58 }
0x10c3   :  { %4802 = vmatprep.subr.bf16.mxu1 %v10895_v33  ;;  %v10931_v33 = vld [vmem:[%s11737_s13 + $0x48] sm:$0xff]  }
0x10c4   :  { %7964 = vmatpush3.bf16.msra.mxu0 %v10931_v33 }
0x10c5   :  { %4582 = vmatmul.mubr.bf16.vlgmr.msra.gmra.mrb[60].mxu1 %v9311_v1  ;;  %7965 = vmatprep.subr.bf16.mxu0 %v9312_v26 }
0x10c6   :  { %4803 = vmatpush1.bf16.msra.mxu1 %v8574_v8  ;;  %4834 = vmatprep.mubr.bf16.mxu1 %v9311_v1  ;;  %v11003_v8 = vrot.slane %v10801_v39, %v9921_v48 }
0x10c7   :  { %4804 = vmatprep.subr.bf16.mxu1 %v8579_v45 }
0x10c8   :  { %7966 = vmatpush3.bf16.msra.mxu0 %v10938_v17 }
0x10c9   :  { %7967 = vmatprep.subr.bf16.mxu0 %v9312_v26 }
0x10ca   :  { %4805 = vmatpush1.bf16.msra.mxu1 %v8577_v4 }
0x10cb   :  { %4806 = vmatprep.subr.bf16.mxu1 %v8582_v34 }
0x10cc   :  { %7968 = vmatpush3.bf16.msra.mxu0 %v10945_v28 }
0x10cd   :  { %7969 = vmatprep.subr.bf16.mxu0 %v9312_v26 }
0x10ce   :  { %4807 = vmatpush1.bf16.msra.mxu1 %v8580_v30 }
0x10cf   :  { %4808 = vmatprep.subr.bf16.mxu1 %v8585_v41 }
0x10d0   :  { %7970 = vmatpush3.bf16.msra.mxu0 %v10952_v5 }
0x10d1   :  { %7971 = vmatprep.subr.bf16.mxu0 %v9312_v26 }
0x10d2   :  { %4809 = vmatpush1.bf16.msra.mxu1 %v8583_v58 }
0x10d3   :  { %7981 = vmatprep.subr.bf16.mxu1 %v9312_v26 }
0x10d4   :  { %7972 = vmatpush3.bf16.msra.mxu0 %v10958_v18 }
0x10d5   :  { %7973 = vmatprep.subr.bf16.mxu0 %v9312_v26 }
0x10d8   :  { %7974 = vmatpush3.bf16.msra.mxu0 %v10965_v20 }
0x10d9   :  { %7975 = vmatprep.subr.bf16.mxu0 %v9312_v26 }
0x10dc   :  { %7976 = vmatpush3.bf16.msra.mxu0 %v10972_v9 }
0x10dd   :  { %4759 = vmatprep.subr.bf16.mxu0 %v10841_v53  ;;  %v8199_v53 = vadd.f32 %v10910_v40, %v10979_v25  ;;  %v10999_v40 = vrot.slane %v10801_v39, %v9918_v49 }
0x10df   :  { %v7378_v43 = vmul.f32 -1.442695, %v8199_v53 }
0x10e1   :  { %8996 = vpow2.f32 %v7378_v43 }
0x10e2   :  { %8998 = vrcp.f32 %v4606_v52 }
0x10e3   :  { %9000 = vrcp.f32 %v4618_v0 }
0x10e4   :  { %9002 = vrcp.f32 %v4619_v57 }
0x10eb   :  { %v8997_v60 = vpop.eup %8996 }
0x10ec   :  { %v4607_v31 = vadd.f32 1.0, %v8997_v60  ;;  %v8999_v23 = vpop.eup %8998 }
0x10ed   :  { %v9001_v53 = vpop.eup %9000 }
0x10ee   :  { %v9003_v63 = vpop.eup %9002 }
0x10ef   :  { %v4639_v24 = vmul.f32 0.0, %v9003_v63 }
0x1188   :  { %v10993_v61 = vpop.f32.mrb[64].mxu1 }
0x1189   :  { %v7959_v32 = vpop.f32.mrb[65].mxu1 }
0x118a   :  { %v10995_v27 = vpop.f32.mrb[66].mxu1  ;;  %v4638_v32 = vmul.f32 0.0, %v9001_v53 }
0x118b   :  { %v7960_v15 = vpop.f32.mrb[67].mxu1 }
0x1198   :  { %v4583_v45 = vpop.f32.mrb[60].mxu1 }
0x1199   :  { %v8205_v4 = vadd.f32 %v4583_v45, %v10999_v40  ;;  %v4585_v34 = vpop.f32.mrb[61].mxu1 }
0x119a   :  { %v8206_v30 = vadd.f32 %v4585_v34, %v11003_v8  ;;  %v4587_v41 = vpop.f32.mrb[62].mxu1 }
0x119b   :  { %9004 = vtanh.f32 %v8205_v4  ;;  %v8207_v58 = vadd.f32 %v4587_v41, %v10999_v40  ;;  %v4589_v6 = vpop.f32.mrb[63].mxu1 }
0x119c   :  { %9006 = vrcp.f32 %v4607_v31  ;;  %v7381_v12 = vmul.f32 -1.442695, %v8206_v30  ;;  %v8208_v39 = vadd.f32 %v4589_v6, %v11003_v8 }
0x119d   :  { %9008 = vtanh.f32 %v8207_v58 }
0x119e   :  { %9010 = vpow2.f32 %v7381_v12  ;;  %v7382_v35 = vmul.f32 -1.442695, %v8208_v39 }
0x11a0   :  { %9012 = vpow2.f32 %v7382_v35 }
0x11a5   :  { %v9005_v22 = vpop.eup %9004 }
0x11a6   :  { %v9007_v43 = vpop.eup %9006  ;;  %v4640_v15 = vmul.f32 %v9005_v22, %v8999_v23 }
0x11a7   :  { %v9009_v3 = vpop.eup %9008 }
0x11a8   :  { %v9011_v7 = vpop.eup %9010  ;;  %v11009_v52 = vadd.f32 %v4640_v15, %v4638_v32  ;;  %v4641_v60 = vmul.f32 %v9009_v3, %v9007_v43 }
0x11a9   :  { %v4632_v0 = vadd.f32 1.0, %v9011_v7 }
0x11aa   :  { %v9013_v57 = vpop.eup %9012  ;;  %9014 = vtanh.f32 %v11009_v52  ;;  %v11012_v31 = vadd.f32 %v4641_v60, %v4639_v24 }
0x11ab   :  { %9016 = vrcp.f32 %v4632_v0  ;;  %v4633_v45 = vadd.f32 1.0, %v9013_v57 }
0x11ac   :  { %9018 = vtanh.f32 %v11012_v31 }
0x11ad   :  { %9020 = vrcp.f32 %v4633_v45 }
0x11b4   :  { %v9015_v4 = vpop.eup %9014 }
0x11b5   :  { %v9017_v34 = vpop.eup %9016 }
0x11b6   :  { %v9019_v30 = vpop.eup %9018  ;;  %v4646_v58 = vmul.f32 %v9017_v34, %v9015_v4 }
0x11b7   :  { %v9021_v41 = vpop.eup %9020 }
0x11b8   :  { %v4647_v6 = vmul.f32 %v9021_v41, %v9019_v30 }
0x11ba   :  { %v4665_v12 = vpack.c.bf16 %v4647_v6, %v4646_v58 }
0x11bc   :  { %7978 = vmatmul.mubr.bf16.vlgmr.msra.gmra.mrb[68].mxu0 %v4665_v12 }
0x11bd   :  { %4760 = vmatpush1.bf16.msra.mxu0 %v10848_v54  ;;  %4791 = vmatprep.mubr.bf16.mxu0 %v9311_v1 }
0x11be   :  { %4761 = vmatprep.subr.bf16.mxu0 %v10852_v29 }
0x11c1   :  { %4762 = vmatpush1.bf16.msra.mxu0 %v10857_v59 }
0x11c2   :  { %4763 = vmatprep.subr.bf16.mxu0 %v10861_v51 }
0x11c5   :  { %4764 = vmatpush1.bf16.msra.mxu0 %v10868_v16 }
0x11c6   :  { %4765 = vmatprep.subr.bf16.mxu0 %v10871_v11 }
0x11c9   :  { %4766 = vmatpush1.bf16.msra.mxu0 %v10876_v37 }
0x128f   :  { %v11023_v39 = vpop.f32.mrb[68].mxu0 }
0x1290   :  { %v7979_v35 = vpop.f32.mrb[69].mxu0 }
0x1291   :  { %v11025_v23 = vpop.f32.mrb[70].mxu0 }
0x1292   :  { %v8397_v54 = vpack.i.bf16 %v11025_v23, %v11023_v39  ;;  %v4755_v29 = vpack.c.bf16 %v11025_v23, %v11023_v39  ;;  %v7980_v59 = vpop.f32.mrb[71].mxu0  ;;  %v4974_v39 = vld [vmem:[%s11734_s10 + $0x58] sm:$0xff] }
0x1294   :  { %7407 = vmatmul.mubr.msk.bf16.vlgmr.msra.gmra.mrb[56].mxu0 %vm366_vm0, %v4755_v29  ;;  %7408 = vmatmul.mubr.msk.bf16.vlgmr.msra.gmra.mrb[56].mxu1 %vm366_vm0, %v4755_v29 }
0x1295   :  { %7982 = vmatpush3.bf16.msra.mxu1 %v10924_v56  ;;  %7997 = vmatprep.mubr.msk.bf16.mxu1 %vm9313_vm1, %v9312_v26 }
0x1296   :  { %7983 = vmatprep.subr.bf16.mxu1 %v9312_v26  ;;  %5423 = vmatprep.mubr.bf16.mxu0 %v9311_v1 }
0x1299   :  { %7984 = vmatpush3.bf16.msra.mxu1 %v10931_v33 }
0x129a   :  { %7985 = vmatprep.subr.bf16.mxu1 %v9312_v26 }
0x129d   :  { %7986 = vmatpush3.bf16.msra.mxu1 %v10938_v17 }
0x129e   :  { %7987 = vmatprep.subr.bf16.mxu1 %v9312_v26 }
0x12a1   :  { %7988 = vmatpush3.bf16.msra.mxu1 %v10945_v28 }
0x12a2   :  { %7989 = vmatprep.subr.bf16.mxu1 %v9312_v26 }
0x12a5   :  { %7990 = vmatpush3.bf16.msra.mxu1 %v10952_v5 }
0x12a6   :  { %7991 = vmatprep.subr.bf16.mxu1 %v9312_v26 }
0x12a9   :  { %7992 = vmatpush3.bf16.msra.mxu1 %v10958_v18 }
0x12aa   :  { %7993 = vmatprep.subr.bf16.mxu1 %v9312_v26 }
0x12ad   :  { %7994 = vmatpush3.bf16.msra.mxu1 %v10965_v20 }
0x12ae   :  { %7995 = vmatprep.subr.bf16.mxu1 %v9312_v26 }
0x12b1   :  { %7996 = vmatpush3.bf16.msra.mxu1 %v10972_v9 }
0x1367   :  { %v4793_v51 = vpop.f32.mrb[56].mxu0  ;;  %v4836_v16 = vpop.f32.mrb[56].mxu1 }
0x1368   :  { %v8193_v11 = vadd.f32 %v4793_v51, %v10979_v25  ;;  %v4795_v37 = vpop.f32.mrb[57].mxu0  ;;  %v4838_v56 = vpop.f32.mrb[57].mxu1  ;;  %v8201_v15 = vadd.f32 %v4836_v16, %v10999_v40 }
0x1369   :  { %v8194_v33 = vadd.f32 %v4795_v37, %v10983_v10  ;;  %v4797_v17 = vpop.f32.mrb[58].mxu0  ;;  %v4840_v28 = vpop.f32.mrb[58].mxu1  ;;  %v8202_v32 = vadd.f32 %v4838_v56, %v11003_v8 }
0x136a   :  { %v7409_v5 = vmul.f32 -1.442695, %v8193_v11  ;;  %v8195_v18 = vadd.f32 %v4797_v17, %v10979_v25  ;;  %v4799_v53 = vpop.f32.mrb[59].mxu0  ;;  %v4842_v63 = vpop.f32.mrb[59].mxu1  ;;  %v8203_v25 = vadd.f32 %v4840_v28, %v10999_v40 }
0x136b   :  { %v7411_v20 = vmul.f32 -1.442695, %v8194_v33  ;;  %v8196_v22 = vadd.f32 %v4799_v53, %v10983_v10  ;;  %v7413_v3 = vmul.f32 -1.442695, %v8202_v32  ;;  %v8204_v7 = vadd.f32 %v4842_v63, %v11003_v8 }
0x136c   :  { %9022 = vpow2.f32 %v7409_v5  ;;  %v7410_v9 = vmul.f32 -1.442695, %v8195_v18 }
0x136d   :  { %9024 = vpow2.f32 %v7411_v20  ;;  %v7412_v43 = vmul.f32 -1.442695, %v8196_v22  ;;  %v7414_v10 = vmul.f32 -1.442695, %v8204_v7  ;;  %v4975_v7 = vld [vmem:[%s11734_s10 + $0x60] sm:$0xff] }
0x136e   :  { %9026 = vpow2.f32 %v7410_v9  ;;  %v4964_v9 = vld [vmem:[%s11734_s10 + $0x8] sm:$0xff] }
0x136f   :  { %9028 = vpow2.f32 %v7412_v43 }
0x1370   :  { %9030 = vtanh.f32 %v8201_v15  ;;  %v4968_v15 = vld [vmem:[%s11734_s10 + $0x28] sm:$0xff] }
0x1371   :  { %9032 = vpow2.f32 %v7413_v3  ;;  %v4971_v3 = vld [vmem:[%s11734_s10 + $0x40] sm:$0xff] }
0x1372   :  { %9034 = vtanh.f32 %v8203_v25  ;;  %v7417_v25 = vcombine.low %v4964_v9, %v4968_v15 }
0x1376   :  { %v9023_v24 = vpop.eup %9022 }
0x1377   :  { %v9025_v60 = vpop.eup %9024  ;;  %v4859_v0 = vadd.f32 1.0, %v9023_v24  ;;  %v7418_v24 = vcombine.high %v4964_v9, %v4968_v15  ;;  %v5011_v15 = vld [vmem:[%s11734_s10 + $0x180] sm:$0xff] }
0x1378   :  { %v4871_v57 = vadd.f32 1.0, %v9025_v60  ;;  %v9027_v45 = vpop.eup %9026  ;;  %v7424_v60 = vcombine.high %v4971_v3, %v4975_v7 }
0x1379   :  { %9036 = vrcp.f32 %v4859_v0  ;;  %v4860_v4 = vadd.f32 1.0, %v9027_v45  ;;  %v9029_v34 = vpop.eup %9028  ;;  %v4972_v0 = vld [vmem:[%s11734_s10 + $0x48] sm:$0xff]  ;;  %5444 = vmatprep.subr.bf16.mxu1 %v7418_v24 }
0x137a   :  { %9038 = vrcp.f32 %v4871_v57  ;;  %v4872_v30 = vadd.f32 1.0, %v9029_v34  ;;  %v9031_v8 = vpop.eup %9030  ;;  %v4979_v57 = vld [vmem:[%s11734_s10 + $0x80] sm:$0xff]  ;;  %v4980_v34 = vld [vmem:[%s11734_s10 + $0x88] sm:$0xff] }
0x137b   :  { %9040 = vpow2.f32 %v7414_v10  ;;  %v9033_v41 = vpop.eup %9032  ;;  %v4976_v10 = vld [vmem:[%s11734_s10 + $0x68] sm:$0xff] }
0x137c   :  { %9042 = vrcp.f32 %v4860_v4  ;;  %v9035_v40 = vpop.eup %9034  ;;  %v4885_v35 = vadd.f32 1.0, %v9033_v41  ;;  %v7426_v45 = vcombine.high %v4972_v0, %v4976_v10  ;;  %v4983_v4 = vld [vmem:[%s11734_s10 + $0xa0] sm:$0xff]  ;;  %v7425_v41 = vcombine.low %v4972_v0, %v4976_v10 }
0x137d   :  { %9044 = vrcp.f32 %v4872_v30  ;;  %v4984_v30 = vld [vmem:[%s11734_s10 + $0xa8] sm:$0xff] }
0x137e   :  { %9046 = vrcp.f32 %v4885_v35  ;;  %v4988_v35 = vld [vmem:[%s11734_s10 + $0xc8] sm:$0xff] }
0x1383   :  { %v9037_v58 = vpop.eup %9036 }
0x1384   :  { %v9039_v6 = vpop.eup %9038  ;;  %v4893_v12 = vmul.f32 %v9037_v58, %v9031_v8  ;;  %v7423_v8 = vcombine.low %v4971_v3, %v4975_v7  ;;  %v7434_v58 = vcombine.high %v4980_v34, %v4984_v30  ;;  %v5015_v3 = vld [vmem:[%s11734_s10 + $0x1a0] sm:$0xff]  ;;  %v5012_v7 = vld [vmem:[%s11734_s10 + $0x188] sm:$0xff] }
0x1385   :  { %v9041_v29 = vpop.eup %9040  ;;  %v4891_v59 = vmul.f32 %v9039_v6, %v11009_v52  ;;  %v4963_v52 = vld [vmem:[%s11734_s10] sm:$0xff]  ;;  %v7464_v0 = vcombine.high %v5011_v15, %v5015_v3 }
0x1386   :  { %v9043_v51 = vpop.eup %9042  ;;  %v4886_v56 = vadd.f32 1.0, %v9041_v29  ;;  %v4987_v6 = vld [vmem:[%s11734_s10 + $0xc0] sm:$0xff]  ;;  %v4992_v29 = vld [vmem:[%s11734_s10 + $0xe8] sm:$0xff] }
0x1387   :  { %v4895_v16 = vadd.f32 %v4893_v12, %v4891_v59  ;;  %v4894_v11 = vmul.f32 %v9043_v51, %v9035_v40  ;;  %v9045_v37 = vpop.eup %9044  ;;  %v7432_v40 = vcombine.high %v4979_v57, %v4983_v4  ;;  %v4991_v12 = vld [vmem:[%s11734_s10 + $0xe0] sm:$0xff]  ;;  %v7431_v59 = vcombine.low %v4979_v57, %v4983_v4 }
0x1388   :  { %v4892_v33 = vmul.f32 %v9045_v37, %v11012_v31  ;;  %v9047_v28 = vpop.eup %9046  ;;  %v4967_v31 = vld [vmem:[%s11734_s10 + $0x20] sm:$0xff]  ;;  %v7433_v51 = vcombine.low %v4980_v34, %v4984_v30  ;;  %v7463_v57 = vcombine.low %v5011_v15, %v5015_v3  ;;  %v5020_v30 = vld [vmem:[%s11734_s10 + $0x1c8] sm:$0xff] }
0x1389   :  { %9048 = vtanh.f32 %v4895_v16  ;;  %v7415_v43 = vcombine.low %v4963_v52, %v4967_v31  ;;  %v7416_v32 = vcombine.high %v4963_v52, %v4967_v31  ;;  %v7440_v16 = vcombine.high %v4987_v6, %v4991_v12  ;;  %v4995_v37 = vld [vmem:[%s11734_s10 + $0x100] sm:$0xff]  ;;  %v5008_v52 = vld [vmem:[%s11734_s10 + $0x168] sm:$0xff] }
0x138a   :  { %v4896_v17 = vadd.f32 %v4894_v11, %v4892_v33  ;;  %9050 = vrcp.f32 %v4886_v56  ;;  %v7442_v11 = vcombine.high %v4988_v35, %v4992_v29  ;;  %v4999_v56 = vld [vmem:[%s11734_s10 + $0x120] sm:$0xff]  ;;  %v4996_v33 = vld [vmem:[%s11734_s10 + $0x108] sm:$0xff] }
0x138b   :  { %5391 = vmatprep.subr.bf16.mxu0 %v7416_v32  ;;  %v7447_v31 = vcombine.low %v4995_v37, %v4999_v56  ;;  %v5019_v4 = vld [vmem:[%s11734_s10 + $0x1c0] sm:$0xff] }
0x138c   :  { %9052 = vtanh.f32 %v4896_v17  ;;  %5392 = vmatpush1.bf16.msra.mxu0 %v7415_v43  ;;  %v5000_v17 = vld [vmem:[%s11734_s10 + $0x128] sm:$0xff]  ;;  %v5023_v34 = vld [vmem:[%s11734_s10 + $0x1e0] sm:$0xff] }
0x138d   :  { %5393 = vmatprep.subr.bf16.mxu0 %v7424_v60  ;;  %v7449_v9 = vcombine.low %v4996_v33, %v5000_v17 }
0x1390   :  { %5394 = vmatpush1.bf16.msra.mxu0 %v7423_v8  ;;  %v7472_v8 = vcombine.high %v5019_v4, %v5023_v34 }
0x1391   :  { %5395 = vmatprep.subr.bf16.mxu0 %v7432_v40  ;;  %v7471_v40 = vcombine.low %v5019_v4, %v5023_v34  ;;  %v4989_v34 = vld [vmem:[%s11734_s10 + $0xd0] sm:$0xff] }
0x1393   :  { %v9049_v5 = vpop.eup %9048 }
0x1394   :  { %v4899_v18 = vmul.f32 %v9049_v5, %v9047_v28  ;;  %v9051_v53 = vpop.eup %9050  ;;  %5396 = vmatpush1.bf16.msra.mxu0 %v7431_v59  ;;  %v7439_v28 = vcombine.low %v4987_v6, %v4991_v12  ;;  %v7441_v5 = vcombine.low %v4988_v35, %v4992_v29  ;;  %v4965_v12 = vld [vmem:[%s11734_s10 + $0x10] sm:$0xff]  ;;  %v4966_v29 = vld [vmem:[%s11734_s10 + $0x18] sm:$0xff] }
0x1395   :  { %5397 = vmatprep.subr.bf16.mxu0 %v7440_v16  ;;  %v4969_v35 = vld [vmem:[%s11734_s10 + $0x30] sm:$0xff] }
0x1396   :  { %v9053_v63 = vpop.eup %9052  ;;  %v7420_v59 = vcombine.high %v4965_v12, %v4969_v35  ;;  %v7419_v16 = vcombine.low %v4965_v12, %v4969_v35 }
0x1397   :  { %v4900_v20 = vmul.f32 %v9053_v63, %v9051_v53  ;;  %v7450_v53 = vcombine.high %v4996_v33, %v5000_v17  ;;  %v5003_v63 = vld [vmem:[%s11734_s10 + $0x140] sm:$0xff] }
0x1398   :  { %5398 = vmatpush1.bf16.msra.mxu0 %v7439_v28 }
0x1399   :  { %v4901_v22 = vpack.c.bf16 %v4900_v20, %v4899_v18  ;;  %v7448_v18 = vcombine.high %v4995_v37, %v4999_v56  ;;  %v5007_v20 = vld [vmem:[%s11734_s10 + $0x160] sm:$0xff] }
0x139a   :  { %v7456_v43 = vcombine.high %v5003_v63, %v5007_v20  ;;  %v7455_v24 = vcombine.low %v5003_v63, %v5007_v20 }
0x139b   :  { %7998 = vmatmul.mubr.bf16.vlgmr.msra.gmra.mrb[68].mxu1 %v4901_v22  ;;  %v5004_v22 = vld [vmem:[%s11734_s10 + $0x148] sm:$0xff]  ;;  %5399 = vmatprep.subr.bf16.mxu0 %v7448_v18 }
0x139c   :  { %5476 = vmatprep.mubr.bf16.mxu1 %v9311_v1  ;;  %5445 = vmatpush1.bf16.msra.mxu1 %v7417_v25  ;;  %v7458_v32 = vcombine.high %v5004_v22, %v5008_v52  ;;  %v5016_v25 = vld [vmem:[%s11734_s10 + $0x1a8] sm:$0xff]  ;;  %v7457_v60 = vcombine.low %v5004_v22, %v5008_v52  ;;  %v4977_v22 = vld [vmem:[%s11734_s10 + $0x70] sm:$0xff] }
0x139d   :  { %5446 = vmatprep.subr.bf16.mxu1 %v7426_v45  ;;  %5400 = vmatpush1.bf16.msra.mxu0 %v7447_v31  ;;  %v7466_v10 = vcombine.high %v5012_v7, %v5016_v25  ;;  %v7465_v45 = vcombine.low %v5012_v7, %v5016_v25  ;;  %v4985_v7 = vld [vmem:[%s11734_s10 + $0xb0] sm:$0xff] }
0x139e   :  { %5401 = vmatprep.subr.bf16.mxu0 %v7456_v43 }
0x13a0   :  { %5447 = vmatpush1.bf16.msra.mxu1 %v7425_v41  ;;  %v5024_v41 = vld [vmem:[%s11734_s10 + $0x1e8] sm:$0xff] }
0x13a1   :  { %5448 = vmatprep.subr.bf16.mxu1 %v7434_v58  ;;  %5402 = vmatpush1.bf16.msra.mxu0 %v7455_v24  ;;  %v7473_v58 = vcombine.low %v5020_v30, %v5024_v41  ;;  %v7474_v6 = vcombine.high %v5020_v30, %v5024_v41  ;;  %v4993_v30 = vld [vmem:[%s11734_s10 + $0xf0] sm:$0xff]  ;;  %v4994_v41 = vld [vmem:[%s11734_s10 + $0xf8] sm:$0xff] }
0x13a2   :  { %5403 = vmatprep.subr.bf16.mxu0 %v7464_v0  ;;  %v7444_v12 = vcombine.high %v4989_v34, %v4993_v30 }
0x13a4   :  { %5449 = vmatpush1.bf16.msra.mxu1 %v7433_v51  ;;  %v4970_v51 = vld [vmem:[%s11734_s10 + $0x38] sm:$0xff] }
0x13a5   :  { %5450 = vmatprep.subr.bf16.mxu1 %v7442_v11  ;;  %5404 = vmatpush1.bf16.msra.mxu0 %v7463_v57  ;;  %v7421_v11 = vcombine.low %v4966_v29, %v4970_v51  ;;  %v7422_v37 = vcombine.high %v4966_v29, %v4970_v51  ;;  %v4997_v29 = vld [vmem:[%s11734_s10 + $0x110] sm:$0xff] }
0x13a6   :  { %5405 = vmatprep.subr.bf16.mxu0 %v7472_v8  ;;  %v4990_v8 = vld [vmem:[%s11734_s10 + $0xd8] sm:$0xff] }
0x13a7   :  { %v7446_v35 = vcombine.high %v4990_v8, %v4994_v41 }
0x13a8   :  { %5451 = vmatpush1.bf16.msra.mxu1 %v7441_v5 }
0x13a9   :  { %5452 = vmatprep.subr.bf16.mxu1 %v7450_v53  ;;  %5406 = vmatpush1.bf16.msra.mxu0 %v7471_v40  ;;  %v4973_v53 = vld [vmem:[%s11734_s10 + $0x50] sm:$0xff] }
0x13aa   :  { %5497 = vmatprep.subr.bf16.mxu0 %v7420_v59  ;;  %v7427_v25 = vcombine.low %v4973_v53, %v4977_v22 }
0x13ac   :  { %5453 = vmatpush1.bf16.msra.mxu1 %v7449_v9  ;;  %v7428_v9 = vcombine.high %v4973_v53, %v4977_v22  ;;  %v5010_v53 = vld [vmem:[%s11734_s10 + $0x178] sm:$0xff] }
0x13ad   :  { %5454 = vmatprep.subr.bf16.mxu1 %v7458_v32  ;;  %v4981_v32 = vld [vmem:[%s11734_s10 + $0x90] sm:$0xff] }
0x13b0   :  { %5455 = vmatpush1.bf16.msra.mxu1 %v7457_v60 }
0x13b1   :  { %5456 = vmatprep.subr.bf16.mxu1 %v7466_v10 }
0x13b4   :  { %5457 = vmatpush1.bf16.msra.mxu1 %v7465_v45  ;;  %v7436_v45 = vcombine.high %v4981_v32, %v4985_v7 }
0x13b5   :  { %5458 = vmatprep.subr.bf16.mxu1 %v7474_v6 }
0x13b8   :  { %5459 = vmatpush1.bf16.msra.mxu1 %v7473_v58 }
0x13b9   :  { %5550 = vmatprep.subr.bf16.mxu1 %v7422_v37  ;;  %v5002_v37 = vld [vmem:[%s11734_s10 + $0x138] sm:$0xff] }
0x146e   :  { %v4936_v56 = vpop.f32.mrb[68].mxu1 }
0x146f   :  { %v7999_v33 = vpop.f32.mrb[69].mxu1 }
0x1470   :  { %v4939_v17 = vpop.f32.mrb[70].mxu1 }
0x1471   :  { %v8392_v28 = vpack.i.bf16 %v4939_v17, %v4936_v56  ;;  %v8000_v5 = vpop.f32.mrb[71].mxu1 }
0x1472   :  { %v5009_v5 = vld [vmem:[%s11734_s10 + $0x170] sm:$0xff] }
0x1473   :  { %8393 = vrot.lane.b32.xlu1 %v8392_v28, %s9314_s30  ;;  %v5005_v28 = vld [vmem:[%s11734_s10 + $0x150] sm:$0xff] }
0x1474   :  { %v7460_v22 = vcombine.high %v5005_v28, %v5009_v5 }
0x1477   :  { %8398 = vrot.lane.b32.xlu1 %v8397_v54, %s9314_s30  ;;  %v3387_v54 = vpop.permute.xlu0 %3386 }
0x147b   :  { %3388 = vrot.lane.b32.xlu1 %v10797_v13, %s9314_s30  ;;  %v4978_v13 = vld [vmem:[%s11734_s10 + $0x78] sm:$0xff] }
0x147c   :  { %v7430_v43 = vcombine.high %v4974_v39, %v4978_v13  ;;  %v7429_v0 = vcombine.low %v4974_v39, %v4978_v13  ;;  %v5013_v13 = vld [vmem:[%s11734_s10 + $0x190] sm:$0xff] }
0x147f   :  { %3392 = vrot.lane.b32.xlu1 %v10623_v19, %s9314_s30 }
0x14e5   :  { %v8394_v18 = vpop.permute.xlu1 %8393 }
0x14e6   :  { %v8396_v63 = vunpack.i.h.bf16 %v8394_v18  ;;  %v8395_v20 = vunpack.i.l.bf16 %v8394_v18  ;;  %v5006_v18 = vld [vmem:[%s11734_s10 + $0x158] sm:$0xff] }
0x14e7   :  { %v7462_v39 = vcombine.high %v5006_v18, %v5010_v53 }
0x14e8   :  { %v4960_v19 = vsel %vm366_vm0, %v10846_v44, %v8396_v63  ;;  %v4959_v23 = vsel %vm366_vm0, %v10844_v2, %v8395_v20  ;;  %v4982_v2 = vld [vmem:[%s11734_s10 + $0x98] sm:$0xff] }
0x14e9   :  { %v11195_v52 = vpack.c.bf16 %v4960_v19, %v4959_v23  ;;  %v8399_v31 = vpop.permute.xlu1 %8398  ;;  %v4986_v44 = vld [vmem:[%s11734_s10 + $0xb8] sm:$0xff]  ;;  %v5017_v19 = vld [vmem:[%s11734_s10 + $0x1b0] sm:$0xff] }
0x14ea   :  { %v8401_v15 = vunpack.i.h.bf16 %v8399_v31  ;;  %v8400_v3 = vunpack.i.l.bf16 %v8399_v31  ;;  %v7438_v4 = vcombine.high %v4982_v2, %v4986_v44  ;;  %v7437_v58 = vcombine.low %v4982_v2, %v4986_v44  ;;  %v5014_v23 = vld [vmem:[%s11734_s10 + $0x198] sm:$0xff] }
0x14eb   :  { %5424 = vmatmul.mubr.bf16.vlgmr.msra.gmra.mrb[72].mxu0 %v11195_v52  ;;  %5477 = vmatmul.mubr.bf16.vlgmr.msra.gmra.mrb[72].mxu1 %v11195_v52  ;;  %v7459_v31 = vcombine.low %v5005_v28, %v5009_v5  ;;  %v5026_v2 = vld [vmem:[%s11734_s10 + $0x1f8] sm:$0xff]  ;;  %v7467_v44 = vcombine.low %v5013_v13, %v5017_v19 }
0x14ec   :  { %v4962_v24 = vsel %vm366_vm0, %v10995_v27, %v8401_v15  ;;  %v4961_v60 = vsel %vm366_vm0, %v10993_v61, %v8400_v3  ;;  %5498 = vmatpush1.bf16.msra.mxu0 %v7419_v16  ;;  %5551 = vmatpush1.bf16.msra.mxu1 %v7421_v11  ;;  %v3398_v27 = vsel %vm366_vm0, %v10397_v62, %v3387_v54  ;;  %v3391_v62 = vpop.permute.xlu0 %3390  ;;  %v5001_v16 = vld [vmem:[%s11734_s10 + $0x130] sm:$0xff]  ;;  %v4998_v11 = vld [vmem:[%s11734_s10 + $0x118] sm:$0xff] }
0x14ed   :  { %v11215_v10 = vpack.c.bf16 %v4962_v24, %v4961_v60  ;;  %v3389_v57 = vpop.permute.xlu1 %3388  ;;  %5499 = vmatprep.subr.bf16.mxu0 %v7428_v9  ;;  %5552 = vmatprep.subr.bf16.mxu1 %v7430_v43  ;;  %v3400_v59 = vsel %vm366_vm0, %v10591_v14, %v3391_v62  ;;  %v7443_v14 = vcombine.low %v4989_v34, %v4993_v30  ;;  %v5018_v54 = vld [vmem:[%s11734_s10 + $0x1b8] sm:$0xff]  ;;  %v5021_v15 = vld [vmem:[%s11734_s10 + $0x1d0] sm:$0xff] }
0x14ee   :  { %v3399_v61 = vsel %vm366_vm0, %v10399_v21, %v3389_v57  ;;  %5433 = vmatprep.mubr.bf16.mxu0 %v9311_v1  ;;  %5486 = vmatprep.mubr.bf16.mxu1 %v9311_v1  ;;  %v7435_v21 = vcombine.low %v4981_v32, %v4985_v7  ;;  %v7452_v33 = vcombine.high %v4997_v29, %v5001_v16  ;;  %v5025_v3 = vld [vmem:[%s11734_s10 + $0x1f0] sm:$0xff]  ;;  %v5022_v7 = vld [vmem:[%s11734_s10 + $0x1d8] sm:$0xff] }
0x14ef   :  { %v11235_v40 = vadd.f32 %v3399_v61, %v3398_v27  ;;  %v7454_v17 = vcombine.high %v4998_v11, %v5002_v37  ;;  %v7451_v63 = vcombine.low %v4997_v29, %v5001_v16  ;;  %v7453_v20 = vcombine.low %v4998_v11, %v5002_v37  ;;  %v11297_v34 = vld [vmem:[#allocation10 + $0x100] ss:$16 sps:$4 sm:$0xff]   ;;  %v8597_v27 = vld [vmem:[#allocation10 + $0x108] ss:$16 sps:$4 sm:$0xff]   ;;  %v11300_v61 = vld [vmem:[#allocation10 + $0x124] ss:$16 sps:$4 sm:$0xff]  }
0x14f0   :  { %5500 = vmatpush1.bf16.msra.mxu0 %v7427_v25  ;;  %5553 = vmatpush1.bf16.msra.mxu1 %v7429_v0  ;;  %v7461_v9 = vcombine.low %v5006_v18, %v5010_v53  ;;  %v7468_v43 = vcombine.high %v5013_v13, %v5017_v19  ;;  %v7470_v32 = vcombine.high %v5014_v23, %v5018_v54  ;;  %v8605_v30 = vld [vmem:[#allocation10 + $0x12c] ss:$16 sps:$4 sm:$0xff]   ;;  %v11308_v62 = vld [vmem:[#allocation10 + $0x144] ss:$16 sps:$4 sm:$0xff]   ;;  %v8615_v29 = vld [vmem:[#allocation10 + $0x168] ss:$16 sps:$4 sm:$0xff]  }
0x14f1   :  { %v3393_v6 = vpop.permute.xlu1 %3392  ;;  %5501 = vmatprep.subr.bf16.mxu0 %v7436_v45  ;;  %5554 = vmatprep.subr.bf16.mxu1 %v7438_v4  ;;  %v7469_v25 = vcombine.low %v5014_v23, %v5018_v54  ;;  %v7476_v24 = vcombine.high %v5021_v15, %v5025_v3  ;;  %v7478_v60 = vcombine.high %v5022_v7, %v5026_v2  ;;  %v11295_v45 = vld [vmem:[#allocation10 + $0x104] ss:$16 sps:$4 sm:$0xff]   ;;  %v8599_v4 = vld [vmem:[#allocation10 + $0x10c] ss:$16 sps:$4 sm:$0xff]  }
0x14f2   :  { %v3401_v51 = vsel %vm366_vm0, %v10593_v46, %v3393_v6  ;;  %v7445_v46 = vcombine.low %v4990_v8, %v4994_v41  ;;  %v7475_v0 = vcombine.low %v5021_v15, %v5025_v3  ;;  %v7477_v57 = vcombine.low %v5022_v7, %v5026_v2  ;;  %v11305_v8 = vld [vmem:[#allocation10 + $0x120] ss:$16 sps:$4 sm:$0xff]   ;;  %v8603_v41 = vld [vmem:[#allocation10 + $0x128] ss:$16 sps:$4 sm:$0xff]   ;;  %v11316_v6 = vld [vmem:[#allocation10 + $0x164] ss:$16 sps:$4 sm:$0xff]  }
0x14f3   :  { %v11253_v56 = vadd.f32 %v3401_v51, %v3400_v59  ;;  %5434 = vmatmul.mubr.bf16.gmra.mrb[76].mxu0 %v11215_v10  ;;  %5487 = vmatmul.mubr.bf16.gmra.mrb[76].mxu1 %v11215_v10  ;;  %v11344_v59 = vld [vmem:[%s11737_s13 + $0x88] sm:$0xff]   ;;  %v11351_v51 = vld [vmem:[%s11737_s13 + $0x90] sm:$0xff]   ;;  %v11358_v16 = vld [vmem:[%s11737_s13 + $0x98] sm:$0xff]  }
0x14f4   :  { %5502 = vmatpush1.bf16.msra.mxu0 %v7435_v21  ;;  %5555 = vmatpush1.bf16.msra.mxu1 %v7437_v58  ;;  %v8611_v21 = vld [vmem:[#allocation10 + $0x14c] ss:$16 sps:$4 sm:$0xff]   ;;  %v8609_v58 = vld [vmem:[#allocation10 + $0x148] ss:$16 sps:$4 sm:$0xff]  }
0x14f5   :  { %5503 = vmatprep.subr.bf16.mxu0 %v7444_v12  ;;  %5556 = vmatprep.subr.bf16.mxu1 %v7446_v35  ;;  %v8617_v12 = vld [vmem:[#allocation10 + $0x16c] ss:$16 sps:$4 sm:$0xff]   ;;  %v11321_v35 = vld [vmem:[#allocation10 + $0x160] ss:$16 sps:$4 sm:$0xff]  }
0x14f6   :  { %5529 = vmatprep.mubr.bf16.mxu0 %v9311_v1  ;;  %5582 = vmatprep.mubr.bf16.mxu1 %v9311_v1  ;;  %v11365_v11 = vld [vmem:[%s11737_s13 + $0xa0] sm:$0xff]   ;;  %v11371_v37 = vld [vmem:[%s11737_s13 + $0xa8] sm:$0xff]  }
0x14f8   :  { %5504 = vmatpush1.bf16.msra.mxu0 %v7443_v14  ;;  %5557 = vmatpush1.bf16.msra.mxu1 %v7445_v46  ;;  %v11378_v14 = vld [vmem:[%s11737_s13 + $0xb0] sm:$0xff]   ;;  %v11385_v46 = vld [vmem:[%s11737_s13 + $0xb8] sm:$0xff]  }
0x14f9   :  { %5505 = vmatprep.subr.bf16.mxu0 %v7452_v33  ;;  %5558 = vmatprep.subr.bf16.mxu1 %v7454_v17  ;;  %v11390_v33 = vld [vmem:[#allocation8] sm:$0xff] }
0x14fa   :  { %v11394_v17 = vrot.slane %v11390_v33, %v9653_v36  ;;  %v11398_v28 = vrot.slane %v11390_v33, %v9661_v38  ;;  %v11405_v38 = vrot.slane %v11390_v33, %v9672_v42  ;;  %v11410_v15 = vrot.slane %v11390_v33, %v9677_v50 }
0x14fc   :  { %5506 = vmatpush1.bf16.msra.mxu0 %v7451_v63  ;;  %5559 = vmatpush1.bf16.msra.mxu1 %v7453_v20 }
0x14fd   :  { %5507 = vmatprep.subr.bf16.mxu0 %v7460_v22  ;;  %5560 = vmatprep.subr.bf16.mxu1 %v7462_v39 }
0x1500   :  { %5508 = vmatpush1.bf16.msra.mxu0 %v7459_v31  ;;  %5561 = vmatpush1.bf16.msra.mxu1 %v7461_v9 }
0x1501   :  { %5509 = vmatprep.subr.bf16.mxu0 %v7468_v43  ;;  %5562 = vmatprep.subr.bf16.mxu1 %v7470_v32 }
0x1504   :  { %5510 = vmatpush1.bf16.msra.mxu0 %v7467_v44  ;;  %5563 = vmatpush1.bf16.msra.mxu1 %v7469_v25 }
0x1505   :  { %5511 = vmatprep.subr.bf16.mxu0 %v7476_v24  ;;  %5564 = vmatprep.subr.bf16.mxu1 %v7478_v60 }
0x1508   :  { %5512 = vmatpush1.bf16.msra.mxu0 %v7475_v0  ;;  %5565 = vmatpush1.bf16.msra.mxu1 %v7477_v57 }
0x1509   :  { %5700 = vmatprep.subr.bf16.mxu0 %v11295_v45  ;;  %5743 = vmatprep.subr.bf16.mxu1 %v8599_v4 }
0x150b   :  { %5530 = vmatmul.mubr.bf16.vlgmr.msra.gmra.mrb[80].mxu0 %v11195_v52  ;;  %5583 = vmatmul.mubr.bf16.vlgmr.msra.gmra.mrb[80].mxu1 %v11195_v52  ;;  %v11313_v52 = vld [vmem:[#allocation10 + $0x140] ss:$16 sps:$4 sm:$0xff]  }
0x150c   :  { %5701 = vmatpush1.bf16.msra.mxu0 %v11297_v34  ;;  %5744 = vmatpush1.bf16.msra.mxu1 %v8597_v27 }
0x150d   :  { %5702 = vmatprep.subr.bf16.mxu0 %v11300_v61  ;;  %5745 = vmatprep.subr.bf16.mxu1 %v8605_v30 }
0x150e   :  { %5539 = vmatprep.mubr.bf16.mxu0 %v9311_v1  ;;  %5592 = vmatprep.mubr.bf16.mxu1 %v9311_v1 }
0x1510   :  { %5703 = vmatpush1.bf16.msra.mxu0 %v11305_v8  ;;  %5746 = vmatpush1.bf16.msra.mxu1 %v8603_v41 }
0x1511   :  { %5704 = vmatprep.subr.bf16.mxu0 %v11308_v62  ;;  %5747 = vmatprep.subr.bf16.mxu1 %v8611_v21 }
0x1513   :  { %5540 = vmatmul.mubr.bf16.gmra.mrb[84].mxu0 %v11215_v10  ;;  %5593 = vmatmul.mubr.bf16.gmra.mrb[84].mxu1 %v11215_v10  ;;  %v11337_v10 = vld [vmem:[%s11737_s13 + $0x80] sm:$0xff]  }
0x1514   :  { %5705 = vmatpush1.bf16.msra.mxu0 %v11313_v52  ;;  %5748 = vmatpush1.bf16.msra.mxu1 %v8609_v58 }
0x1515   :  { %5706 = vmatprep.subr.bf16.mxu0 %v11316_v6  ;;  %5749 = vmatprep.subr.bf16.mxu1 %v8617_v12 }
0x1516   :  { %5732 = vmatprep.mubr.bf16.mxu0 %v9311_v1  ;;  %5775 = vmatprep.mubr.bf16.mxu1 %v9311_v1 }
0x1518   :  { %5707 = vmatpush1.bf16.msra.mxu0 %v11321_v35  ;;  %5750 = vmatpush1.bf16.msra.mxu1 %v8615_v29 }
0x1519   :  { %8001 = vmatprep.subr.bf16.mxu0 %v9312_v26  ;;  %5996 = vmatprep.subr.bf16.mxu1 %v8599_v4 }
0x151b   :  { %5733 = vmatmul.mubr.bf16.vlgmr.msra.gmra.mrb[72].mxu0 %v9311_v1  ;;  %5776 = vmatmul.mubr.bf16.vlgmr.msra.gmra.mrb[72].mxu1 %v9311_v1 }
0x151c   :  { %8017 = vmatprep.mubr.msk.bf16.mxu0 %vm9313_vm1, %v9312_v26  ;;  %5997 = vmatpush1.bf16.msra.mxu1 %v8597_v27 }
0x151d   :  { %5998 = vmatprep.subr.bf16.mxu1 %v8605_v30  ;;  %6028 = vmatprep.mubr.bf16.mxu1 %v9311_v1 }
0x151e   :  { %8002 = vmatpush3.bf16.msra.mxu0 %v11337_v10 }
0x151f   :  { %8003 = vmatprep.subr.bf16.mxu0 %v9312_v26 }
0x1520   :  { %5999 = vmatpush1.bf16.msra.mxu1 %v8603_v41 }
0x1521   :  { %6000 = vmatprep.subr.bf16.mxu1 %v8611_v21 }
0x1522   :  { %8004 = vmatpush3.bf16.msra.mxu0 %v11344_v59 }
0x1523   :  { %8005 = vmatprep.subr.bf16.mxu0 %v9312_v26 }
0x1524   :  { %6001 = vmatpush1.bf16.msra.mxu1 %v8609_v58 }
0x1525   :  { %6002 = vmatprep.subr.bf16.mxu1 %v8617_v12 }
0x1526   :  { %8006 = vmatpush3.bf16.msra.mxu0 %v11351_v51 }
0x1527   :  { %8007 = vmatprep.subr.bf16.mxu0 %v9312_v26 }
0x1528   :  { %6003 = vmatpush1.bf16.msra.mxu1 %v8615_v29 }
0x1529   :  { %8021 = vmatprep.subr.bf16.mxu1 %v9312_v26 }
0x152a   :  { %8008 = vmatpush3.bf16.msra.mxu0 %v11358_v16 }
0x152b   :  { %8009 = vmatprep.subr.bf16.mxu0 %v9312_v26 }
0x152e   :  { %8010 = vmatpush3.bf16.msra.mxu0 %v11365_v11 }
0x152f   :  { %8011 = vmatprep.subr.bf16.mxu0 %v9312_v26 }
0x1532   :  { %8012 = vmatpush3.bf16.msra.mxu0 %v11371_v37 }
0x1533   :  { %8013 = vmatprep.subr.bf16.mxu0 %v9312_v26 }
0x1536   :  { %8014 = vmatpush3.bf16.msra.mxu0 %v11378_v14 }
0x1537   :  { %8015 = vmatprep.subr.bf16.mxu0 %v9312_v26 }
0x153a   :  { %8016 = vmatpush3.bf16.msra.mxu0 %v11385_v46 }
0x153b   :  { %5953 = vmatprep.subr.bf16.mxu0 %v11295_v45 }
0x15ee   :  { %v5734_v5 = vpop.f32.mrb[72].mxu0  ;;  %v5777_v18 = vpop.f32.mrb[72].mxu1 }
0x15ef   :  { %v8209_v53 = vadd.f32 %v5734_v5, %v11394_v17  ;;  %v5736_v63 = vpop.f32.mrb[73].mxu0  ;;  %v5779_v20 = vpop.f32.mrb[73].mxu1  ;;  %v8217_v7 = vadd.f32 %v5777_v18, %v11410_v15 }
0x15f0   :  { %v8210_v22 = vadd.f32 %v5736_v63, %v11398_v28  ;;  %v5738_v39 = vpop.f32.mrb[74].mxu0  ;;  %v5781_v13 = vpop.f32.mrb[74].mxu1  ;;  %v8218_v3 = vadd.f32 %v5779_v20, %v11405_v38 }
0x15f1   :  { %v7495_v19 = vmul.f32 -1.442695, %v8209_v53  ;;  %v8211_v23 = vadd.f32 %v5738_v39, %v11394_v17  ;;  %v5740_v54 = vpop.f32.mrb[75].mxu0  ;;  %v5783_v36 = vpop.f32.mrb[75].mxu1  ;;  %v8219_v44 = vadd.f32 %v5781_v13, %v11410_v15 }
0x15f2   :  { %v7497_v31 = vmul.f32 -1.442695, %v8210_v22  ;;  %v8212_v9 = vadd.f32 %v5740_v54, %v11398_v28  ;;  %v7499_v2 = vmul.f32 -1.442695, %v8218_v3  ;;  %v8220_v42 = vadd.f32 %v5783_v36, %v11405_v38 }
0x15f3   :  { %9054 = vpow2.f32 %v7495_v19  ;;  %v7496_v43 = vmul.f32 -1.442695, %v8211_v23 }
0x15f4   :  { %9056 = vpow2.f32 %v7497_v31  ;;  %v7498_v32 = vmul.f32 -1.442695, %v8212_v9  ;;  %v7500_v0 = vmul.f32 -1.442695, %v8220_v42 }
0x15f5   :  { %9058 = vpow2.f32 %v7496_v43 }
0x15f6   :  { %9060 = vpow2.f32 %v7498_v32 }
0x15f7   :  { %9062 = vtanh.f32 %v8217_v7  ;;  %v11430_v7 = vld [vmem:[#allocation10 + $0x184] ss:$16 sps:$4 sm:$0xff]  }
0x15f8   :  { %9064 = vpow2.f32 %v7499_v2 }
0x15f9   :  { %9066 = vtanh.f32 %v8219_v44  ;;  %v11457_v44 = vld [vmem:[#allocation10 + $0x1c0] ss:$16 sps:$4 sm:$0xff]  }
0x15fd   :  { %v9055_v25 = vpop.eup %9054 }
0x15fe   :  { %v9057_v24 = vpop.eup %9056  ;;  %v5800_v60 = vadd.f32 1.0, %v9055_v25  ;;  %v11460_v25 = vld [vmem:[#allocation10 + $0x1e4] ss:$16 sps:$4 sm:$0xff]  }
0x15ff   :  { %v5812_v57 = vadd.f32 1.0, %v9057_v24  ;;  %v9059_v50 = vpop.eup %9058 }
0x1600   :  { %9068 = vrcp.f32 %v5800_v60  ;;  %v5801_v45 = vadd.f32 1.0, %v9059_v50  ;;  %v9061_v4 = vpop.eup %9060 }
0x1601   :  { %9070 = vrcp.f32 %v5812_v57  ;;  %v5813_v27 = vadd.f32 1.0, %v9061_v4  ;;  %v9063_v30 = vpop.eup %9062 }
0x1602   :  { %9072 = vpow2.f32 %v7500_v0  ;;  %v9065_v41 = vpop.eup %9064 }
0x1603   :  { %9074 = vrcp.f32 %v5801_v45  ;;  %v9067_v21 = vpop.eup %9066  ;;  %v5826_v63 = vadd.f32 1.0, %v9065_v41 }
0x1604   :  { %9076 = vrcp.f32 %v5813_v27 }
0x1605   :  { %9078 = vrcp.f32 %v5826_v63 }
0x160a   :  { %v9069_v58 = vpop.eup %9068 }
0x160b   :  { %v9071_v12 = vpop.eup %9070  ;;  %v5834_v29 = vmul.f32 %v9069_v58, %v9063_v30 }
0x160c   :  { %v9073_v5 = vpop.eup %9072  ;;  %v5832_v18 = vmul.f32 0.0, %v9071_v12 }
0x160d   :  { %v9075_v53 = vpop.eup %9074  ;;  %v5827_v13 = vadd.f32 1.0, %v9073_v5 }
0x160e   :  { %v11416_v20 = vadd.f32 %v5834_v29, %v5832_v18  ;;  %v5835_v22 = vmul.f32 %v9075_v53, %v9067_v21  ;;  %v9077_v39 = vpop.eup %9076 }
0x160f   :  { %v5833_v19 = vmul.f32 0.0, %v9077_v39  ;;  %v9079_v54 = vpop.eup %9078 }
0x1610   :  { %9080 = vtanh.f32 %v11416_v20 }
0x1611   :  { %v11419_v23 = vadd.f32 %v5835_v22, %v5833_v19  ;;  %9082 = vrcp.f32 %v5827_v13 }
0x1613   :  { %9084 = vtanh.f32 %v11419_v23 }
0x161a   :  { %v9081_v36 = vpop.eup %9080 }
0x161b   :  { %v9083_v31 = vpop.eup %9082  ;;  %v5840_v43 = vmul.f32 %v9081_v36, %v9079_v54 }
0x161d   :  { %v9085_v9 = vpop.eup %9084 }
0x161e   :  { %v5841_v32 = vmul.f32 %v9085_v9, %v9083_v31 }
0x1620   :  { %v5859_v3 = vpack.c.bf16 %v5841_v32, %v5840_v43 }
0x1622   :  { %8018 = vmatmul.mubr.bf16.vlgmr.msra.gmra.mrb[88].mxu0 %v5859_v3 }
0x1623   :  { %5954 = vmatpush1.bf16.msra.mxu0 %v11297_v34  ;;  %5985 = vmatprep.mubr.bf16.mxu0 %v9311_v1 }
0x1624   :  { %5955 = vmatprep.subr.bf16.mxu0 %v11300_v61  ;;  %v11437_v61 = vld [vmem:[#allocation10 + $0x180] ss:$16 sps:$4 sm:$0xff]  }
0x1627   :  { %5956 = vmatpush1.bf16.msra.mxu0 %v11305_v8 }
0x1628   :  { %5957 = vmatprep.subr.bf16.mxu0 %v11308_v62 }
0x162b   :  { %5958 = vmatpush1.bf16.msra.mxu0 %v11313_v52  ;;  %v11441_v52 = vld [vmem:[#allocation10 + $0x1a4] ss:$16 sps:$4 sm:$0xff]  }
0x162c   :  { %5959 = vmatprep.subr.bf16.mxu0 %v11316_v6  ;;  %v11446_v6 = vld [vmem:[#allocation10 + $0x1a0] ss:$16 sps:$4 sm:$0xff]  }
0x162f   :  { %5960 = vmatpush1.bf16.msra.mxu0 %v11321_v35  ;;  %v11450_v35 = vld [vmem:[#allocation10 + $0x1c4] ss:$16 sps:$4 sm:$0xff]  }
0x1630   :  { %6234 = vmatprep.subr.bf16.mxu0 %v11430_v7 }
0x16f5   :  { %v11433_v2 = vpop.f32.mrb[88].mxu0 }
0x16f6   :  { %v8019_v34 = vpop.f32.mrb[89].mxu0 }
0x16f7   :  { %v11435_v42 = vpop.f32.mrb[90].mxu0 }
0x16f8   :  { %v5949_v8 = vpack.c.bf16 %v11435_v42, %v11433_v2  ;;  %v8020_v62 = vpop.f32.mrb[91].mxu0 }
0x16fa   :  { %7525 = vmatmul.mubr.msk.bf16.vlgmr.msra.gmra.mrb[76].mxu0 %vm366_vm0, %v5949_v8  ;;  %7526 = vmatmul.mubr.msk.bf16.vlgmr.msra.gmra.mrb[76].mxu1 %vm366_vm0, %v5949_v8 }
0x16fb   :  { %6235 = vmatpush1.bf16.msra.mxu0 %v11437_v61  ;;  %6266 = vmatprep.mubr.bf16.mxu0 %v9311_v1 }
0x16fc   :  { %6236 = vmatprep.subr.bf16.mxu0 %v11441_v52  ;;  %8022 = vmatpush3.bf16.msra.mxu1 %v11337_v10  ;;  %v11465_v10 = vld [vmem:[#allocation10 + $0x1e0] ss:$16 sps:$4 sm:$0xff]  }
0x16fd   :  { %8023 = vmatprep.subr.bf16.mxu1 %v9312_v26  ;;  %8037 = vmatprep.mubr.msk.bf16.mxu1 %vm9313_vm1, %v9312_v26 }
0x16ff   :  { %6237 = vmatpush1.bf16.msra.mxu0 %v11446_v6 }
0x1700   :  { %6238 = vmatprep.subr.bf16.mxu0 %v11450_v35  ;;  %8024 = vmatpush3.bf16.msra.mxu1 %v11344_v59  ;;  %v11484_v59 = vld [vmem:[#allocation10 + $0x18c] ss:$16 sps:$4 sm:$0xff]  }
0x1701   :  { %8025 = vmatprep.subr.bf16.mxu1 %v9312_v26 }
0x1703   :  { %6239 = vmatpush1.bf16.msra.mxu0 %v11457_v44 }
0x1704   :  { %6240 = vmatprep.subr.bf16.mxu0 %v11460_v25  ;;  %8026 = vmatpush3.bf16.msra.mxu1 %v11351_v51 }
0x1705   :  { %8027 = vmatprep.subr.bf16.mxu1 %v9312_v26 }
0x1707   :  { %6241 = vmatpush1.bf16.msra.mxu0 %v11465_v10 }
0x1708   :  { %8028 = vmatpush3.bf16.msra.mxu1 %v11358_v16  ;;  %8041 = vmatprep.subr.bf16.mxu0 %v9312_v26 }
0x1709   :  { %8029 = vmatprep.subr.bf16.mxu1 %v9312_v26 }
0x170a   :  { %6267 = vmatmul.mubr.bf16.vlgmr.msra.gmra.mrb[84].mxu0 %v9311_v1 }
0x170b   :  { %8057 = vmatprep.mubr.msk.bf16.mxu0 %vm9313_vm1, %v9312_v26 }
0x170c   :  { %8030 = vmatpush3.bf16.msra.mxu1 %v11365_v11 }
0x170d   :  { %8031 = vmatprep.subr.bf16.mxu1 %v9312_v26 }
0x1710   :  { %8032 = vmatpush3.bf16.msra.mxu1 %v11371_v37 }
0x1711   :  { %8033 = vmatprep.subr.bf16.mxu1 %v9312_v26 }
0x1714   :  { %8034 = vmatpush3.bf16.msra.mxu1 %v11378_v14 }
0x1715   :  { %8035 = vmatprep.subr.bf16.mxu1 %v9312_v26 }
0x1718   :  { %8036 = vmatpush3.bf16.msra.mxu1 %v11385_v46 }
0x1719   :  { %6277 = vmatprep.subr.bf16.mxu1 %v11484_v59 }
0x17cd   :  { %v5987_v51 = vpop.f32.mrb[76].mxu0  ;;  %v6030_v16 = vpop.f32.mrb[76].mxu1 }
0x17ce   :  { %v8213_v11 = vadd.f32 %v5987_v51, %v11394_v17  ;;  %v5989_v24 = vpop.f32.mrb[77].mxu0  ;;  %v6032_v60 = vpop.f32.mrb[77].mxu1  ;;  %v8221_v58 = vadd.f32 %v6030_v16, %v11410_v15 }
0x17cf   :  { %v8214_v37 = vadd.f32 %v5989_v24, %v11398_v28  ;;  %v5991_v0 = vpop.f32.mrb[78].mxu0  ;;  %v6034_v57 = vpop.f32.mrb[78].mxu1  ;;  %v8222_v21 = vadd.f32 %v6032_v60, %v11405_v38 }
0x17d0   :  { %v7527_v50 = vmul.f32 -1.442695, %v8213_v11  ;;  %v8215_v14 = vadd.f32 %v5991_v0, %v11394_v17  ;;  %v5993_v45 = vpop.f32.mrb[79].mxu0  ;;  %v6036_v4 = vpop.f32.mrb[79].mxu1  ;;  %v8223_v17 = vadd.f32 %v6034_v57, %v11410_v15 }
0x17d1   :  { %v7529_v46 = vmul.f32 -1.442695, %v8214_v37  ;;  %v8216_v27 = vadd.f32 %v5993_v45, %v11398_v28  ;;  %v7531_v12 = vmul.f32 -1.442695, %v8222_v21  ;;  %v8224_v29 = vadd.f32 %v6036_v4, %v11405_v38  ;;  %v8641_v21 = vld [vmem:[#allocation10 + $0x1a8] ss:$16 sps:$4 sm:$0xff]  }
0x17d2   :  { %9086 = vpow2.f32 %v7527_v50  ;;  %v7528_v30 = vmul.f32 -1.442695, %v8215_v14 }
0x17d3   :  { %9088 = vpow2.f32 %v7529_v46  ;;  %v7530_v41 = vmul.f32 -1.442695, %v8216_v27  ;;  %v7532_v28 = vmul.f32 -1.442695, %v8224_v29  ;;  %v8647_v29 = vld [vmem:[#allocation10 + $0x1e8] ss:$16 sps:$4 sm:$0xff]  }
0x17d4   :  { %9090 = vpow2.f32 %v7528_v30  ;;  %v8638_v30 = vld [vmem:[#allocation10 + $0x188] ss:$16 sps:$4 sm:$0xff]  }
0x17d5   :  { %9092 = vpow2.f32 %v7530_v41  ;;  %v8643_v41 = vld [vmem:[#allocation10 + $0x1ac] ss:$16 sps:$4 sm:$0xff]  }
0x17d6   :  { %9094 = vtanh.f32 %v8221_v58  ;;  %v8646_v58 = vld [vmem:[#allocation10 + $0x1cc] ss:$16 sps:$4 sm:$0xff]  }
0x17d7   :  { %9096 = vpow2.f32 %v7531_v12  ;;  %v8649_v12 = vld [vmem:[#allocation10 + $0x1ec] ss:$16 sps:$4 sm:$0xff]  }
0x17d8   :  { %9098 = vtanh.f32 %v8223_v17  ;;  %v11513_v17 = vld [vmem:[%s11737_s13 + $0xc0] sm:$0xff]  }
0x17d9   :  { %8042 = vmatpush3.bf16.msra.mxu0 %v11513_v17 }
0x17da   :  { %8043 = vmatprep.subr.bf16.mxu0 %v9312_v26 }
0x17dc   :  { %v9087_v5 = vpop.eup %9086 }
0x17dd   :  { %v9089_v18 = vpop.eup %9088  ;;  %v6053_v53 = vadd.f32 1.0, %v9087_v5  ;;  %v11495_v63 = vpop.f32.mrb[84].mxu0  ;;  %v11527_v5 = vld [vmem:[%s11737_s13 + $0xd0] sm:$0xff]  }
0x17de   :  { %v6065_v22 = vadd.f32 1.0, %v9089_v18  ;;  %v11497_v39 = vpop.f32.mrb[85].mxu0  ;;  %v9091_v13 = vpop.eup %9090  ;;  %v11534_v18 = vld [vmem:[%s11737_s13 + $0xd8] sm:$0xff]  }
0x17df   :  { %9100 = vrcp.f32 %v6053_v53  ;;  %v11499_v19 = vpop.f32.mrb[86].mxu0  ;;  %v6054_v38 = vadd.f32 1.0, %v9091_v13  ;;  %v9093_v15 = vpop.eup %9092  ;;  %v11541_v53 = vld [vmem:[%s11737_s13 + $0xe0] sm:$0xff]   ;;  %v11561_v13 = vld [vmem:[%s11737_s13 + $0xf8] sm:$0xff]  }
0x17e0   :  { %9102 = vrcp.f32 %v6065_v22  ;;  %v11501_v54 = vpop.f32.mrb[87].mxu0  ;;  %v6066_v36 = vadd.f32 1.0, %v9093_v15  ;;  %v9095_v31 = vpop.eup %9094  ;;  %v11554_v22 = vld [vmem:[%s11737_s13 + $0xf0] sm:$0xff]   ;;  %v11572_v15 = vrot.slane %v11390_v33, %v9895_v55 }
0x17e1   :  { %9104 = vpow2.f32 %v7532_v28  ;;  %v9097_v9 = vpop.eup %9096  ;;  %v11547_v28 = vld [vmem:[%s11737_s13 + $0xe8] sm:$0xff]  }
0x17e2   :  { %9106 = vrcp.f32 %v6054_v38  ;;  %v9099_v43 = vpop.eup %9098  ;;  %v6079_v8 = vadd.f32 1.0, %v9097_v9  ;;  %v11568_v38 = vrot.slane %v11390_v33, %v9892_v47  ;;  %v8232_v9 = vadd.f32 %v11501_v54, %v11572_v15 }
0x17e3   :  { %9108 = vrcp.f32 %v6066_v36 }
0x17e4   :  { %9110 = vrcp.f32 %v6079_v8  ;;  %v8229_v36 = vadd.f32 %v11495_v63, %v11568_v38  ;;  %v7552_v47 = vmul.f32 -1.442695, %v8232_v9 }
0x17e9   :  { %v9101_v32 = vpop.eup %9100 }
0x17ea   :  { %v9103_v3 = vpop.eup %9102  ;;  %v6087_v34 = vmul.f32 %v9101_v32, %v9095_v31  ;;  %v8230_v31 = vadd.f32 %v11497_v39, %v11572_v15 }
0x17eb   :  { %v9105_v62 = vpop.eup %9104  ;;  %v6085_v51 = vmul.f32 %v9103_v3, %v11416_v20 }
0x17ec   :  { %v9107_v16 = vpop.eup %9106  ;;  %v6080_v37 = vadd.f32 1.0, %v9105_v62  ;;  %v7551_v32 = vmul.f32 -1.442695, %v8230_v31 }
0x17ed   :  { %v6089_v11 = vadd.f32 %v6087_v34, %v6085_v51  ;;  %v6088_v24 = vmul.f32 %v9107_v16, %v9099_v43  ;;  %v9109_v60 = vpop.eup %9108  ;;  %v7549_v43 = vmul.f32 -1.442695, %v8229_v36 }
0x17ee   :  { %v6086_v0 = vmul.f32 %v9109_v60, %v11419_v23  ;;  %v9111_v50 = vpop.eup %9110  ;;  %v8644_v23 = vld [vmem:[#allocation10 + $0x1c8] ss:$16 sps:$4 sm:$0xff]   ;;  %v11592_v60 = vrot.slane %v11390_v33, %v9921_v48 }
0x17ef   :  { %9112 = vtanh.f32 %v6089_v11 }
0x17f0   :  { %v6090_v57 = vadd.f32 %v6088_v24, %v6086_v0  ;;  %9114 = vrcp.f32 %v6080_v37 }
0x17f2   :  { %9116 = vtanh.f32 %v6090_v57 }
0x17f3   :  { %9118 = vpow2.f32 %v7549_v43 }
0x17f4   :  { %9120 = vpow2.f32 %v7551_v32 }
0x17f5   :  { %9122 = vpow2.f32 %v7552_v47 }
0x17f9   :  { %v9113_v14 = vpop.eup %9112 }
0x17fa   :  { %v6093_v45 = vmul.f32 %v9113_v14, %v9111_v50  ;;  %v9115_v4 = vpop.eup %9114 }
0x17fc   :  { %v9117_v46 = vpop.eup %9116 }
0x17fd   :  { %v6094_v27 = vmul.f32 %v9117_v46, %v9115_v4  ;;  %v9119_v8 = vpop.eup %9118 }
0x17fe   :  { %v9121_v62 = vpop.eup %9120  ;;  %v6334_v51 = vadd.f32 1.0, %v9119_v8 }
0x17ff   :  { %v6095_v20 = vpack.c.bf16 %v6094_v27, %v6093_v45  ;;  %v9123_v54 = vpop.eup %9122  ;;  %v6346_v11 = vadd.f32 1.0, %v9121_v62 }
0x1800   :  { %v6347_v24 = vadd.f32 1.0, %v9123_v54 }
0x1801   :  { %8038 = vmatmul.mubr.bf16.vlgmr.msra.gmra.mrb[88].mxu1 %v6095_v20 }
0x1802   :  { %6278 = vmatpush1.bf16.msra.mxu1 %v8638_v30  ;;  %6309 = vmatprep.mubr.bf16.mxu1 %v9311_v1 }
0x1803   :  { %6279 = vmatprep.subr.bf16.mxu1 %v8643_v41 }
0x1806   :  { %6280 = vmatpush1.bf16.msra.mxu1 %v8641_v21 }
0x1807   :  { %6281 = vmatprep.subr.bf16.mxu1 %v8646_v58 }
0x180a   :  { %6282 = vmatpush1.bf16.msra.mxu1 %v8644_v23 }
0x180b   :  { %6283 = vmatprep.subr.bf16.mxu1 %v8649_v12 }
0x180e   :  { %6284 = vmatpush1.bf16.msra.mxu1 %v8647_v29 }
0x180f   :  { %6530 = vmatprep.subr.bf16.mxu1 %v11484_v59  ;;  %v11520_v59 = vld [vmem:[%s11737_s13 + $0xc8] sm:$0xff]  }
0x1810   :  { %8044 = vmatpush3.bf16.msra.mxu0 %v11520_v59 }
0x1811   :  { %6310 = vmatmul.mubr.bf16.vlgmr.msra.gmra.mrb[84].mxu1 %v9311_v1  ;;  %8045 = vmatprep.subr.bf16.mxu0 %v9312_v26 }
0x1812   :  { %6531 = vmatpush1.bf16.msra.mxu1 %v8638_v30  ;;  %6562 = vmatprep.mubr.bf16.mxu1 %v9311_v1 }
0x1813   :  { %6532 = vmatprep.subr.bf16.mxu1 %v8643_v41 }
0x1814   :  { %8046 = vmatpush3.bf16.msra.mxu0 %v11527_v5 }
0x1815   :  { %8047 = vmatprep.subr.bf16.mxu0 %v9312_v26 }
0x1816   :  { %6533 = vmatpush1.bf16.msra.mxu1 %v8641_v21 }
0x1817   :  { %6534 = vmatprep.subr.bf16.mxu1 %v8646_v58 }
0x1818   :  { %8048 = vmatpush3.bf16.msra.mxu0 %v11534_v18 }
0x1819   :  { %8049 = vmatprep.subr.bf16.mxu0 %v9312_v26 }
0x181a   :  { %6535 = vmatpush1.bf16.msra.mxu1 %v8644_v23 }
0x181b   :  { %6536 = vmatprep.subr.bf16.mxu1 %v8649_v12 }
0x181c   :  { %8050 = vmatpush3.bf16.msra.mxu0 %v11541_v53 }
0x181d   :  { %8051 = vmatprep.subr.bf16.mxu0 %v9312_v26 }
0x181e   :  { %6537 = vmatpush1.bf16.msra.mxu1 %v8647_v29 }
0x181f   :  { %8061 = vmatprep.subr.bf16.mxu1 %v9312_v26 }
0x1820   :  { %8052 = vmatpush3.bf16.msra.mxu0 %v11547_v28 }
0x1821   :  { %8053 = vmatprep.subr.bf16.mxu0 %v9312_v26 }
0x1824   :  { %8054 = vmatpush3.bf16.msra.mxu0 %v11554_v22 }
0x1825   :  { %8055 = vmatprep.subr.bf16.mxu0 %v9312_v26 }
0x1828   :  { %8056 = vmatpush3.bf16.msra.mxu0 %v11561_v13 }
0x1829   :  { %6487 = vmatprep.subr.bf16.mxu0 %v11430_v7  ;;  %v8231_v7 = vadd.f32 %v11499_v19, %v11568_v38  ;;  %v11588_v19 = vrot.slane %v11390_v33, %v9918_v49 }
0x182b   :  { %v7550_v3 = vmul.f32 -1.442695, %v8231_v7 }
0x182d   :  { %9124 = vpow2.f32 %v7550_v3 }
0x182e   :  { %9126 = vrcp.f32 %v6334_v51 }
0x182f   :  { %9128 = vrcp.f32 %v6346_v11 }
0x1830   :  { %9130 = vrcp.f32 %v6347_v24 }
0x1837   :  { %v9125_v16 = vpop.eup %9124 }
0x1838   :  { %v6335_v37 = vadd.f32 1.0, %v9125_v16  ;;  %v9127_v27 = vpop.eup %9126 }
0x1839   :  { %v9129_v30 = vpop.eup %9128 }
0x183a   :  { %v9131_v20 = vpop.eup %9130  ;;  %v6366_v58 = vmul.f32 0.0, %v9129_v30 }
0x183b   :  { %v6367_v36 = vmul.f32 0.0, %v9131_v20 }
0x18d4   :  { %v11582_v55 = vpop.f32.mrb[88].mxu1 }
0x18d5   :  { %v8039_v34 = vpop.f32.mrb[89].mxu1 }
0x18d6   :  { %v11584_v63 = vpop.f32.mrb[90].mxu1 }
0x18d7   :  { %v8040_v39 = vpop.f32.mrb[91].mxu1 }
0x18e4   :  { %v6311_v0 = vpop.f32.mrb[84].mxu1 }
0x18e5   :  { %v8237_v57 = vadd.f32 %v6311_v0, %v11588_v19  ;;  %v6313_v50 = vpop.f32.mrb[85].mxu1 }
0x18e6   :  { %v8238_v14 = vadd.f32 %v6313_v50, %v11592_v60  ;;  %v6315_v45 = vpop.f32.mrb[86].mxu1 }
0x18e7   :  { %9132 = vtanh.f32 %v8237_v57  ;;  %v8239_v49 = vadd.f32 %v6315_v45, %v11588_v19  ;;  %v6317_v4 = vpop.f32.mrb[87].mxu1 }
0x18e8   :  { %9134 = vrcp.f32 %v6335_v37  ;;  %v7553_v46 = vmul.f32 -1.442695, %v8238_v14  ;;  %v8240_v48 = vadd.f32 %v6317_v4, %v11592_v60 }
0x18e9   :  { %9136 = vtanh.f32 %v8239_v49 }
0x18ea   :  { %9138 = vpow2.f32 %v7553_v46  ;;  %v7554_v33 = vmul.f32 -1.442695, %v8240_v48 }
0x18ec   :  { %9140 = vpow2.f32 %v7554_v33 }
0x18f1   :  { %v9133_v41 = vpop.eup %9132 }
0x18f2   :  { %v9135_v21 = vpop.eup %9134  ;;  %v6368_v23 = vmul.f32 %v9133_v41, %v9127_v27 }
0x18f3   :  { %v9137_v12 = vpop.eup %9136 }
0x18f4   :  { %v9139_v29 = vpop.eup %9138  ;;  %v11598_v31 = vadd.f32 %v6368_v23, %v6366_v58  ;;  %v6369_v9 = vmul.f32 %v9137_v12, %v9135_v21 }
0x18f5   :  { %v6360_v43 = vadd.f32 1.0, %v9139_v29 }
0x18f6   :  { %v9141_v7 = vpop.eup %9140  ;;  %9142 = vtanh.f32 %v11598_v31  ;;  %v11601_v32 = vadd.f32 %v6369_v9, %v6367_v36 }
0x18f7   :  { %9144 = vrcp.f32 %v6360_v43  ;;  %v6361_v47 = vadd.f32 1.0, %v9141_v7 }
0x18f8   :  { %9146 = vtanh.f32 %v11601_v32 }
0x18f9   :  { %9148 = vrcp.f32 %v6361_v47 }
0x1900   :  { %v9143_v3 = vpop.eup %9142 }
0x1901   :  { %v9145_v34 = vpop.eup %9144 }
0x1902   :  { %v9147_v39 = vpop.eup %9146  ;;  %v6374_v62 = vmul.f32 %v9145_v34, %v9143_v3 }
0x1903   :  { %v9149_v8 = vpop.eup %9148 }
0x1904   :  { %v6375_v54 = vmul.f32 %v9149_v8, %v9147_v39 }
0x1906   :  { %v6393_v51 = vpack.c.bf16 %v6375_v54, %v6374_v62 }
0x1908   :  { %8058 = vmatmul.mubr.bf16.vlgmr.msra.gmra.mrb[92].mxu0 %v6393_v51 }
0x1909   :  { %6488 = vmatpush1.bf16.msra.mxu0 %v11437_v61  ;;  %6519 = vmatprep.mubr.bf16.mxu0 %v9311_v1 }
0x190a   :  { %6489 = vmatprep.subr.bf16.mxu0 %v11441_v52 }
0x190d   :  { %6490 = vmatpush1.bf16.msra.mxu0 %v11446_v6 }
0x190e   :  { %6491 = vmatprep.subr.bf16.mxu0 %v11450_v35 }
0x1911   :  { %6492 = vmatpush1.bf16.msra.mxu0 %v11457_v44 }
0x1912   :  { %6493 = vmatprep.subr.bf16.mxu0 %v11460_v25 }
0x1915   :  { %6494 = vmatpush1.bf16.msra.mxu0 %v11465_v10 }
0x1916   :  { %8081 = vmatprep.subr.bf16.mxu0 %v9312_v26 }
0x19db   :  { %v11613_v16 = vpop.f32.mrb[92].mxu0 }
0x19dc   :  { %v8059_v11 = vpop.f32.mrb[93].mxu0 }
0x19dd   :  { %v11615_v61 = vpop.f32.mrb[94].mxu0 }
0x19de   :  { %v6483_v1 = vpack.c.bf16 %v11615_v61, %v11613_v16  ;;  %v8060_v52 = vpop.f32.mrb[95].mxu0 }
0x19e0   :  { %7579 = vmatmul.mubr.msk.bf16.vlgmr.msra.gmra.mrb[80].mxu0 %vm366_vm0, %v6483_v1  ;;  %7580 = vmatmul.mubr.msk.bf16.vlgmr.msra.gmra.mrb[80].mxu1 %vm366_vm0, %v6483_v1 }
0x19e1   :  { %8062 = vmatpush3.bf16.msra.mxu1 %v11513_v17  ;;  %8077 = vmatprep.mubr.msk.bf16.mxu1 %vm9313_vm1, %v9312_v26 }
0x19e2   :  { %8063 = vmatprep.subr.bf16.mxu1 %v9312_v26  ;;  %8097 = vmatprep.mubr.msk.bf16.mxu0 %vm9313_vm1, %v9312_v26 }
0x19e5   :  { %8064 = vmatpush3.bf16.msra.mxu1 %v11520_v59 }
0x19e6   :  { %8065 = vmatprep.subr.bf16.mxu1 %v9312_v26 }
0x19e9   :  { %8066 = vmatpush3.bf16.msra.mxu1 %v11527_v5 }
0x19ea   :  { %8067 = vmatprep.subr.bf16.mxu1 %v9312_v26 }
0x19ed   :  { %8068 = vmatpush3.bf16.msra.mxu1 %v11534_v18 }
0x19ee   :  { %8069 = vmatprep.subr.bf16.mxu1 %v9312_v26 }
0x19f1   :  { %8070 = vmatpush3.bf16.msra.mxu1 %v11541_v53 }
0x19f2   :  { %8071 = vmatprep.subr.bf16.mxu1 %v9312_v26 }
0x19f5   :  { %8072 = vmatpush3.bf16.msra.mxu1 %v11547_v28 }
0x19f6   :  { %8073 = vmatprep.subr.bf16.mxu1 %v9312_v26 }
0x19f9   :  { %8074 = vmatpush3.bf16.msra.mxu1 %v11554_v22 }
0x19fa   :  { %8075 = vmatprep.subr.bf16.mxu1 %v9312_v26 }
0x19fd   :  { %8076 = vmatpush3.bf16.msra.mxu1 %v11561_v13 }
0x19fe   :  { %8101 = vmatprep.subr.bf16.mxu1 %v9312_v26 }
0x1ab3   :  { %v6521_v6 = vpop.f32.mrb[80].mxu0  ;;  %v6564_v35 = vpop.f32.mrb[80].mxu1 }
0x1ab4   :  { %v8225_v44 = vadd.f32 %v6521_v6, %v11568_v38  ;;  %v6523_v25 = vpop.f32.mrb[81].mxu0  ;;  %v6566_v10 = vpop.f32.mrb[81].mxu1  ;;  %v8233_v50 = vadd.f32 %v6564_v35, %v11588_v19  ;;  %v8660_v6 = vld [vmem:[%s11738_s14 + $0x10] sm:$0xff]  }
0x1ab5   :  { %v8226_v17 = vadd.f32 %v6523_v25, %v11572_v15  ;;  %v6525_v59 = vpop.f32.mrb[82].mxu0  ;;  %v6568_v5 = vpop.f32.mrb[82].mxu1  ;;  %v8234_v57 = vadd.f32 %v6566_v10, %v11592_v60  ;;  %v8661_v25 = vld [vmem:[%s11738_s14 + $0x18] sm:$0xff]  }
0x1ab6   :  { %v7581_v18 = vmul.f32 -1.442695, %v8225_v44  ;;  %v8227_v53 = vadd.f32 %v6525_v59, %v11568_v38  ;;  %v6527_v28 = vpop.f32.mrb[83].mxu0  ;;  %v6570_v22 = vpop.f32.mrb[83].mxu1  ;;  %v8235_v38 = vadd.f32 %v6568_v5, %v11588_v19  ;;  %v8662_v59 = vld [vmem:[%s11738_s14 + $0x20] sm:$0xff]   ;;  %v8663_v5 = vld [vmem:[%s11738_s14 + $0x28] sm:$0xff]  }
0x1ab7   :  { %v7583_v24 = vmul.f32 -1.442695, %v8226_v17  ;;  %v8228_v13 = vadd.f32 %v6527_v28, %v11572_v15  ;;  %v7585_v14 = vmul.f32 -1.442695, %v8234_v57  ;;  %v8236_v45 = vadd.f32 %v6570_v22, %v11592_v60 }
0x1ab8   :  { %9150 = vpow2.f32 %v7581_v18  ;;  %v7582_v37 = vmul.f32 -1.442695, %v8227_v53  ;;  %v8665_v18 = vld [vmem:[%s11738_s14 + $0x38] sm:$0xff]   ;;  %v8667_v53 = vld [vmem:[%s11740_s16 + $0x8] sm:$0xff]   ;;  %v3403_v28 = vrot.slane %v11235_v40, 4 }
0x1ab9   :  { %9152 = vpow2.f32 %v7583_v24  ;;  %v7584_v0 = vmul.f32 -1.442695, %v8228_v13  ;;  %v7586_v15 = vmul.f32 -1.442695, %v8236_v45  ;;  %v3410_v24 = vrot.slane %v11253_v56, 4 }
0x1aba   :  { %9154 = vpow2.f32 %v7582_v37  ;;  %v3404_v22 = vadd.f32 %v3403_v28, %v11235_v40 }
0x1abb   :  { %9156 = vpow2.f32 %v7584_v0  ;;  %v3411_v0 = vadd.f32 %v3410_v24, %v11253_v56 }
0x1abc   :  { %9158 = vtanh.f32 %v8233_v50  ;;  %v3405_v37 = vrot.slane %v3404_v22, 2 }
0x1abd   :  { %9160 = vpow2.f32 %v7585_v14 }
0x1abe   :  { %9162 = vtanh.f32 %v8235_v38 }
0x1ac2   :  { %v9151_v49 = vpop.eup %9150 }
0x1ac3   :  { %v9153_v4 = vpop.eup %9152  ;;  %v6587_v46 = vadd.f32 1.0, %v9151_v49  ;;  %v3406_v49 = vadd.f32 %v3405_v37, %v3404_v22 }
0x1ac4   :  { %v6599_v48 = vadd.f32 1.0, %v9153_v4  ;;  %v9155_v33 = vpop.eup %9154  ;;  %v3412_v4 = vrot.slane %v3411_v0, 2 }
0x1ac5   :  { %9164 = vrcp.f32 %v6587_v46  ;;  %v6588_v27 = vadd.f32 1.0, %v9155_v33  ;;  %v9157_v30 = vpop.eup %9156 }
0x1ac6   :  { %9166 = vrcp.f32 %v6599_v48  ;;  %v6600_v20 = vadd.f32 1.0, %v9157_v30  ;;  %v9159_v60 = vpop.eup %9158  ;;  %v3413_v30 = vadd.f32 %v3412_v4, %v3411_v0 }
0x1ac7   :  { %9168 = vpow2.f32 %v7586_v15  ;;  %v9161_v41 = vpop.eup %9160 }
0x1ac8   :  { %9170 = vrcp.f32 %v6588_v27  ;;  %v9163_v19 = vpop.eup %9162  ;;  %v6613_v12 = vadd.f32 1.0, %v9161_v41  ;;  %v3407_v27 = vrot.slane %v3406_v49, 1 }
0x1ac9   :  { %9172 = vrcp.f32 %v6600_v20 }
0x1aca   :  { %9174 = vrcp.f32 %v6613_v12  ;;  %v3408_v41 = vadd.f32 %v3407_v27, %v3406_v49 }
0x1acf   :  { %v9165_v21 = vpop.eup %9164 }
0x1ad0   :  { %v9167_v58 = vpop.eup %9166  ;;  %v6621_v23 = vmul.f32 %v9165_v21, %v9159_v60 }
0x1ad1   :  { %v9169_v29 = vpop.eup %9168  ;;  %v6619_v36 = vmul.f32 %v9167_v58, %v11598_v31  ;;  %v8658_v31 = vld [vmem:[%s11738_s14] sm:$0xff]  }
0x1ad2   :  { %v9171_v9 = vpop.eup %9170  ;;  %v6614_v3 = vadd.f32 1.0, %v9169_v29  ;;  %8082 = vmatpush3.bf16.msra.mxu0 %v8658_v31  ;;  %v3417_v29 = vmul.f32 0.0625, %v3408_v41 }
0x1ad3   :  { %v6623_v43 = vadd.f32 %v6621_v23, %v6619_v36  ;;  %v6622_v7 = vmul.f32 %v9171_v9, %v9163_v19  ;;  %v9173_v47 = vpop.eup %9172  ;;  %8083 = vmatprep.subr.bf16.mxu0 %v9312_v26  ;;  %v3414_v19 = vrot.slane %v3413_v30, 1 }
0x1ad4   :  { %v6620_v34 = vmul.f32 %v9173_v47, %v11601_v32  ;;  %v9175_v8 = vpop.eup %9174  ;;  %v8659_v32 = vld [vmem:[%s11738_s14 + $0x8] sm:$0xff]  }
0x1ad5   :  { %9176 = vtanh.f32 %v6623_v43  ;;  %v3415_v36 = vadd.f32 %v3414_v19, %v3413_v30 }
0x1ad6   :  { %v6624_v39 = vadd.f32 %v6622_v7, %v6620_v34  ;;  %9178 = vrcp.f32 %v6614_v3  ;;  %8084 = vmatpush3.bf16.msra.mxu0 %v8659_v32 }
0x1ad7   :  { %8085 = vmatprep.subr.bf16.mxu0 %v9312_v26  ;;  %v3418_v7 = vmul.f32 0.0625, %v3415_v36 }
0x1ad8   :  { %9180 = vtanh.f32 %v6624_v39 }
0x1ada   :  { %8086 = vmatpush3.bf16.msra.mxu0 %v8660_v6 }
0x1adb   :  { %8087 = vmatprep.subr.bf16.mxu0 %v9312_v26 }
0x1ade   :  { %8088 = vmatpush3.bf16.msra.mxu0 %v8661_v25 }
0x1adf   :  { %v9177_v62 = vpop.eup %9176  ;;  %8089 = vmatprep.subr.bf16.mxu0 %v9312_v26 }
0x1ae0   :  { %v6627_v54 = vmul.f32 %v9177_v62, %v9175_v8  ;;  %v9179_v51 = vpop.eup %9178 }
0x1ae2   :  { %v9181_v11 = vpop.eup %9180  ;;  %8090 = vmatpush3.bf16.msra.mxu0 %v8662_v59 }
0x1ae3   :  { %v6628_v1 = vmul.f32 %v9181_v11, %v9179_v51  ;;  %8091 = vmatprep.subr.bf16.mxu0 %v9312_v26  ;;  %v8668_v11 = vld [vmem:[%s11740_s16 + $0x10] sm:$0xff]  }
0x1ae5   :  { %v6629_v52 = vpack.c.bf16 %v6628_v1, %v6627_v54  ;;  %v8669_v1 = vld [vmem:[%s11740_s16 + $0x18] sm:$0xff]  }
0x1ae6   :  { %8092 = vmatpush3.bf16.msra.mxu0 %v8663_v5 }
0x1ae7   :  { %8078 = vmatmul.mubr.bf16.vlgmr.msra.gmra.mrb[92].mxu1 %v6629_v52  ;;  %8093 = vmatprep.subr.bf16.mxu0 %v9312_v26  ;;  %v7587_v52 = vld [vmem:[%s11739_s15] ss:$0 sm:$0xff] }
0x1ae8   :  { %8109 = vmatprep.mubr.msk.bf16.mxu1 %vm9313_vm1, %v9312_v26 }
0x1bba   :  { %v6664_v35 = vpop.f32.mrb[92].mxu1 }
0x1bbb   :  { %6675 = vrot.lane.b32.xlu0 %v6664_v35, %s9314_s30  ;;  %v8079_v44 = vpop.f32.mrb[93].mxu1 }
0x1bbc   :  { %v6667_v10 = vpop.f32.mrb[94].mxu1 }
0x1bbd   :  { %6677 = vrot.lane.b32.xlu1 %v6667_v10, %s9314_s30  ;;  %v8080_v17 = vpop.f32.mrb[95].mxu1 }
0x1bbf   :  { %6679 = vrot.lane.b32.xlu0 %v11613_v16, %s9314_s30  ;;  %v8664_v16 = vld [vmem:[%s11738_s14 + $0x30] sm:$0xff]  }
0x1bc0   :  { %8094 = vmatpush3.bf16.msra.mxu0 %v8664_v16 }
0x1bc1   :  { %6681 = vrot.lane.b32.xlu1 %v11615_v61, %s9314_s30  ;;  %8095 = vmatprep.subr.bf16.mxu0 %v9312_v26  ;;  %v8666_v61 = vld [vmem:[%s11740_s16] sm:$0xff]  }
0x1bc2   :  { %8102 = vmatpush3.bf16.msra.mxu1 %v8666_v61 }
0x1bc3   :  { %8103 = vmatprep.subr.bf16.mxu1 %v9312_v26 }
0x1bc4   :  { %8096 = vmatpush3.bf16.msra.mxu0 %v8665_v18 }
0x1bc6   :  { %8104 = vmatpush3.bf16.msra.mxu1 %v8667_v53 }
0x1bc7   :  { %8105 = vmatprep.subr.bf16.mxu1 %v9312_v26 }
0x1bca   :  { %8106 = vmatpush3.bf16.msra.mxu1 %v8668_v11 }
0x1bcb   :  { %8107 = vmatprep.subr.bf16.mxu1 %v9312_v26  ;;  %v7596_v26 = vld [vmem:[#allocation2] ss:$0 sm:$0xff] }
0x1bce   :  { %8108 = vmatpush3.bf16.msra.mxu1 %v8669_v1 }
0x1c2d   :  { %v6676_v13 = vpop.permute.xlu0 %6675 }
0x1c2e   :  { %v6687_v50 = vsel %vm366_vm0, %v11433_v2, %v6676_v13 }
0x1c2f   :  { %v6678_v57 = vpop.permute.xlu1 %6677 }
0x1c30   :  { %v6688_v14 = vsel %vm366_vm0, %v11435_v42, %v6678_v57 }
0x1c31   :  { %v6691_v45 = vadd.f32 %v6688_v14, %v6687_v50  ;;  %v6680_v38 = vpop.permute.xlu0 %6679 }
0x1c32   :  { %v6689_v40 = vsel %vm366_vm0, %v11582_v55, %v6680_v38 }
0x1c33   :  { %v6692_v46 = vrot.slane %v6691_v45, 4  ;;  %v6682_v15 = vpop.permute.xlu1 %6681 }
0x1c34   :  { %v6690_v48 = vsel %vm366_vm0, %v11584_v63, %v6682_v15 }
0x1c35   :  { %v6693_v56 = vadd.f32 %v6692_v46, %v6691_v45  ;;  %v6698_v33 = vadd.f32 %v6690_v48, %v6689_v40 }
0x1c37   :  { %v6694_v2 = vrot.slane %v6693_v56, 2  ;;  %v6699_v20 = vrot.slane %v6698_v33, 4 }
0x1c39   :  { %v6695_v60 = vadd.f32 %v6694_v2, %v6693_v56  ;;  %v6700_v42 = vadd.f32 %v6699_v20, %v6698_v33 }
0x1c3b   :  { %v6696_v21 = vrot.slane %v6695_v60, 1  ;;  %v6701_v58 = vrot.slane %v6700_v42, 2 }
0x1c3d   :  { %v6697_v23 = vadd.f32 %v6696_v21, %v6695_v60  ;;  %v6702_v12 = vadd.f32 %v6701_v58, %v6700_v42 }
0x1c3f   :  { %v6705_v55 = vmul.f32 0.0625, %v6697_v23  ;;  %v6703_v9 = vrot.slane %v6702_v12, 1 }
0x1c41   :  { %v6707_v43 = vmul.f32 %v6705_v55, %v3417_v29  ;;  %v6704_v63 = vadd.f32 %v6703_v9, %v6702_v12 }
0x1c43   :  { %v6706_v47 = vmul.f32 0.0625, %v6704_v63  ;;  %v6725_v3 = vpack.c.bf16 %v6707_v43, %v6707_v43 }
0x1c45   :  { %v6708_v34 = vmul.f32 %v6706_v47, %v3418_v7  ;;  %v6736_v8 = vunpack.c.l.b16 %v6725_v3 }
0x1c47   :  { %v6726_v39 = vpack.c.bf16 %v6708_v34, %v6708_v34 }
0x1c49   :  { %v6737_v62 = vunpack.c.l.b16 %v6726_v39 }
0x1c4b   :  { %v6739_v54 = vsel %vm6738_vm2, %v6737_v62, %v6736_v8 }
0x1c4c   :  { %v6740_v51 = vpack.c.b16 %v6739_v54, %v6739_v54 }
0x1c4e   :  { %8098 = vmatmul.mubr.bf16.vlgmr.msra.gmra.mrb[96].mxu0 %v6740_v51 }
0x1d21   :  { %v6824_v31 = vpop.f32.mrb[96].mxu0 }
0x1d22   :  { %v6825_v32 = vadd.f32 %v7587_v52, %v6824_v31  ;;  %v8099_v6 = vpop.f32.mrb[97].mxu0 }
0x1d23   :  { %v6827_v35 = vpop.f32.mrb[98].mxu0 }
0x1d24   :  { %vm6830_vm3 = vcmp.gt.f32.partialorder %v6825_v32, 0.0  ;;  %v6831_v44 = vmul.f32 0.01, %v6825_v32  ;;  %v8100_v25 = vpop.f32.mrb[99].mxu0 }
0x1d26   :  { %v6832_v10 = vsel %vm6830_vm3, %v6825_v32, %v6831_v44 }
0x1d27   :  { %v6841_v17 = vpack.c.bf16 %v6832_v10, %v6832_v10 }
0x1d29   :  { %8110 = vmatmul.mubr.msk.bf16.vlgmr.msra.gmra.mrb[96].mxu1 %vm366_vm0, %v6841_v17 }
0x1dfc   :  { %v6910_v59 = vpop.f32.mrb[96].mxu1 }
0x1dfd   :  { %v6911_v5 = vadd.f32 %v7596_v26, %v6910_v59  ;;  %v8111_v16 = vpop.f32.mrb[97].mxu1 }
0x1dfe   :  { %v6913_v18 = vpop.f32.mrb[98].mxu1 }
0x1dff   :  { %v7602_v61 = vmul.f32 -1.442695, %v6911_v5  ;;  %v8112_v53 = vpop.f32.mrb[99].mxu1 }
0x1e01   :  { %9182 = vpow2.f32 %v7602_v61 }
0x1e0b   :  { %v9183_v28 = vpop.eup %9182 }
0x1e0c   :  { %v6919_v22 = vadd.f32 1.0, %v9183_v28 }
0x1e0e   :  { %9184 = vrcp.f32 %v6919_v22 }
0x1e18   :  { %v9185_v24 = vpop.eup %9184 }
0x1e19   :  { %6923 = vst.msk [vmem:[%s11742_s18] sm:$0x3] %vm6922_vm4, %v9185_v24 }
0x1e1a   :  { %6928 = vsyncpa [#allocation4], 1 }
0x1e1b   :  { %6929 = vsyncpa [#allocation6], 1 }
0x1e1c   :  { %6930 = vsyncpa [#allocation9], 1 }

</bundles_post_ra>
